<compile_context>
chip_gen: v5e
topology: v5e:2x2
jax: 0.10.0
libtpu: 0.0.40
codegen_flags: <defaults>
</compile_context>

<pallas_src>
import functools

import jax
import jax.numpy as jnp
from jax.experimental import pallas as pl
from jax.experimental.pallas import tpu as pltpu

_LANE = 128
_MXU_M = 256   # preferred batch-tile granularity for v6e/v7x MXU passes


def _round_up(a, m):
    return (a + m - 1) // m * m


def _cdiv(a, b):
    return -(-a // b)


def _to(v, dt):
    return v if v.dtype == dt else v.astype(dt)


def _sigmoid(z, act_dtype):
    # sigmoid(z) = 0.5 * tanh(0.5 * z) + 0.5  -> a single EUP transcendental.
    z = _to(z, act_dtype)
    half = jnp.asarray(0.5, act_dtype)
    return half * jnp.tanh(half * z) + half


def _device_kind():
    try:
        return jax.devices()[0].device_kind.lower()
    except Exception:
        return ""


def mlp3_kernel(x_ref, w1_ref, b1_ref, w2_ref, b2_ref, w3_ref, b3_ref,
                w4_ref, b4_ref, o_ref, *, mxu_dtype, act_dtype, n_chunks):
    """One batch tile: fused fc1+sig, fc2+sig, fc3+sig, fc4.

    The tile is processed as `n_chunks` independent row sub-chunks (static
    unroll) so MXU work of one chunk overlaps EUP work of another.
    """
    w1 = w1_ref[...]
    w2 = w2_ref[...]
    w3 = w3_ref[...]
    w4 = w4_ref[...]
    b1 = b1_ref[...]
    b2 = b2_ref[...]
    b3 = b3_ref[...]
    b4 = b4_ref[...]

    rows = x_ref.shape[0] // n_chunks
    for c in range(n_chunks):                      # static -> fully unrolled
        sl = pl.ds(c * rows, rows)
        x = _to(x_ref[sl, :], mxu_dtype)
        h = _sigmoid(jnp.dot(x, w1, preferred_element_type=jnp.float32) + b1,
                     act_dtype)
        h = _sigmoid(jnp.dot(_to(h, mxu_dtype), w2,
                             preferred_element_type=jnp.float32) + b2,
                     act_dtype)
        h = _sigmoid(jnp.dot(_to(h, mxu_dtype), w3,
                             preferred_element_type=jnp.float32) + b3,
                     act_dtype)
        out = jnp.dot(_to(h, mxu_dtype), w4,
                      preferred_element_type=jnp.float32) + b4
        o_ref[sl, :] = out.astype(o_ref.dtype)


def prepare_mlp3_params(params, *, use_bf16=True):
    """Hoists per-call weight prep (transpose to (in,out), bf16 cast, lane-pad
    of fc4) out of the forward hot path.  Call once, reuse across forwards."""
    w1, b1, w2, b2, w3, b3, w4, b4 = params
    mxu_dtype = jnp.bfloat16 if use_bf16 else jnp.float32
    h1, h2, h3 = w1.shape[0], w2.shape[0], w3.shape[0]
    out_dim = w4.shape[0]
    out_pad = _round_up(out_dim, _LANE)        # lane-dense output: unmasked vst

    w1t = _to(jnp.asarray(w1).T, mxu_dtype)
    w2t = _to(jnp.asarray(w2).T, mxu_dtype)
    w3t = _to(jnp.asarray(w3).T, mxu_dtype)
    w4t = jnp.zeros((h3, out_pad), mxu_dtype).at[:, :out_dim].set(
        _to(jnp.asarray(w4).T, mxu_dtype))
    b1r = jnp.asarray(b1, jnp.float32).reshape(1, h1)
    b2r = jnp.asarray(b2, jnp.float32).reshape(1, h2)
    b3r = jnp.asarray(b3, jnp.float32).reshape(1, h3)
    b4r = jnp.zeros((1, out_pad), jnp.float32).at[:, :out_dim].set(
        jnp.asarray(b4, jnp.float32).reshape(1, out_dim))

    return {
        "tensors": (w1t, b1r, w2t, b2r, w3t, b3r, w4t, b4r),
        "mxu_dtype": mxu_dtype,
        "dims": (h1, h2, h3),
        "out_dim": out_dim,
        "out_pad": out_pad,
    }


def _choose_tile(B, batch_tile, n_tc):
    tile_cap = _round_up(max(batch_tile, 8), 8)
    if n_tc > 1 and B > 8:
        # v7x: guarantee >= 2 grid steps per TensorCore, MXU-aligned tiles.
        tile_cap = min(tile_cap,
                       max(_MXU_M, _round_up(_cdiv(B, 2 * n_tc), _MXU_M)))
    return max(8, min(tile_cap, _round_up(B, 8)))


def _pick_chunks(tile):
    # 128-256 row sub-chunks: enough rows to keep the MXU efficient, few enough
    # chains to bound vreg/VMEM-temp pressure.
    for n in (4, 2):
        if tile % n == 0 and (tile // n) % 8 == 0 and (tile // n) >= 128:
            return n
    return 1


def mlp3_apply(x, prep, *, input_size, batch_tile=1024):
    """Runs MLP3.forward on prepared params.  x may be any shape with a leading
    batch; it is flattened to (-1, input_size) like `x.view(-1, input_size)`."""
    kind = _device_kind()
    n_tc = 2 if "v7" in kind else 1                  # v7x: 2 TensorCores/chip
    bf16_eup = ("v6" in kind) or ("v7" in kind)      # bf16 VALU/EUP (not v5e)

    mxu_dtype = prep["mxu_dtype"]
    act_dtype = (jnp.bfloat16
                 if (bf16_eup and mxu_dtype == jnp.bfloat16) else jnp.float32)
    h1, h2, h3 = prep["dims"]
    out_dim, out_pad = prep["out_dim"], prep["out_pad"]

    x2d = _to(jnp.asarray(x).reshape(-1, input_size), mxu_dtype)
    B = x2d.shape[0]
    tile = _choose_tile(B, batch_tile, n_tc)
    Bp = _round_up(B, tile)
    if Bp != B:
        x2d = jnp.pad(x2d, ((0, Bp - B), (0, 0)))
    n_chunks = _pick_chunks(tile)

    resident = lambda i: (0, 0)   # weights/biases resident across batch tiles

    out = pl.pallas_call(
        functools.partial(mlp3_kernel, mxu_dtype=mxu_dtype,
                          act_dtype=act_dtype, n_chunks=n_chunks),
        out_shape=jax.ShapeDtypeStruct((Bp, out_pad), jnp.float32),
        grid_spec=pltpu.PrefetchScalarGridSpec(
            num_scalar_prefetch=0,
            grid=(Bp // tile,),
            in_specs=[
                pl.BlockSpec((tile, input_size), lambda i: (i, 0)),
                pl.BlockSpec((input_size, h1), resident),
                pl.BlockSpec((1, h1), resident),
                pl.BlockSpec((h1, h2), resident),
                pl.BlockSpec((1, h2), resident),
                pl.BlockSpec((h2, h3), resident),
                pl.BlockSpec((1, h3), resident),
                pl.BlockSpec((h3, out_pad), resident),
                pl.BlockSpec((1, out_pad), resident),
            ],
            out_specs=pl.BlockSpec((tile, out_pad), lambda i: (i, 0)),
        ),
        compiler_params=pltpu.CompilerParams(
            dimension_semantics=("parallel",),
            vmem_limit_bytes=32 * 1024 * 1024,   # headroom for 1024-row tiles,
        ),                                       # still well under v7x's 64 MiB
    )(x2d, *prep["tensors"])

    # drop batch padding and the zero-padded output lanes
    return out[:B, :out_dim]


def mlp3_forward(x, params, *, input_size, use_bf16=True, batch_tile=1024):
    """Convenience: prep + apply in one call (prep is the cold path)."""
    prep = prepare_mlp3_params(params, use_bf16=use_bf16)
    return mlp3_apply(x, prep, input_size=input_size, batch_tile=batch_tile)


def init_mlp3_params(key, input_size, hidden_nodes=(1024, 512, 512), out_dim=10):
    """Deterministic init mimicking nn.Linear's U(-1/sqrt(fan_in), 1/sqrt(fan_in)).
    Weights kept in PyTorch (out_features, in_features) layout."""
    dims = [(hidden_nodes[0], input_size),
            (hidden_nodes[1], hidden_nodes[0]),
            (hidden_nodes[2], hidden_nodes[1]),
            (out_dim, hidden_nodes[2])]
    params = []
    for (fo, fi) in dims:
        key, kw, kb = jax.random.split(key, 3)
        bound = 1.0 / jnp.sqrt(jnp.float32(fi))
        w = jax.random.uniform(kw, (fo, fi), jnp.float32, -bound, bound)
        b = jax.random.uniform(kb, (fo,), jnp.float32, -bound, bound)
        params += [w, b]
    return tuple(params)


if __name__ == "__main__":
    # NCHW "image" batch flattened to input_size = C*H*W = 1*8*8 = 64;
    # hidden_nodes are the MLP3 defaults [1024, 512, 512], out_dim = 10.
    batch, C, H, W = 2, 1, 8, 8
    input_size = C * H * W
    hidden_nodes = (1024, 512, 512)

    key = jax.random.PRNGKey(0)
    key, kx, kx2 = jax.random.split(key, 3)
    x = jax.random.normal(kx, (batch, C, H, W), jnp.float32)
    params = init_mlp3_params(key, input_size, hidden_nodes)

    # pure-JAX reference (same math as the PyTorch forward)
    def ref_fwd(xin):
        w1, b1, w2, b2, w3, b3, w4, b4 = params
        r = xin.reshape(-1, input_size)
        r = jax.nn.sigmoid(r @ w1.T + b1)
        r = jax.nn.sigmoid(r @ w2.T + b2)
        r = jax.nn.sigmoid(r @ w3.T + b3)
        return r @ w4.T + b4

    # weight prep hoisted out of the hot path and reused across calls
    prep = prepare_mlp3_params(params, use_bf16=True)

    # 1) small batch, default bf16 MXU path
    out = jax.block_until_ready(mlp3_apply(x, prep, input_size=input_size))
    ref = ref_fwd(x)
    assert out.shape == (batch, 10), out.shape
    assert jnp.allclose(out, ref, atol=5e-2, rtol=5e-2), "bf16 small-batch mismatch"

    # 2) larger batch: multi-chunk MXU/EUP interleave (and multi-step grid on v7x)
    xb = jax.random.normal(kx2, (1024, C, H, W), jnp.float32)
    outb = jax.block_until_ready(mlp3_apply(xb, prep, input_size=input_size))
    refb = ref_fwd(xb)
    assert outb.shape == (1024, 10), outb.shape
    assert jnp.allclose(outb, refb, atol=5e-2, rtol=5e-2), "bf16 large-batch mismatch"

    # 3) f32 MXU fallback path (kept for accuracy-sensitive callers)
    outf = jax.block_until_ready(
        mlp3_forward(xb, params, input_size=input_size, use_bf16=False))
    assert jnp.allclose(outf, refb, atol=2e-2, rtol=2e-2), "f32 path mismatch"

    print("KERNEL_OK")
</pallas_src>

<mosaic_0001>
module attributes {stable_mosaic.version = 11 : i64} {
  func.func @mlp3_kernel(%arg0: i32, %arg1: memref<8x64xbf16, #tpu.memory_space<vmem>>, %arg2: memref<64x1024xbf16, #tpu.memory_space<vmem>>, %arg3: memref<1x1024xf32, #tpu.memory_space<vmem>>, %arg4: memref<1024x512xbf16, #tpu.memory_space<vmem>>, %arg5: memref<1x512xf32, #tpu.memory_space<vmem>>, %arg6: memref<512x512xbf16, #tpu.memory_space<vmem>>, %arg7: memref<1x512xf32, #tpu.memory_space<vmem>>, %arg8: memref<512x128xbf16, #tpu.memory_space<vmem>>, %arg9: memref<1x128xf32, #tpu.memory_space<vmem>>, %arg10: memref<8x128xf32, #tpu.memory_space<vmem>>) attributes {dimension_semantics = [#tpu.dimension_semantics<parallel>], iteration_bounds = array<i64: 1>, scalar_prefetch = 0 : i64, scratch_operands = 0 : i64, tpu.core_type = #tpu.core_type<tc>, window_params = [{transform_indices = @transform_0, window_bounds = array<i64: 8, 64>}, {pipeline_mode = #tpu.pipeline_mode<synchronous>, transform_indices = @transform_1, window_bounds = array<i64: 64, 1024>}, {pipeline_mode = #tpu.pipeline_mode<synchronous>, transform_indices = @transform_2, window_bounds = array<i64: 1, 1024>}, {pipeline_mode = #tpu.pipeline_mode<synchronous>, transform_indices = @transform_3, window_bounds = array<i64: 1024, 512>}, {pipeline_mode = #tpu.pipeline_mode<synchronous>, transform_indices = @transform_4, window_bounds = array<i64: 1, 512>}, {pipeline_mode = #tpu.pipeline_mode<synchronous>, transform_indices = @transform_5, window_bounds = array<i64: 512, 512>}, {pipeline_mode = #tpu.pipeline_mode<synchronous>, transform_indices = @transform_6, window_bounds = array<i64: 1, 512>}, {pipeline_mode = #tpu.pipeline_mode<synchronous>, transform_indices = @transform_7, window_bounds = array<i64: 512, 128>}, {pipeline_mode = #tpu.pipeline_mode<synchronous>, transform_indices = @transform_8, window_bounds = array<i64: 1, 128>}, {transform_indices = @transform_9, window_bounds = array<i64: 8, 128>}]} {
    %c0 = arith.constant 0 : index
    %c0_0 = arith.constant 0 : index
    %0 = vector.load %arg2[%c0, %c0_0] : memref<64x1024xbf16, #tpu.memory_space<vmem>>, vector<64x1024xbf16>
    %c0_1 = arith.constant 0 : index
    %c0_2 = arith.constant 0 : index
    %1 = vector.load %arg4[%c0_1, %c0_2] : memref<1024x512xbf16, #tpu.memory_space<vmem>>, vector<1024x512xbf16>
    %c0_3 = arith.constant 0 : index
    %c0_4 = arith.constant 0 : index
    %2 = vector.load %arg6[%c0_3, %c0_4] : memref<512x512xbf16, #tpu.memory_space<vmem>>, vector<512x512xbf16>
    %c0_5 = arith.constant 0 : index
    %c0_6 = arith.constant 0 : index
    %3 = vector.load %arg8[%c0_5, %c0_6] : memref<512x128xbf16, #tpu.memory_space<vmem>>, vector<512x128xbf16>
    %c0_7 = arith.constant 0 : index
    %c0_8 = arith.constant 0 : index
    %4 = vector.load %arg3[%c0_7, %c0_8] : memref<1x1024xf32, #tpu.memory_space<vmem>>, vector<1x1024xf32>
    %c0_9 = arith.constant 0 : index
    %c0_10 = arith.constant 0 : index
    %5 = vector.load %arg5[%c0_9, %c0_10] : memref<1x512xf32, #tpu.memory_space<vmem>>, vector<1x512xf32>
    %c0_11 = arith.constant 0 : index
    %c0_12 = arith.constant 0 : index
    %6 = vector.load %arg7[%c0_11, %c0_12] : memref<1x512xf32, #tpu.memory_space<vmem>>, vector<1x512xf32>
    %c0_13 = arith.constant 0 : index
    %c0_14 = arith.constant 0 : index
    %7 = vector.load %arg9[%c0_13, %c0_14] : memref<1x128xf32, #tpu.memory_space<vmem>>, vector<1x128xf32>
    %c0_15 = arith.constant 0 : index
    %c0_16 = arith.constant 0 : index
    %8 = vector.load %arg1[%c0_15, %c0_16] : memref<8x64xbf16, #tpu.memory_space<vmem>>, vector<8x64xbf16>
    %cst = arith.constant dense<0.000000e+00> : vector<8x1024xf32>
    %9 = tpu.matmul %8, %0, %cst {dimension_numbers = #tpu.dot_dimension_numbers<[1], [0], [0], [1], [0, 0, 1, 1], [], []>} : vector<8x64xbf16>, vector<64x1024xbf16>, vector<8x1024xf32> -> vector<8x1024xf32>
    %10 = vector.broadcast %4 : vector<1x1024xf32> to vector<8x1024xf32>
    %11 = arith.addf %9, %10 : vector<8x1024xf32>
    %cst_17 = arith.constant 5.000000e-01 : f32
    %12 = vector.broadcast %cst_17 : f32 to vector<8x1024xf32>
    %13 = arith.mulf %12, %11 : vector<8x1024xf32>
    %14 = math.tanh %13 : vector<8x1024xf32>
    %cst_18 = arith.constant 5.000000e-01 : f32
    %15 = vector.broadcast %cst_18 : f32 to vector<8x1024xf32>
    %16 = arith.mulf %15, %14 : vector<8x1024xf32>
    %cst_19 = arith.constant 5.000000e-01 : f32
    %17 = vector.broadcast %cst_19 : f32 to vector<8x1024xf32>
    %18 = arith.addf %16, %17 : vector<8x1024xf32>
    %19 = arith.truncf %18 : vector<8x1024xf32> to vector<8x1024xbf16>
    %cst_20 = arith.constant dense<0.000000e+00> : vector<8x512xf32>
    %20 = tpu.matmul %19, %1, %cst_20 {dimension_numbers = #tpu.dot_dimension_numbers<[1], [0], [0], [1], [0, 0, 1, 1], [], []>} : vector<8x1024xbf16>, vector<1024x512xbf16>, vector<8x512xf32> -> vector<8x512xf32>
    %21 = vector.broadcast %5 : vector<1x512xf32> to vector<8x512xf32>
    %22 = arith.addf %20, %21 : vector<8x512xf32>
    %cst_21 = arith.constant 5.000000e-01 : f32
    %23 = vector.broadcast %cst_21 : f32 to vector<8x512xf32>
    %24 = arith.mulf %23, %22 : vector<8x512xf32>
    %25 = math.tanh %24 : vector<8x512xf32>
    %cst_22 = arith.constant 5.000000e-01 : f32
    %26 = vector.broadcast %cst_22 : f32 to vector<8x512xf32>
    %27 = arith.mulf %26, %25 : vector<8x512xf32>
    %cst_23 = arith.constant 5.000000e-01 : f32
    %28 = vector.broadcast %cst_23 : f32 to vector<8x512xf32>
    %29 = arith.addf %27, %28 : vector<8x512xf32>
    %30 = arith.truncf %29 : vector<8x512xf32> to vector<8x512xbf16>
    %cst_24 = arith.constant dense<0.000000e+00> : vector<8x512xf32>
    %31 = tpu.matmul %30, %2, %cst_24 {dimension_numbers = #tpu.dot_dimension_numbers<[1], [0], [0], [1], [0, 0, 1, 1], [], []>} : vector<8x512xbf16>, vector<512x512xbf16>, vector<8x512xf32> -> vector<8x512xf32>
    %32 = vector.broadcast %6 : vector<1x512xf32> to vector<8x512xf32>
    %33 = arith.addf %31, %32 : vector<8x512xf32>
    %cst_25 = arith.constant 5.000000e-01 : f32
    %34 = vector.broadcast %cst_25 : f32 to vector<8x512xf32>
    %35 = arith.mulf %34, %33 : vector<8x512xf32>
    %36 = math.tanh %35 : vector<8x512xf32>
    %cst_26 = arith.constant 5.000000e-01 : f32
    %37 = vector.broadcast %cst_26 : f32 to vector<8x512xf32>
    %38 = arith.mulf %37, %36 : vector<8x512xf32>
    %cst_27 = arith.constant 5.000000e-01 : f32
    %39 = vector.broadcast %cst_27 : f32 to vector<8x512xf32>
    %40 = arith.addf %38, %39 : vector<8x512xf32>
    %41 = arith.truncf %40 : vector<8x512xf32> to vector<8x512xbf16>
    %cst_28 = arith.constant dense<0.000000e+00> : vector<8x128xf32>
    %42 = tpu.matmul %41, %3, %cst_28 {dimension_numbers = #tpu.dot_dimension_numbers<[1], [0], [0], [1], [0, 0, 1, 1], [], []>} : vector<8x512xbf16>, vector<512x128xbf16>, vector<8x128xf32> -> vector<8x128xf32>
    %43 = vector.broadcast %7 : vector<1x128xf32> to vector<8x128xf32>
    %44 = arith.addf %42, %43 : vector<8x128xf32>
    %c0_29 = arith.constant 0 : index
    %c0_30 = arith.constant 0 : index
    %45 = vector.load %arg10[%c0_29, %c0_30] : memref<8x128xf32, #tpu.memory_space<vmem>>, vector<8x128xf32>
    tpu.vector_store %arg10[%c0_29, %c0_30], %44 {strides = array<i32>} : memref<8x128xf32, #tpu.memory_space<vmem>>, vector<8x128xf32>,
    return
  }
  func.func @transform_0(%arg0: i32) -> (i32, i32) {
    %c0_i32 = arith.constant 0 : i32
    %c0_i32_0 = arith.constant 0 : i32
    return %arg0, %c0_i32 : i32, i32
  }
  func.func @transform_1(%arg0: i32) -> (i32, i32) {
    %c0_i32 = arith.constant 0 : i32
    %c0_i32_0 = arith.constant 0 : i32
    %c0_i32_1 = arith.constant 0 : i32
    return %c0_i32, %c0_i32_0 : i32, i32
  }
  func.func @transform_2(%arg0: i32) -> (i32, i32) {
    %c0_i32 = arith.constant 0 : i32
    %c0_i32_0 = arith.constant 0 : i32
    %c0_i32_1 = arith.constant 0 : i32
    return %c0_i32, %c0_i32_0 : i32, i32
  }
  func.func @transform_3(%arg0: i32) -> (i32, i32) {
    %c0_i32 = arith.constant 0 : i32
    %c0_i32_0 = arith.constant 0 : i32
    %c0_i32_1 = arith.constant 0 : i32
    return %c0_i32, %c0_i32_0 : i32, i32
  }
  func.func @transform_4(%arg0: i32) -> (i32, i32) {
    %c0_i32 = arith.constant 0 : i32
    %c0_i32_0 = arith.constant 0 : i32
    %c0_i32_1 = arith.constant 0 : i32
    return %c0_i32, %c0_i32_0 : i32, i32
  }
  func.func @transform_5(%arg0: i32) -> (i32, i32) {
    %c0_i32 = arith.constant 0 : i32
    %c0_i32_0 = arith.constant 0 : i32
    %c0_i32_1 = arith.constant 0 : i32
    return %c0_i32, %c0_i32_0 : i32, i32
  }
  func.func @transform_6(%arg0: i32) -> (i32, i32) {
    %c0_i32 = arith.constant 0 : i32
    %c0_i32_0 = arith.constant 0 : i32
    %c0_i32_1 = arith.constant 0 : i32
    return %c0_i32, %c0_i32_0 : i32, i32
  }
  func.func @transform_7(%arg0: i32) -> (i32, i32) {
    %c0_i32 = arith.constant 0 : i32
    %c0_i32_0 = arith.constant 0 : i32
    %c0_i32_1 = arith.constant 0 : i32
    return %c0_i32, %c0_i32_0 : i32, i32
  }
  func.func @transform_8(%arg0: i32) -> (i32, i32) {
    %c0_i32 = arith.constant 0 : i32
    %c0_i32_0 = arith.constant 0 : i32
    %c0_i32_1 = arith.constant 0 : i32
    return %c0_i32, %c0_i32_0 : i32, i32
  }
  func.func @transform_9(%arg0: i32) -> (i32, i32) {
    %c0_i32 = arith.constant 0 : i32
    %c0_i32_0 = arith.constant 0 : i32
    return %arg0, %c0_i32 : i32, i32
  }
}

</mosaic_0001>

<bundles_post_ra>
// kernel: tpu_custom_call.1
= control target key start
LH: loop header
LB: loop body
LE: loop exit
PB: predicated region body
PF: predicated region fallthrough
CT: control target
= control target key end

     0   :  { %14 = vsyncpa [#allocation3], 0  ;;  %s6589_s0 = inlined_call_operand.hbm [shape: bf16[8,64], index: 0, kind: input, shape index: {}]   ;;  %s6590_s1 = inlined_call_operand.hbm [shape: bf16[64,1024], index: 1, kind: input, shape index: {}]   ;;  %s6591_s2 = inlined_call_operand.hbm [shape: f32[1,1024], index: 2, kind: input, shape index: {}]   ;;  %s6592_s3 = inlined_call_operand.hbm [shape: bf16[1024,512], index: 3, kind: input, shape index: {}]   ;;  %s6593_s4 = inlined_call_operand.hbm [shape: f32[1,512], index: 4, kind: input, shape index: {}]   ;;  %s6594_s5 = inlined_call_operand.hbm [shape: bf16[512,512], index: 5, kind: input, shape index: {}]   ;;  %s6595_s6 = inlined_call_operand.vmem [shape: f32[1,512], index: 6, kind: input, shape index: {}]   ;;  %s6596_s7 = inlined_call_operand.hbm [shape: bf16[512,128], index: 7, kind: input, shape index: {}]   ;;  %s6597_s8 = inlined_call_operand.vmem [shape: f32[1,128], index: 8, kind: input, shape index: {}]   ;;  %s6598_s9 = inlined_call_operand.hbm [shape: f32[8,128], index: 9, kind: output, shape index: {}]  }
   0x1   :  { %15 = vsyncpa [#allocation6], 0 }
   0x2   :  { %16 = vsyncpa [#allocation9], 0 }
   0x3   :  { %17 = vsyncpa [#allocation12], 0  ;;  %s34_s11 = sshll.u32 %s6590_s1, 4  ;;  %s35_s11 = int_to_ptr.hbm [resolvable:$true] %s34_s11 }
   0x4   :  { %18 = vsyncpa [#allocation4], 0  ;;  %s6315_s12 = smov [#allocation5]   ;;  %s58_s16 = sshll.u32 %s6592_s3, 4  ;;  %s59_s16 = int_to_ptr.hbm [resolvable:$true] %s58_s16 }
   0x5   :  { %s36_s13 = sshll.u32 %s6315_s12, 4  ;;  %s6316_s17 = smov 512   ;;  %s37_s13 = int_to_ptr.vmem [resolvable:$true] %s36_s13 }
   0x6   :  { %s6317_s18 = smov 32   ;;  %s6318_s19 = smov [#allocation8]  }
   0x7   :  { %42 = dma.hbm_to_vmem [thread:$0]  %s35_s11, 4096, %s37_s13, [#allocation6], %s6316_s17, %s6316_s17, %s6317_s18  }
   0x8   :  { %s60_s20 = sshll.u32 %s6318_s19, 4  ;;  %s6319_s21 = smov 256   ;;  %s61_s20 = int_to_ptr.vmem [resolvable:$true] %s60_s20 }
   0x9   :  { %s6320_s22 = smov 16   ;;  %s82_s24 = sshll.u32 %s6594_s5, 4  ;;  %s83_s24 = int_to_ptr.hbm [resolvable:$true] %s82_s24 }
   0xa   :  { %66 = dma.hbm_to_vmem [thread:$0]  %s59_s16, 32768, %s61_s20, [#allocation9], %s6319_s21, %s6319_s21, %s6320_s22  }
   0xb   :  { %s6321_s25 = smov [#allocation11]   ;;  %s24_s28 = sshll.u32 %s6589_s0, 4  ;;  %s25_s28 = int_to_ptr.hbm [resolvable:$true] %s24_s28 }
   0xc   :  { %s84_s26 = sshll.u32 %s6321_s25, 4  ;;  %s6322_s29 = smov [#allocation2]   ;;  %s85_s26 = int_to_ptr.vmem [resolvable:$true] %s84_s26 }
   0xd   :  { %90 = dma.hbm_to_vmem [thread:$0]  %s83_s24, 16384, %s85_s26, [#allocation12], %s6319_s21, %s6319_s21, %s6320_s22  }
   0xe   :  { %s26_s30 = sshll.u32 %s6322_s29, 4  ;;  %s48_s12 = sshll.u32 %s6591_s2, 4  ;;  %s27_s30 = int_to_ptr.vmem [resolvable:$true] %s26_s30  ;;  %s49_s12 = int_to_ptr.hbm [resolvable:$true] %s48_s12 }
   0xf   :  { %29 = dma.hbm_to_vmem [thread:$0]  %s25_s28, 64, %s27_s30, [#allocation3]  }
  0x10   :  { %s72_s14 = sshll.u32 %s6593_s4, 4  ;;  %s6323_s15 = smov [#allocation7]   ;;  %s73_s14 = int_to_ptr.hbm [resolvable:$true] %s72_s14 }
  0x11   :  { %s50_s16 = sshll.u32 %s6323_s15, 4  ;;  %s6324_s0 = smov [#allocation10]   ;;  %s51_s16 = int_to_ptr.vmem [resolvable:$true] %s50_s16 }
  0x12   :  { %53 = dma.hbm_to_vmem [thread:$0]  %s49_s12, 128, %s51_s16, [#allocation6]  }
  0x13   :  { %s74_s17 = sshll.u32 %s6324_s0, 4  ;;  %s97_s20 = sshll.u32 %s6596_s7, 4  ;;  %s75_s17 = int_to_ptr.vmem [resolvable:$true] %s74_s17  ;;  %s98_s20 = int_to_ptr.hbm [resolvable:$true] %s97_s20 }
  0x14   :  { %77 = dma.hbm_to_vmem [thread:$0]  %s73_s14, 64, %s75_s17, [#allocation9]  }
  0x15   :  { %s6325_s2 = smov [#allocation13]   ;;  %s6326_s22 = smov 64  }
  0x16   :  { %s99_s21 = sshll.u32 %s6325_s2, 4  ;;  %s6327_s1 = smov 4   ;;  %s100_s21 = int_to_ptr.vmem [resolvable:$true] %s99_s21 }
  0x17   :  { %105 = dma.hbm_to_vmem [thread:$0]  %s98_s20, 4096, %s100_s21, [#allocation12], %s6326_s22, %s6326_s22, %s6327_s1  }
  0x18   :  { %6305 = dma.done.wait [#allocation3], 64  }
  0x19   :  { %6306 = vsyncadd [#allocation3], 4294967232 }
  0x1a   :  { %6307 = dma.done.wait [#allocation6], 4224  }
  0x1b   :  { %6308 = vsyncadd [#allocation6], 4294963072 }
  0x1c   :  { %6309 = dma.done.wait [#allocation9], 32832  }
  0x1d   :  { %6310 = vsyncadd [#allocation9], 4294934464 }
  0x1e   :  { %6311 = dma.done.wait [#allocation12], 20480  }
  0x1f   :  { %6312 = vsyncadd [#allocation12], 4294946816  ;;  %v3915_v0 = vld [vmem:[#allocation5 + $0xc0] sm:$0xf]  ;;  %v5641_v2 = vld [vmem:[#allocation5 + $0xc4] sm:$0xf] }
  0x20   :  { %v5645_v1 = vld [vmem:[#allocation5 + $0xdc] sm:$0xf0]  ;;  %v3917_v4 = vld [vmem:[#allocation5 + $0xe0] sm:$0xf0]  ;;  %v3923_v5 = vld [vmem:[#allocation5 + $0xc8] sm:$0xf] }
  0x21   :  { %v3916_v3 = vor.u32 %v5645_v1, %v3915_v0  ;;  %v5646_v6 = vld [vmem:[#allocation5 + $0xe4] sm:$0xf0]  ;;  %v3920_v7 = vor.u32 %v5641_v2, %v3917_v4  ;;  %v5642_v9 = vld [vmem:[#allocation5 + $0xcc] sm:$0xf]  ;;  %v3883_v11 = vld [vmem:[#allocation5 + $0x80] sm:$0xf] }
  0x22   :  { %v3924_v8 = vor.u32 %v5646_v6, %v3923_v5  ;;  %v3925_v10 = vld [vmem:[#allocation5 + $0xe8] sm:$0xf0]  ;;  %v5637_v13 = vld [vmem:[#allocation5 + $0x9c] sm:$0xf0]  ;;  %v5633_v14 = vld [vmem:[#allocation5 + $0x84] sm:$0xf] }
  0x23   :  { %807 = vmatpush.bf16.msra.mxu0 %v3916_v3  ;;  %v3928_v12 = vor.u32 %v5642_v9, %v3925_v10  ;;  %v3885_v15 = vld [vmem:[#allocation5 + $0xa0] sm:$0xf0]  ;;  %820 = vmatpush.bf16.msra.mxu1 %v3920_v7  ;;  %v3884_v16 = vor.u32 %v5637_v13, %v3883_v11  ;;  %v3891_v18 = vld [vmem:[#allocation5 + $0x88] sm:$0xf]  ;;  %v5634_v20 = vld [vmem:[#allocation5 + $0x8c] sm:$0xf] }
  0x24   :  { %833 = vmatpush.bf16.msra.mxu2 %v3924_v8  ;;  %v3888_v17 = vor.u32 %v5633_v14, %v3885_v15  ;;  %v5638_v19 = vld [vmem:[#allocation5 + $0xa4] sm:$0xf0]  ;;  %v3893_v22 = vld [vmem:[#allocation5 + $0xa8] sm:$0xf0]  ;;  %v3851_v23 = vld [vmem:[#allocation5 + $0x40] sm:$0xf] }
  0x25   :  { %846 = vmatpush.bf16.msra.mxu3 %v3928_v12  ;;  %v3892_v21 = vor.u32 %v5638_v19, %v3891_v18  ;;  %v5629_v24 = vld [vmem:[#allocation5 + $0x5c] sm:$0xf0]  ;;  %v3896_v25 = vor.u32 %v5634_v20, %v3893_v22  ;;  %v5625_v26 = vld [vmem:[#allocation5 + $0x44] sm:$0xf]  ;;  %v3859_v28 = vld [vmem:[#allocation5 + $0x48] sm:$0xf] }
  0x26   :  { %v3853_v27 = vld [vmem:[#allocation5 + $0x60] sm:$0xf0]  ;;  %v3852_v29 = vor.u32 %v5629_v24, %v3851_v23  ;;  %v5630_v30 = vld [vmem:[#allocation5 + $0x64] sm:$0xf0]  ;;  %v5626_v31 = vld [vmem:[#allocation5 + $0x4c] sm:$0xf] }
  0x27   :  { %808 = vmatpush.bf16.msra.mxu0 %v3884_v16  ;;  %v3861_v32 = vld [vmem:[#allocation5 + $0x68] sm:$0xf0]  ;;  %821 = vmatpush.bf16.msra.mxu1 %v3888_v17  ;;  %v3856_v33 = vor.u32 %v5625_v26, %v3853_v27  ;;  %v3860_v34 = vor.u32 %v5630_v30, %v3859_v28  ;;  %v3819_v35 = vld [vmem:[#allocation5] sm:$0xf]  ;;  %v5617_v37 = vld [vmem:[#allocation5 + $0x4] sm:$0xf] }
  0x28   :  { %834 = vmatpush.bf16.msra.mxu2 %v3892_v21  ;;  %v5621_v36 = vld [vmem:[#allocation5 + $0x1c] sm:$0xf0]  ;;  %v3864_v38 = vor.u32 %v5626_v31, %v3861_v32  ;;  %v3821_v39 = vld [vmem:[#allocation5 + $0x20] sm:$0xf0]  ;;  %v3827_v40 = vld [vmem:[#allocation5 + $0x8] sm:$0xf] }
  0x29   :  { %847 = vmatpush.bf16.msra.mxu3 %v3896_v25  ;;  %v5622_v41 = vld [vmem:[#allocation5 + $0x24] sm:$0xf0]  ;;  %v5618_v42 = vld [vmem:[#allocation5 + $0xc] sm:$0xf]  ;;  %v3820_v44 = vor.u32 %v5621_v36, %v3819_v35  ;;  %v3931_v45 = vld [vmem:[#allocation5 + $0xd0] sm:$0xf]  ;;  %v3824_v48 = vor.u32 %v5617_v37, %v3821_v39 }
  0x2a   :  { %v3829_v43 = vld [vmem:[#allocation5 + $0x28] sm:$0xf0]  ;;  %v5647_v46 = vld [vmem:[#allocation5 + $0xec] sm:$0xf0]  ;;  %v5643_v47 = vld [vmem:[#allocation5 + $0xd4] sm:$0xf]  ;;  %v3828_v49 = vor.u32 %v5622_v41, %v3827_v40 }
  0x2b   :  { %809 = vmatpush.bf16.msra.mxu0 %v3852_v29  ;;  %822 = vmatpush.bf16.msra.mxu1 %v3856_v33  ;;  %vm799_vm0 = vcmask 523264   ;;  %v3933_v50 = vld [vmem:[#allocation5 + $0xf0] sm:$0xf0]  ;;  %v3832_v51 = vor.u32 %v5618_v42, %v3829_v43  ;;  %v3932_v52 = vor.u32 %v5647_v46, %v3931_v45  ;;  %v3939_v53 = vld [vmem:[#allocation5 + $0xd8] sm:$0xf]  ;;  %s6328_s24 = smov [#allocation14]  }
  0x2c   :  { %835 = vmatpush.bf16.msra.mxu2 %v3860_v34  ;;  %v5648_v54 = vld [vmem:[#allocation5 + $0xf4] sm:$0xf0]  ;;  %v5644_v55 = vld [vmem:[#allocation5 + $0xdc] sm:$0xf]  ;;  %v3936_v56 = vor.u32 %v5643_v47, %v3933_v50  ;;  %v3899_v58 = vld [vmem:[#allocation5 + $0x90] sm:$0xf] }
  0x2d   :  { %848 = vmatpush.bf16.msra.mxu3 %v3864_v38  ;;  %v3941_v57 = vld [vmem:[#allocation5 + $0xf8] sm:$0xf0]  ;;  %v5639_v59 = vld [vmem:[#allocation5 + $0xac] sm:$0xf0]  ;;  %v5635_v61 = vld [vmem:[#allocation5 + $0x94] sm:$0xf]  ;;  %v3940_v63 = vor.u32 %v5648_v54, %v3939_v53 }
  0x2e   :  { %v6400_v60 = vld [vmem:[#allocation2] sm:$0xf]  ;;  %v3901_v62 = vld [vmem:[#allocation5 + $0xb0] sm:$0xf0]  ;;  %v3944_v0 = vor.u32 %v5644_v55, %v3941_v57  ;;  %v3900_v1 = vor.u32 %v5639_v59, %v3899_v58  ;;  %v3907_v2 = vld [vmem:[#allocation5 + $0x98] sm:$0xf] }
  0x2f   :  { %810 = vmatpush.bf16.msra.mxu0 %v3820_v44  ;;  %823 = vmatpush.bf16.msra.mxu1 %v3824_v48  ;;  %v5640_v3 = vld [vmem:[#allocation5 + $0xb4] sm:$0xf0]  ;;  %v5636_v4 = vld [vmem:[#allocation5 + $0x9c] sm:$0xf]  ;;  %v3904_v5 = vor.u32 %v5635_v61, %v3901_v62  ;;  %v3867_v7 = vld [vmem:[#allocation5 + $0x50] sm:$0xf] }
  0x30   :  { %836 = vmatpush.bf16.msra.mxu2 %v3828_v49  ;;  %v3909_v6 = vld [vmem:[#allocation5 + $0xb8] sm:$0xf0]  ;;  %v5631_v8 = vld [vmem:[#allocation5 + $0x6c] sm:$0xf0]  ;;  %v5627_v9 = vld [vmem:[#allocation5 + $0x54] sm:$0xf]  ;;  %v3908_v11 = vor.u32 %v5640_v3, %v3907_v2 }
  0x31   :  { %849 = vmatpush.bf16.msra.mxu3 %v3832_v51  ;;  %v3869_v10 = vld [vmem:[#allocation5 + $0x70] sm:$0xf0]  ;;  %v3875_v12 = vld [vmem:[#allocation5 + $0x58] sm:$0xf]  ;;  %v3912_v13 = vor.u32 %v5636_v4, %v3909_v6  ;;  %v3868_v14 = vor.u32 %v5631_v8, %v3867_v7  ;;  %v5628_v16 = vld [vmem:[#allocation5 + $0x5c] sm:$0xf] }
  0x32   :  { %3945 = vmatmul.msk.bf16.vlgmr.msra.gmra.mxu0 %vm799_vm0, %v6400_v60  ;;  %3946 = vmatmul.msk.bf16.vlgmr.msra.gmra.mxu1 %vm799_vm0, %v6400_v60  ;;  %v5632_v15 = vld [vmem:[#allocation5 + $0x74] sm:$0xf0]  ;;  %v3877_v17 = vld [vmem:[#allocation5 + $0x78] sm:$0xf0]  ;;  %v3872_v18 = vor.u32 %v5627_v9, %v3869_v10  ;;  %v3835_v19 = vld [vmem:[#allocation5 + $0x10] sm:$0xf] }
  0x33   :  { %859 = vmatpush.bf16.msrb.mxu0 %v3932_v52  ;;  %872 = vmatpush.bf16.msrb.mxu1 %v3936_v56  ;;  %v5623_v20 = vld [vmem:[#allocation5 + $0x2c] sm:$0xf0]  ;;  %v5619_v21 = vld [vmem:[#allocation5 + $0x14] sm:$0xf]  ;;  %v4067_v23 = vld [vmem:[#allocation8 + $0xe0] sm:$0xf]  ;;  %v3876_v25 = vor.u32 %v5632_v15, %v3875_v12  ;;  %v3880_v28 = vor.u32 %v5628_v16, %v3877_v17 }
  0x34   :  { %3947 = vmatmul.msk.bf16.vlgmr.msra.gmra.mxu2 %vm799_vm0, %v6400_v60  ;;  %3948 = vmatmul.msk.bf16.vlgmr.msra.gmra.mxu3 %vm799_vm0, %v6400_v60  ;;  %v3837_v22 = vld [vmem:[#allocation5 + $0x30] sm:$0xf0]  ;;  %v5679_v24 = vld [vmem:[#allocation8 + $0xec] sm:$0xf0]  ;;  %v4195_v26 = vld [vmem:[#allocation8 + $0x1e0] sm:$0xf]  ;;  %v3836_v29 = vor.u32 %v5623_v20, %v3835_v19 }
  0x35   :  { %885 = vmatpush.bf16.msrb.mxu2 %v3940_v63  ;;  %898 = vmatpush.bf16.msrb.mxu3 %v3944_v0  ;;  %v5711_v27 = vld [vmem:[#allocation8 + $0x1ec] sm:$0xf0]  ;;  %v5620_v32 = vld [vmem:[#allocation5 + $0x1c] sm:$0xf]  ;;  %v3840_v33 = vor.u32 %v5619_v21, %v3837_v22  ;;  %v4068_v35 = vor.u32 %v5679_v24, %v4067_v23  ;;  %v4323_v36 = vld [vmem:[#allocation8 + $0x2e0] sm:$0xf] }
  0x36   :  { %v3843_v30 = vld [vmem:[#allocation5 + $0x18] sm:$0xf]  ;;  %v3845_v34 = vld [vmem:[#allocation5 + $0x38] sm:$0xf0]  ;;  %v4196_v38 = vor.u32 %v5711_v27, %v4195_v26  ;;  %v4451_v39 = vld [vmem:[#allocation8 + $0x3e0] sm:$0xf] }
  0x37   :  { %860 = vmatpush.bf16.msrb.mxu0 %v3900_v1  ;;  %873 = vmatpush.bf16.msrb.mxu1 %v3904_v5  ;;  %v5624_v31 = vld [vmem:[#allocation5 + $0x34] sm:$0xf0]  ;;  %v3848_v42 = vor.u32 %v5620_v32, %v3845_v34  ;;  %v4051_v43 = vld [vmem:[#allocation8 + $0xc0] sm:$0xf]  ;;  %s3802_s25 = sshll.u32 %s6328_s24, 4  ;;  %s3804_s3 = sshll.u32 %s6598_s9, 4  ;;  %s3803_s25 = int_to_ptr.vmem [resolvable:$true] %s3802_s25  ;;  %s3805_s3 = int_to_ptr.hbm [resolvable:$true] %s3804_s3 }
  0x38   :  { %v5743_v37 = vld [vmem:[#allocation8 + $0x2ec] sm:$0xf0]  ;;  %v3844_v41 = vor.u32 %v5624_v31, %v3843_v30  ;;  %v4179_v45 = vld [vmem:[#allocation8 + $0x1c0] sm:$0xf] }
  0x39   :  { %886 = vmatpush.bf16.msrb.mxu2 %v3908_v11  ;;  %899 = vmatpush.bf16.msrb.mxu3 %v3912_v13  ;;  %v5775_v40 = vld [vmem:[#allocation8 + $0x3ec] sm:$0xf0]  ;;  %v4324_v46 = vor.u32 %v5743_v37, %v4323_v36  ;;  %v4307_v49 = vld [vmem:[#allocation8 + $0x2c0] sm:$0xf] }
  0x3a   :  { %v5675_v44 = vld [vmem:[#allocation8 + $0xcc] sm:$0xf0]  ;;  %v4452_v48 = vor.u32 %v5775_v40, %v4451_v39  ;;  %v4435_v51 = vld [vmem:[#allocation8 + $0x3c0] sm:$0xf] }
  0x3b   :  { %861 = vmatpush.bf16.msrb.mxu0 %v3868_v14  ;;  %874 = vmatpush.bf16.msrb.mxu1 %v3872_v18  ;;  %v5707_v47 = vld [vmem:[#allocation8 + $0x1cc] sm:$0xf0]  ;;  %v4052_v53 = vor.u32 %v5675_v44, %v4051_v43  ;;  %v4035_v55 = vld [vmem:[#allocation8 + $0xa0] sm:$0xf] }
  0x3c   :  { %v5739_v50 = vld [vmem:[#allocation8 + $0x2cc] sm:$0xf0]  ;;  %v4180_v54 = vor.u32 %v5707_v47, %v4179_v45  ;;  %v4163_v57 = vld [vmem:[#allocation8 + $0x1a0] sm:$0xf] }
  0x3d   :  { %887 = vmatpush.bf16.msrb.mxu2 %v3876_v25  ;;  %900 = vmatpush.bf16.msrb.mxu3 %v3880_v28  ;;  %v5771_v52 = vld [vmem:[#allocation8 + $0x3cc] sm:$0xf0]  ;;  %v4308_v58 = vor.u32 %v5739_v50, %v4307_v49  ;;  %v4291_v62 = vld [vmem:[#allocation8 + $0x2a0] sm:$0xf] }
  0x3e   :  { %v5671_v56 = vld [vmem:[#allocation8 + $0xac] sm:$0xf0]  ;;  %v4436_v61 = vor.u32 %v5771_v52, %v4435_v51  ;;  %v4419_v0 = vld [vmem:[#allocation8 + $0x3a0] sm:$0xf] }
  0x3f   :  { %862 = vmatpush.bf16.msrb.mxu0 %v3836_v29  ;;  %875 = vmatpush.bf16.msrb.mxu1 %v3840_v33  ;;  %v5703_v59 = vld [vmem:[#allocation8 + $0x1ac] sm:$0xf0]  ;;  %v4036_v2 = vor.u32 %v5671_v56, %v4035_v55  ;;  %v4019_v4 = vld [vmem:[#allocation8 + $0x80] sm:$0xf] }
  0x40   :  { %v5735_v63 = vld [vmem:[#allocation8 + $0x2ac] sm:$0xf0]  ;;  %v4164_v3 = vor.u32 %v5703_v59, %v4163_v57  ;;  %v4147_v6 = vld [vmem:[#allocation8 + $0x180] sm:$0xf] }
  0x41   :  { %888 = vmatpush.bf16.msrb.mxu2 %v3844_v41  ;;  %901 = vmatpush.bf16.msrb.mxu3 %v3848_v42  ;;  %v5767_v1 = vld [vmem:[#allocation8 + $0x3ac] sm:$0xf0]  ;;  %v4292_v7 = vor.u32 %v5735_v63, %v4291_v62  ;;  %v4275_v10 = vld [vmem:[#allocation8 + $0x280] sm:$0xf] }
  0x42   :  { %3949 = vmatmul.msk.bf16.vlgmr.msrb.gmra.mxu0 %vm799_vm0, %v6400_v60  ;;  %3950 = vmatmul.msk.bf16.vlgmr.msrb.gmra.mxu1 %vm799_vm0, %v6400_v60  ;;  %v5667_v5 = vld [vmem:[#allocation8 + $0x8c] sm:$0xf0]  ;;  %v4420_v9 = vor.u32 %v5767_v1, %v4419_v0  ;;  %v4403_v12 = vld [vmem:[#allocation8 + $0x380] sm:$0xf] }
  0x43   :  { %2236 = vmatpush.bf16.msra.mxu0 %v4068_v35  ;;  %2249 = vmatpush.bf16.msra.mxu1 %v4196_v38  ;;  %v5699_v8 = vld [vmem:[#allocation8 + $0x18c] sm:$0xf0]  ;;  %v4020_v14 = vor.u32 %v5667_v5, %v4019_v4  ;;  %v4003_v15 = vld [vmem:[#allocation8 + $0x60] sm:$0xf] }
  0x44   :  { %3951 = vmatmul.msk.bf16.vlgmr.msrb.gmra.mxu2 %vm799_vm0, %v6400_v60  ;;  %3952 = vmatmul.msk.bf16.vlgmr.msrb.gmra.mxu3 %vm799_vm0, %v6400_v60  ;;  %v5731_v11 = vld [vmem:[#allocation8 + $0x28c] sm:$0xf0]  ;;  %v4148_v60 = vor.u32 %v5699_v8, %v4147_v6  ;;  %v4131_v17 = vld [vmem:[#allocation8 + $0x160] sm:$0xf] }
  0x45   :  { %2262 = vmatpush.bf16.msra.mxu2 %v4324_v46  ;;  %2275 = vmatpush.bf16.msra.mxu3 %v4452_v48  ;;  %v5763_v13 = vld [vmem:[#allocation8 + $0x38c] sm:$0xf0]  ;;  %v4276_v18 = vor.u32 %v5731_v11, %v4275_v10  ;;  %v4259_v21 = vld [vmem:[#allocation8 + $0x260] sm:$0xf] }
  0x46   :  { %v5663_v16 = vld [vmem:[#allocation8 + $0x6c] sm:$0xf0]  ;;  %v4404_v20 = vor.u32 %v5763_v13, %v4403_v12  ;;  %v4387_v23 = vld [vmem:[#allocation8 + $0x360] sm:$0xf] }
  0x47   :  { %2237 = vmatpush.bf16.msra.mxu0 %v4052_v53  ;;  %2250 = vmatpush.bf16.msra.mxu1 %v4180_v54  ;;  %v5695_v19 = vld [vmem:[#allocation8 + $0x16c] sm:$0xf0]  ;;  %v4004_v25 = vor.u32 %v5663_v16, %v4003_v15  ;;  %v3987_v27 = vld [vmem:[#allocation8 + $0x40] sm:$0xf] }
  0x48   :  { %v5727_v22 = vld [vmem:[#allocation8 + $0x26c] sm:$0xf0]  ;;  %v4132_v26 = vor.u32 %v5695_v19, %v4131_v17  ;;  %v4115_v29 = vld [vmem:[#allocation8 + $0x140] sm:$0xf] }
  0x49   :  { %2263 = vmatpush.bf16.msra.mxu2 %v4308_v58  ;;  %2276 = vmatpush.bf16.msra.mxu3 %v4436_v61  ;;  %v5759_v24 = vld [vmem:[#allocation8 + $0x36c] sm:$0xf0]  ;;  %v4260_v30 = vor.u32 %v5727_v22, %v4259_v21  ;;  %v4243_v33 = vld [vmem:[#allocation8 + $0x240] sm:$0xf] }
  0x4a   :  { %v5659_v28 = vld [vmem:[#allocation8 + $0x4c] sm:$0xf0]  ;;  %v4388_v32 = vor.u32 %v5759_v24, %v4387_v23  ;;  %v4371_v35 = vld [vmem:[#allocation8 + $0x340] sm:$0xf] }
  0x4b   :  { %2238 = vmatpush.bf16.msra.mxu0 %v4036_v2  ;;  %2251 = vmatpush.bf16.msra.mxu1 %v4164_v3  ;;  %v5691_v31 = vld [vmem:[#allocation8 + $0x14c] sm:$0xf0]  ;;  %v3988_v37 = vor.u32 %v5659_v28, %v3987_v27  ;;  %v3971_v38 = vld [vmem:[#allocation8 + $0x20] sm:$0xf] }
  0x4c   :  { %v5723_v34 = vld [vmem:[#allocation8 + $0x24c] sm:$0xf0]  ;;  %v4116_v39 = vor.u32 %v5691_v31, %v4115_v29  ;;  %v4099_v41 = vld [vmem:[#allocation8 + $0x120] sm:$0xf] }
  0x4d   :  { %2264 = vmatpush.bf16.msra.mxu2 %v4292_v7  ;;  %2277 = vmatpush.bf16.msra.mxu3 %v4420_v9  ;;  %v5755_v36 = vld [vmem:[#allocation8 + $0x34c] sm:$0xf0]  ;;  %v4244_v43 = vor.u32 %v5723_v34, %v4243_v33  ;;  %v4227_v45 = vld [vmem:[#allocation8 + $0x220] sm:$0xf] }
  0x4e   :  { %v5655_v40 = vld [vmem:[#allocation8 + $0x2c] sm:$0xf0]  ;;  %v4372_v44 = vor.u32 %v5755_v36, %v4371_v35  ;;  %v4355_v47 = vld [vmem:[#allocation8 + $0x320] sm:$0xf] }
  0x4f   :  { %2239 = vmatpush.bf16.msra.mxu0 %v4020_v14  ;;  %2252 = vmatpush.bf16.msra.mxu1 %v4148_v60  ;;  %v5687_v42 = vld [vmem:[#allocation8 + $0x12c] sm:$0xf0]  ;;  %v3972_v49 = vor.u32 %v5655_v40, %v3971_v38  ;;  %v3955_v50 = vld [vmem:[#allocation8] sm:$0xf] }
  0x50   :  { %v5719_v46 = vld [vmem:[#allocation8 + $0x22c] sm:$0xf0]  ;;  %v4100_v52 = vor.u32 %v5687_v42, %v4099_v41  ;;  %v4083_v53 = vld [vmem:[#allocation8 + $0x100] sm:$0xf] }
  0x51   :  { %2265 = vmatpush.bf16.msra.mxu2 %v4276_v18  ;;  %2278 = vmatpush.bf16.msra.mxu3 %v4404_v20  ;;  %v5751_v48 = vld [vmem:[#allocation8 + $0x32c] sm:$0xf0]  ;;  %v4579_v55 = vld [vmem:[#allocation8 + $0x4e0] sm:$0xf]  ;;  %v4228_v56 = vor.u32 %v5719_v46, %v4227_v45 }
  0x52   :  { %v5651_v51 = vld [vmem:[#allocation8 + $0xc] sm:$0xf0]  ;;  %v4707_v58 = vld [vmem:[#allocation8 + $0x5e0] sm:$0xf]  ;;  %v4356_v61 = vor.u32 %v5751_v48, %v4355_v47 }
  0x53   :  { %2240 = vmatpush.bf16.msra.mxu0 %v4004_v25  ;;  %2253 = vmatpush.bf16.msra.mxu1 %v4132_v26  ;;  %v5683_v54 = vld [vmem:[#allocation8 + $0x10c] sm:$0xf0]  ;;  %v4211_v62 = vld [vmem:[#allocation8 + $0x200] sm:$0xf]  ;;  %v3956_v1 = vor.u32 %v5651_v51, %v3955_v50 }
  0x54   :  { %v5807_v57 = vld [vmem:[#allocation8 + $0x4ec] sm:$0xf0]  ;;  %v4339_v0 = vld [vmem:[#allocation8 + $0x300] sm:$0xf]  ;;  %v4084_v5 = vor.u32 %v5683_v54, %v4083_v53 }
  0x55   :  { %2266 = vmatpush.bf16.msra.mxu2 %v4260_v30  ;;  %2279 = vmatpush.bf16.msra.mxu3 %v4388_v32  ;;  %v5839_v59 = vld [vmem:[#allocation8 + $0x5ec] sm:$0xf0]  ;;  %v4835_v3 = vld [vmem:[#allocation8 + $0x6e0] sm:$0xf]  ;;  %v4580_v6 = vor.u32 %v5807_v57, %v4579_v55 }
  0x56   :  { %v5715_v63 = vld [vmem:[#allocation8 + $0x20c] sm:$0xf0]  ;;  %v4963_v7 = vld [vmem:[#allocation8 + $0x7e0] sm:$0xf]  ;;  %v4708_v9 = vor.u32 %v5839_v59, %v4707_v58 }
  0x57   :  { %2241 = vmatpush.bf16.msra.mxu0 %v3988_v37  ;;  %2254 = vmatpush.bf16.msra.mxu1 %v4116_v39  ;;  %v5747_v2 = vld [vmem:[#allocation8 + $0x30c] sm:$0xf0]  ;;  %v4563_v10 = vld [vmem:[#allocation8 + $0x4c0] sm:$0xf]  ;;  %v4212_v12 = vor.u32 %v5715_v63, %v4211_v62 }
  0x58   :  { %v5871_v4 = vld [vmem:[#allocation8 + $0x6ec] sm:$0xf0]  ;;  %v4691_v13 = vld [vmem:[#allocation8 + $0x5c0] sm:$0xf]  ;;  %v4340_v60 = vor.u32 %v5747_v2, %v4339_v0 }
  0x59   :  { %2267 = vmatpush.bf16.msra.mxu2 %v4244_v43  ;;  %2280 = vmatpush.bf16.msra.mxu3 %v4372_v44  ;;  %v5903_v8 = vld [vmem:[#allocation8 + $0x7ec] sm:$0xf0]  ;;  %v4836_v15 = vor.u32 %v5871_v4, %v4835_v3  ;;  %v4819_v17 = vld [vmem:[#allocation8 + $0x6c0] sm:$0xf] }
  0x5a   :  { %v5803_v11 = vld [vmem:[#allocation8 + $0x4cc] sm:$0xf0]  ;;  %v4964_v16 = vor.u32 %v5903_v8, %v4963_v7  ;;  %v4947_v20 = vld [vmem:[#allocation8 + $0x7c0] sm:$0xf] }
  0x5b   :  { %2242 = vmatpush.bf16.msra.mxu0 %v3972_v49  ;;  %2255 = vmatpush.bf16.msra.mxu1 %v4100_v52  ;;  %v5835_v14 = vld [vmem:[#allocation8 + $0x5cc] sm:$0xf0]  ;;  %v4564_v19 = vor.u32 %v5803_v11, %v4563_v10  ;;  %v4547_v23 = vld [vmem:[#allocation8 + $0x4a0] sm:$0xf] }
  0x5c   :  { %v5867_v18 = vld [vmem:[#allocation8 + $0x6cc] sm:$0xf0]  ;;  %v4692_v22 = vor.u32 %v5835_v14, %v4691_v13  ;;  %v4675_v25 = vld [vmem:[#allocation8 + $0x5a0] sm:$0xf] }
  0x5d   :  { %2268 = vmatpush.bf16.msra.mxu2 %v4228_v56  ;;  %2281 = vmatpush.bf16.msra.mxu3 %v4356_v61  ;;  %v5899_v21 = vld [vmem:[#allocation8 + $0x7cc] sm:$0xf0]  ;;  %v4820_v27 = vor.u32 %v5867_v18, %v4819_v17  ;;  %v4531_v31 = vld [vmem:[#allocation8 + $0x480] sm:$0xf] }
  0x5e   :  { %v5799_v24 = vld [vmem:[#allocation8 + $0x4ac] sm:$0xf0]  ;;  %v4948_v28 = vor.u32 %v5899_v21, %v4947_v20  ;;  %v4659_v33 = vld [vmem:[#allocation8 + $0x580] sm:$0xf] }
  0x5f   :  { %2243 = vmatpush.bf16.msra.mxu0 %v3956_v1  ;;  %2256 = vmatpush.bf16.msra.mxu1 %v4084_v5  ;;  %v5831_v26 = vld [vmem:[#allocation8 + $0x5ac] sm:$0xf0]  ;;  %v4548_v29 = vor.u32 %v5799_v24, %v4547_v23  ;;  %v4803_v37 = vld [vmem:[#allocation8 + $0x6a0] sm:$0xf] }
  0x60   :  { %v4676_v30 = vor.u32 %v5831_v26, %v4675_v25  ;;  %v5795_v32 = vld [vmem:[#allocation8 + $0x48c] sm:$0xf0]  ;;  %v4931_v39 = vld [vmem:[#allocation8 + $0x7a0] sm:$0xf] }
  0x61   :  { %2269 = vmatpush.bf16.msra.mxu2 %v4212_v12  ;;  %2282 = vmatpush.bf16.msra.mxu3 %v4340_v60  ;;  %v4532_v34 = vor.u32 %v5795_v32, %v4531_v31  ;;  %v5827_v35 = vld [vmem:[#allocation8 + $0x58c] sm:$0xf0]  ;;  %v4515_v43 = vld [vmem:[#allocation8 + $0x460] sm:$0xf] }
  0x62   :  { %v4660_v36 = vor.u32 %v5827_v35, %v4659_v33  ;;  %v5863_v38 = vld [vmem:[#allocation8 + $0x6ac] sm:$0xf0]  ;;  %v4643_v45 = vld [vmem:[#allocation8 + $0x560] sm:$0xf]  ;;  %v6418_v33 = vld [vmem:[#allocation7] sm:$0xff] }
  0x63   :  { %2288 = vmatpush.bf16.msrb.mxu0 %v4580_v6  ;;  %2301 = vmatpush.bf16.msrb.mxu1 %v4708_v9  ;;  %v4804_v40 = vor.u32 %v5863_v38, %v4803_v37  ;;  %v5895_v41 = vld [vmem:[#allocation8 + $0x7ac] sm:$0xf0]  ;;  %v4787_v49 = vld [vmem:[#allocation8 + $0x680] sm:$0xf]  ;;  %v624_v35 = vperm.slane %v6418_v33, 1 }
  0x64   :  { %v4932_v42 = vor.u32 %v5895_v41, %v4931_v39  ;;  %v5791_v44 = vld [vmem:[#allocation8 + $0x46c] sm:$0xf0]  ;;  %v4915_v51 = vld [vmem:[#allocation8 + $0x780] sm:$0xf] }
  0x65   :  { %2314 = vmatpush.bf16.msrb.mxu2 %v4836_v15  ;;  %2327 = vmatpush.bf16.msrb.mxu3 %v4964_v16  ;;  %v4516_v46 = vor.u32 %v5791_v44, %v4515_v43  ;;  %v5823_v47 = vld [vmem:[#allocation8 + $0x56c] sm:$0xf0]  ;;  %v4499_v55 = vld [vmem:[#allocation8 + $0x440] sm:$0xf]  ;;  %v626_v43 = vperm.slane %v6418_v33, 3 }
  0x66   :  { %v4644_v48 = vor.u32 %v5823_v47, %v4643_v45  ;;  %v5859_v50 = vld [vmem:[#allocation8 + $0x68c] sm:$0xf0]  ;;  %v4627_v57 = vld [vmem:[#allocation8 + $0x540] sm:$0xf] }
  0x67   :  { %2289 = vmatpush.bf16.msrb.mxu0 %v4564_v19  ;;  %2302 = vmatpush.bf16.msrb.mxu1 %v4692_v22  ;;  %v4788_v52 = vor.u32 %v5859_v50, %v4787_v49  ;;  %v5891_v53 = vld [vmem:[#allocation8 + $0x78c] sm:$0xf0]  ;;  %v4771_v62 = vld [vmem:[#allocation8 + $0x660] sm:$0xf] }
  0x68   :  { %v4916_v54 = vor.u32 %v5891_v53, %v4915_v51  ;;  %v5787_v56 = vld [vmem:[#allocation8 + $0x44c] sm:$0xf0]  ;;  %v4899_v0 = vld [vmem:[#allocation8 + $0x760] sm:$0xf] }
  0x69   :  { %2315 = vmatpush.bf16.msrb.mxu2 %v4820_v27  ;;  %2328 = vmatpush.bf16.msrb.mxu3 %v4948_v28  ;;  %v4500_v58 = vor.u32 %v5787_v56, %v4499_v55  ;;  %v5819_v59 = vld [vmem:[#allocation8 + $0x54c] sm:$0xf0]  ;;  %v4483_v4 = vld [vmem:[#allocation8 + $0x420] sm:$0xf]  ;;  %v5677_v55 = vld [vmem:[#allocation8 + $0xe4] sm:$0xf] }
  0x6a   :  { %v4628_v61 = vor.u32 %v5819_v59, %v4627_v57  ;;  %v5855_v63 = vld [vmem:[#allocation8 + $0x66c] sm:$0xf0]  ;;  %v4611_v6 = vld [vmem:[#allocation8 + $0x520] sm:$0xf]  ;;  %v4069_v56 = vld [vmem:[#allocation8 + $0xf0] sm:$0xf0] }
  0x6b   :  { %2290 = vmatpush.bf16.msrb.mxu0 %v4548_v29  ;;  %2303 = vmatpush.bf16.msrb.mxu1 %v4676_v30  ;;  %v4772_v1 = vor.u32 %v5855_v63, %v4771_v62  ;;  %v5887_v2 = vld [vmem:[#allocation8 + $0x76c] sm:$0xf0]  ;;  %v4755_v10 = vld [vmem:[#allocation8 + $0x640] sm:$0xf]  ;;  %v5709_v59 = vld [vmem:[#allocation8 + $0x1e4] sm:$0xf] }
  0x6c   :  { %v4900_v3 = vor.u32 %v5887_v2, %v4899_v0  ;;  %v5783_v5 = vld [vmem:[#allocation8 + $0x42c] sm:$0xf0]  ;;  %v4883_v12 = vld [vmem:[#allocation8 + $0x740] sm:$0xf]  ;;  %v628_v63 = vperm.slane %v6418_v33, 5  ;;  %v4072_v2 = vor.u32 %v5677_v55, %v4069_v56 }
  0x6d   :  { %2316 = vmatpush.bf16.msrb.mxu2 %v4804_v40  ;;  %2329 = vmatpush.bf16.msrb.mxu3 %v4932_v42  ;;  %v4484_v7 = vor.u32 %v5783_v5, %v4483_v4  ;;  %v5815_v8 = vld [vmem:[#allocation8 + $0x52c] sm:$0xf0]  ;;  %v4467_v15 = vld [vmem:[#allocation8 + $0x400] sm:$0xf]  ;;  %v625_v42 = vperm.slane %v6418_v33, 2 }
  0x6e   :  { %v4612_v9 = vor.u32 %v5815_v8, %v4611_v6  ;;  %v5851_v11 = vld [vmem:[#allocation8 + $0x64c] sm:$0xf0]  ;;  %v4595_v17 = vld [vmem:[#allocation8 + $0x500] sm:$0xf]  ;;  %v4053_v8 = vld [vmem:[#allocation8 + $0xd0] sm:$0xf0] }
  0x6f   :  { %2291 = vmatpush.bf16.msrb.mxu0 %v4532_v34  ;;  %2304 = vmatpush.bf16.msrb.mxu1 %v4660_v36  ;;  %v4756_v13 = vor.u32 %v5851_v11, %v4755_v10  ;;  %v5883_v14 = vld [vmem:[#allocation8 + $0x74c] sm:$0xf0]  ;;  %v4739_v21 = vld [vmem:[#allocation8 + $0x620] sm:$0xf]  ;;  %v623_v34 = vperm.slane %v6418_v33, 0 }
  0x70   :  { %v4884_v60 = vor.u32 %v5883_v14, %v4883_v12  ;;  %v5779_v16 = vld [vmem:[#allocation8 + $0x40c] sm:$0xf0]  ;;  %v4867_v23 = vld [vmem:[#allocation8 + $0x720] sm:$0xf]  ;;  %v5705_v12 = vld [vmem:[#allocation8 + $0x1c4] sm:$0xf] }
  0x71   :  { %2317 = vmatpush.bf16.msrb.mxu2 %v4788_v52  ;;  %2330 = vmatpush.bf16.msrb.mxu3 %v4916_v54  ;;  %v4468_v18 = vor.u32 %v5779_v16, %v4467_v15  ;;  %v5811_v19 = vld [vmem:[#allocation8 + $0x50c] sm:$0xf0]  ;;  %v4723_v27 = vld [vmem:[#allocation8 + $0x600] sm:$0xf]  ;;  %v629_v15 = vperm.slane %v6418_v33, 6 }
  0x72   :  { %v4596_v20 = vor.u32 %v5811_v19, %v4595_v17  ;;  %v5847_v22 = vld [vmem:[#allocation8 + $0x62c] sm:$0xf0]  ;;  %v4851_v30 = vld [vmem:[#allocation8 + $0x700] sm:$0xf]  ;;  %v5741_v16 = vld [vmem:[#allocation8 + $0x2e4] sm:$0xf] }
  0x73   :  { %2292 = vmatpush.bf16.msrb.mxu0 %v4516_v46  ;;  %2305 = vmatpush.bf16.msrb.mxu1 %v4644_v48  ;;  %v4740_v24 = vor.u32 %v5847_v22, %v4739_v21  ;;  %v5879_v25 = vld [vmem:[#allocation8 + $0x72c] sm:$0xf0]  ;;  %v4325_v17 = vld [vmem:[#allocation8 + $0x2f0] sm:$0xf0]  ;;  %v5773_v22 = vld [vmem:[#allocation8 + $0x3e4] sm:$0xf] }
  0x74   :  { %v4868_v26 = vor.u32 %v5879_v25, %v4867_v23  ;;  %v5843_v28 = vld [vmem:[#allocation8 + $0x60c] sm:$0xf0]  ;;  %v4453_v23 = vld [vmem:[#allocation8 + $0x3f0] sm:$0xf0]  ;;  %v5733_v56 = vld [vmem:[#allocation8 + $0x2a4] sm:$0xf] }
  0x75   :  { %2318 = vmatpush.bf16.msrb.mxu2 %v4772_v1  ;;  %2331 = vmatpush.bf16.msrb.mxu3 %v4900_v3  ;;  %v4724_v29 = vor.u32 %v5843_v28, %v4723_v27  ;;  %v5875_v31 = vld [vmem:[#allocation8 + $0x70c] sm:$0xf0]  ;;  %v5669_v27 = vld [vmem:[#allocation8 + $0xa4] sm:$0xf]  ;;  %v4037_v28 = vld [vmem:[#allocation8 + $0xb0] sm:$0xf0] }
  0x76   :  { %v4852_v32 = vor.u32 %v5875_v31, %v4851_v30  ;;  %v630_v30 = vperm.slane %v6418_v33, 7  ;;  %v5701_v31 = vld [vmem:[#allocation8 + $0x1a4] sm:$0xf] }
  0x77   :  { %2293 = vmatpush.bf16.msrb.mxu0 %v4500_v58  ;;  %2306 = vmatpush.bf16.msrb.mxu1 %v4628_v61  ;;  %v627_v58 = vperm.slane %v6418_v33, 4  ;;  %v4197_v61 = vld [vmem:[#allocation8 + $0x1f0] sm:$0xf0] }
  0x78   :  { %v4200_v6 = vor.u32 %v5709_v59, %v4197_v61 }
  0x79   :  { %2319 = vmatpush.bf16.msrb.mxu2 %v4756_v13  ;;  %2332 = vmatpush.bf16.msrb.mxu3 %v4884_v60  ;;  %v4181_v13 = vld [vmem:[#allocation8 + $0x1d0] sm:$0xf0] }
  0x7b   :  { %2294 = vmatpush.bf16.msrb.mxu0 %v4484_v7  ;;  %2307 = vmatpush.bf16.msrb.mxu1 %v4612_v9  ;;  %v5673_v7 = vld [vmem:[#allocation8 + $0xc4] sm:$0xf] }
  0x7c   :  { %v4056_v21 = vor.u32 %v5673_v7, %v4053_v8  ;;  %v5693_v8 = vld [vmem:[#allocation8 + $0x164] sm:$0xf] }
  0x7d   :  { %2320 = vmatpush.bf16.msrb.mxu2 %v4740_v24  ;;  %2333 = vmatpush.bf16.msrb.mxu3 %v4868_v26  ;;  %v4184_v26 = vor.u32 %v5705_v12, %v4181_v13 }
  0x7f   :  { %2295 = vmatpush.bf16.msrb.mxu0 %v4468_v18  ;;  %2308 = vmatpush.bf16.msrb.mxu1 %v4596_v20 }
  0x81   :  { %2321 = vmatpush.bf16.msrb.mxu2 %v4724_v29  ;;  %2334 = vmatpush.bf16.msrb.mxu3 %v4852_v32  ;;  %v4165_v32 = vld [vmem:[#allocation8 + $0x1b0] sm:$0xf0] }
  0x82   :  { %v4168_v33 = vor.u32 %v5701_v31, %v4165_v32  ;;  %v4261_v31 = vld [vmem:[#allocation8 + $0x270] sm:$0xf0] }
  0xaf   :  { %v812_v36 = vpop.f32.mrf.mxu0  ;;  %v825_v38 = vpop.f32.mrf.mxu1 }
  0xb0   :  { %v813_v37 = vadd.f32 %v812_v36, %v623_v34  ;;  %v826_v39 = vadd.f32 %v825_v38, %v624_v35  ;;  %v4328_v35 = vor.u32 %v5741_v16, %v4325_v17  ;;  %v4456_v38 = vor.u32 %v5773_v22, %v4453_v23  ;;  %v4277_v16 = vld [vmem:[#allocation8 + $0x290] sm:$0xf0]  ;;  %v5657_v23 = vld [vmem:[#allocation8 + $0x44] sm:$0xf] }
  0xb2   :  { %v907_v40 = vmul.f32 0.5, %v813_v37  ;;  %v908_v41 = vmul.f32 0.5, %v826_v39  ;;  %v4040_v39 = vor.u32 %v5669_v27, %v4037_v28  ;;  %v4117_v27 = vld [vmem:[#allocation8 + $0x150] sm:$0xf0] }
  0xb4   :  { %6080 = vtanh.f32 %v907_v40  ;;  %v5737_v40 = vld [vmem:[#allocation8 + $0x2c4] sm:$0xf] }
  0xb5   :  { %6082 = vtanh.f32 %v908_v41  ;;  %v4309_v41 = vld [vmem:[#allocation8 + $0x2d0] sm:$0xf0] }
  0xb6   :  { %v4312_v55 = vor.u32 %v5737_v40, %v4309_v41 }
  0xb7   :  { %v838_v44 = vpop.f32.mrf.mxu2  ;;  %v851_v46 = vpop.f32.mrf.mxu3 }
  0xb8   :  { %v839_v45 = vadd.f32 %v838_v44, %v625_v42  ;;  %v814_v47 = vpop.f32.mrf.mxu0  ;;  %v852_v48 = vadd.f32 %v851_v46, %v626_v43  ;;  %v827_v49 = vpop.f32.mrf.mxu1  ;;  %v5769_v42 = vld [vmem:[#allocation8 + $0x3c4] sm:$0xf]  ;;  %v4437_v46 = vld [vmem:[#allocation8 + $0x3d0] sm:$0xf0] }
  0xb9   :  { %v5665_v47 = vld [vmem:[#allocation8 + $0x84] sm:$0xf]  ;;  %v4440_v61 = vor.u32 %v5769_v42, %v4437_v46  ;;  %v4101_v46 = vld [vmem:[#allocation8 + $0x130] sm:$0xf0] }
  0xba   :  { %v909_v50 = vmul.f32 0.5, %v839_v45  ;;  %v6081_v51 = vpop.eup %6080  ;;  %v910_v52 = vmul.f32 0.5, %v852_v48  ;;  %v4021_v48 = vld [vmem:[#allocation8 + $0x90] sm:$0xf0]  ;;  %v5653_v42 = vld [vmem:[#allocation8 + $0x24] sm:$0xf] }
  0xbb   :  { %v6083_v53 = vpop.eup %6082  ;;  %v923_v54 = vmul.f32 0.5, %v6081_v51  ;;  %v5697_v51 = vld [vmem:[#allocation8 + $0x184] sm:$0xf] }
  0xbc   :  { %6084 = vtanh.f32 %v909_v50  ;;  %v924_v57 = vmul.f32 0.5, %v6083_v53 }
  0xbd   :  { %6086 = vtanh.f32 %v910_v52  ;;  %v931_v62 = vadd.f32 0.5, %v923_v54  ;;  %v4149_v52 = vld [vmem:[#allocation8 + $0x190] sm:$0xf0] }
  0xbe   :  { %v932_v0 = vadd.f32 0.5, %v924_v57  ;;  %v4293_v57 = vld [vmem:[#allocation8 + $0x2b0] sm:$0xf0] }
  0xbf   :  { %v840_v1 = vpop.f32.mrf.mxu2  ;;  %v6426_v3 = vpack.c.bf16 %v931_v62, %v931_v62  ;;  %v853_v4 = vpop.f32.mrf.mxu3  ;;  %v4024_v62 = vor.u32 %v5665_v47, %v4021_v48  ;;  %v4296_v12 = vor.u32 %v5733_v56, %v4293_v57  ;;  %v4373_v57 = vld [vmem:[#allocation8 + $0x350] sm:$0xf0] }
  0xc0   :  { %v864_v5 = vpop.f32.mrf.mxu0  ;;  %v6428_v9 = vpack.c.bf16 %v932_v0, %v932_v0  ;;  %v877_v11 = vpop.f32.mrf.mxu1  ;;  %v4421_v0 = vld [vmem:[#allocation8 + $0x3b0] sm:$0xf0]  ;;  %v4152_v4 = vor.u32 %v5697_v51, %v4149_v52  ;;  %v5721_v51 = vld [vmem:[#allocation8 + $0x244] sm:$0xf] }
  0xc1   :  { %v865_v10 = vadd.f32 %v864_v5, %v627_v58  ;;  %v878_v60 = vadd.f32 %v877_v11, %v628_v63  ;;  %2244 = vmatmul.bf16.vlgmr.msra.gmra.mxu0 %v6426_v3  ;;  %v5765_v63 = vld [vmem:[#allocation8 + $0x3a4] sm:$0xf]  ;;  %v4245_v52 = vld [vmem:[#allocation8 + $0x250] sm:$0xf0] }
  0xc2   :  { %v6085_v14 = vpop.eup %6084  ;;  %2257 = vmatmul.bf16.vlgmr.msra.gmra.mxu1 %v6428_v9  ;;  %2340 = vmatpush.bf16.msra.mxu0 %v4072_v2  ;;  %v5661_v5 = vld [vmem:[#allocation8 + $0x64] sm:$0xf] }
  0xc3   :  { %v6087_v18 = vpop.eup %6086  ;;  %v925_v19 = vmul.f32 0.5, %v6085_v14  ;;  %v911_v20 = vmul.f32 0.5, %v865_v10  ;;  %v912_v25 = vmul.f32 0.5, %v878_v60  ;;  %2353 = vmatpush.bf16.msra.mxu1 %v4200_v6  ;;  %v4005_v6 = vld [vmem:[#allocation8 + $0x70] sm:$0xf0]  ;;  %v4424_v14 = vor.u32 %v5765_v63, %v4421_v0 }
  0xc4   :  { %v926_v24 = vmul.f32 0.5, %v6087_v18  ;;  %v4133_v10 = vld [vmem:[#allocation8 + $0x170] sm:$0xf0]  ;;  %v4008_v18 = vor.u32 %v5661_v5, %v4005_v6  ;;  %v5805_v63 = vld [vmem:[#allocation8 + $0x4e4] sm:$0xf]  ;;  %v4248_v0 = vor.u32 %v5721_v51, %v4245_v52 }
  0xc5   :  { %v933_v29 = vadd.f32 0.5, %v925_v19  ;;  %6088 = vtanh.f32 %v911_v20  ;;  %v4136_v19 = vor.u32 %v5693_v8, %v4133_v10  ;;  %v5761_v20 = vld [vmem:[#allocation8 + $0x384] sm:$0xf]  ;;  %v4661_v52 = vld [vmem:[#allocation8 + $0x590] sm:$0xf0] }
  0xc6   :  { %v934_v34 = vadd.f32 0.5, %v926_v24  ;;  %6090 = vtanh.f32 %v912_v25  ;;  %2341 = vmatpush.bf16.msra.mxu0 %v4056_v21  ;;  %v4405_v21 = vld [vmem:[#allocation8 + $0x390] sm:$0xf0]  ;;  %v5717_v6 = vld [vmem:[#allocation8 + $0x224] sm:$0xf] }
  0xc7   :  { %v6434_v36 = vpack.c.bf16 %v933_v29, %v933_v29  ;;  %v890_v37 = vpop.f32.mrf.mxu2  ;;  %v903_v45 = vpop.f32.mrf.mxu3  ;;  %2354 = vmatpush.bf16.msra.mxu1 %v4184_v26  ;;  %v3989_v25 = vld [vmem:[#allocation8 + $0x50] sm:$0xf0]  ;;  %v5689_v26 = vld [vmem:[#allocation8 + $0x144] sm:$0xf] }
  0xc8   :  { %v6436_v43 = vpack.c.bf16 %v934_v34, %v934_v34  ;;  %v891_v44 = vadd.f32 %v890_v37, %v629_v15  ;;  %v866_v49 = vpop.f32.mrf.mxu0  ;;  %v904_v50 = vadd.f32 %v903_v45, %v630_v30  ;;  %v879_v53 = vpop.f32.mrf.mxu1  ;;  %v5729_v15 = vld [vmem:[#allocation8 + $0x284] sm:$0xf]  ;;  %v3992_v40 = vor.u32 %v5657_v23, %v3989_v25  ;;  %v4341_v25 = vld [vmem:[#allocation8 + $0x310] sm:$0xf0] }
  0xc9   :  { %2270 = vmatmul.bf16.vlgmr.msra.gmra.mxu2 %v6434_v36  ;;  %v4280_v29 = vor.u32 %v5729_v15, %v4277_v16  ;;  %v5725_v30 = vld [vmem:[#allocation8 + $0x264] sm:$0xf]  ;;  %v4120_v41 = vor.u32 %v5689_v26, %v4117_v27  ;;  %v4565_v16 = vld [vmem:[#allocation8 + $0x4d0] sm:$0xf0] }
  0xca   :  { %v913_v54 = vmul.f32 0.5, %v891_v44  ;;  %2283 = vmatmul.bf16.vlgmr.msra.gmra.mxu3 %v6436_v43  ;;  %2366 = vmatpush.bf16.msra.mxu2 %v4328_v35  ;;  %v914_v59 = vmul.f32 0.5, %v904_v50  ;;  %v4408_v35 = vor.u32 %v5761_v20, %v4405_v21  ;;  %v5757_v37 = vld [vmem:[#allocation8 + $0x364] sm:$0xf]  ;;  %v3973_v44 = vld [vmem:[#allocation8 + $0x30] sm:$0xf0]  ;;  %v4264_v48 = vor.u32 %v5725_v30, %v4261_v31 }
  0xcb   :  { %v6089_v58 = vpop.eup %6088  ;;  %2379 = vmatpush.bf16.msra.mxu3 %v4456_v38  ;;  %2342 = vmatpush.bf16.msra.mxu0 %v4040_v39  ;;  %v4389_v38 = vld [vmem:[#allocation8 + $0x370] sm:$0xf0]  ;;  %v5753_v53 = vld [vmem:[#allocation8 + $0x344] sm:$0xf] }
  0xcc   :  { %v6091_v1 = vpop.eup %6090  ;;  %v927_v2 = vmul.f32 0.5, %v6089_v58  ;;  %6092 = vtanh.f32 %v913_v54  ;;  %2355 = vmatpush.bf16.msra.mxu1 %v4168_v33  ;;  %v5685_v33 = vld [vmem:[#allocation8 + $0x124] sm:$0xf]  ;;  %v4392_v50 = vor.u32 %v5757_v37, %v4389_v38  ;;  %v4376_v5 = vor.u32 %v5753_v53, %v4373_v57  ;;  %v4837_v27 = vld [vmem:[#allocation8 + $0x6f0] sm:$0xf0] }
  0xcd   :  { %v928_v7 = vmul.f32 0.5, %v6091_v1  ;;  %6094 = vtanh.f32 %v914_v59  ;;  %v4104_v56 = vor.u32 %v5685_v33, %v4101_v46  ;;  %v5649_v58 = vld [vmem:[#allocation8 + $0x4] sm:$0xf]  ;;  %v3957_v59 = vld [vmem:[#allocation8 + $0x10] sm:$0xf0] }
  0xce   :  { %v935_v11 = vadd.f32 0.5, %v927_v2  ;;  %2367 = vmatpush.bf16.msra.mxu2 %v4312_v55  ;;  %v3976_v55 = vor.u32 %v5653_v42, %v3973_v44  ;;  %v4581_v1 = vld [vmem:[#allocation8 + $0x4f0] sm:$0xf0]  ;;  %v5837_v2 = vld [vmem:[#allocation8 + $0x5e4] sm:$0xf]  ;;  %v3960_v8 = vor.u32 %v5649_v58, %v3957_v59 }
  0xcf   :  { %v936_v13 = vadd.f32 0.5, %v928_v7  ;;  %2380 = vmatpush.bf16.msra.mxu3 %v4440_v61  ;;  %2343 = vmatpush.bf16.msra.mxu0 %v4024_v62  ;;  %v892_v60 = vpop.f32.mrf.mxu2  ;;  %v905_v22 = vpop.f32.mrf.mxu3  ;;  %v5681_v61 = vld [vmem:[#allocation8 + $0x104] sm:$0xf]  ;;  %v4085_v62 = vld [vmem:[#allocation8 + $0x110] sm:$0xf0] }
  0xd0   :  { %v6440_v17 = vpack.c.bf16 %v935_v11, %v935_v11  ;;  %2356 = vmatpush.bf16.msra.mxu1 %v4152_v4  ;;  %v4709_v4 = vld [vmem:[#allocation8 + $0x5f0] sm:$0xf0]  ;;  %v4088_v10 = vor.u32 %v5681_v61, %v4085_v62  ;;  %v5749_v11 = vld [vmem:[#allocation8 + $0x324] sm:$0xf] }
  0xd1   :  { %v6442_v24 = vpack.c.bf16 %v936_v13, %v936_v13  ;;  %v4229_v7 = vld [vmem:[#allocation8 + $0x230] sm:$0xf0]  ;;  %v4584_v13 = vor.u32 %v5805_v63, %v4581_v1  ;;  %v5801_v60 = vld [vmem:[#allocation8 + $0x4c4] sm:$0xf] }
  0xd2   :  { %v6093_v28 = vpop.eup %6092  ;;  %2368 = vmatpush.bf16.msra.mxu2 %v4296_v12  ;;  %2296 = vmatmul.bf16.vlgmr.msrb.gmra.mxu0 %v6440_v17  ;;  %v4357_v12 = vld [vmem:[#allocation8 + $0x330] sm:$0xf0]  ;;  %v4232_v15 = vor.u32 %v5717_v6, %v4229_v7  ;;  %v5713_v21 = vld [vmem:[#allocation8 + $0x204] sm:$0xf] }
  0xd3   :  { %v6095_v32 = vpop.eup %6094  ;;  %v929_v34 = vmul.f32 0.5, %v6093_v28  ;;  %2381 = vmatpush.bf16.msra.mxu3 %v4424_v14  ;;  %2309 = vmatmul.bf16.vlgmr.msrb.gmra.mxu1 %v6442_v24  ;;  %v4712_v14 = vor.u32 %v5837_v2, %v4709_v4  ;;  %v4360_v20 = vor.u32 %v5749_v11, %v4357_v12  ;;  %v4213_v22 = vld [vmem:[#allocation8 + $0x210] sm:$0xf0]  ;;  %v5745_v23 = vld [vmem:[#allocation8 + $0x304] sm:$0xf]  ;;  %v4568_v28 = vor.u32 %v5801_v60, %v4565_v16 }
  0xd4   :  { %v930_v39 = vmul.f32 0.5, %v6095_v32  ;;  %2344 = vmatpush.bf16.msra.mxu0 %v4008_v18  ;;  %2357 = vmatpush.bf16.msra.mxu1 %v4136_v19  ;;  %v5833_v18 = vld [vmem:[#allocation8 + $0x5c4] sm:$0xf]  ;;  %v4693_v19 = vld [vmem:[#allocation8 + $0x5d0] sm:$0xf0] }
  0xd5   :  { %v937_v45 = vadd.f32 0.5, %v929_v34  ;;  %v5869_v26 = vld [vmem:[#allocation8 + $0x6e4] sm:$0xf]  ;;  %v4965_v31 = vld [vmem:[#allocation8 + $0x7f0] sm:$0xf0]  ;;  %v4216_v34 = vor.u32 %v5713_v21, %v4213_v22 }
  0xd6   :  { %v938_v47 = vadd.f32 0.5, %v930_v39  ;;  %2369 = vmatpush.bf16.msra.mxu2 %v4280_v29  ;;  %v4696_v29 = vor.u32 %v5833_v18, %v4693_v19  ;;  %v5901_v30 = vld [vmem:[#allocation8 + $0x7e4] sm:$0xf]  ;;  %v4677_v38 = vld [vmem:[#allocation8 + $0x5b0] sm:$0xf0]  ;;  %v4344_v39 = vor.u32 %v5745_v23, %v4341_v25 }
  0xd7   :  { %v6446_v49 = vpack.c.bf16 %v937_v45, %v937_v45  ;;  %2382 = vmatpush.bf16.msra.mxu3 %v4408_v35  ;;  %v5797_v32 = vld [vmem:[#allocation8 + $0x4a4] sm:$0xf]  ;;  %v4549_v35 = vld [vmem:[#allocation8 + $0x4b0] sm:$0xf0] }
  0xd8   :  { %v6448_v54 = vpack.c.bf16 %v938_v47, %v938_v47  ;;  %2345 = vmatpush.bf16.msra.mxu0 %v3992_v40  ;;  %2358 = vmatpush.bf16.msra.mxu1 %v4120_v41  ;;  %v5829_v37 = vld [vmem:[#allocation8 + $0x5a4] sm:$0xf]  ;;  %v4840_v40 = vor.u32 %v5869_v26, %v4837_v27  ;;  %v4968_v41 = vor.u32 %v5901_v30, %v4965_v31  ;;  %v4821_v44 = vld [vmem:[#allocation8 + $0x6d0] sm:$0xf0] }
  0xd9   :  { %2322 = vmatmul.bf16.vlgmr.msrb.gmra.mxu2 %v6446_v49  ;;  %v5865_v42 = vld [vmem:[#allocation8 + $0x6c4] sm:$0xf]  ;;  %v4552_v45 = vor.u32 %v5797_v32, %v4549_v35  ;;  %v4680_v33 = vor.u32 %v5829_v37, %v4677_v38  ;;  %v4949_v47 = vld [vmem:[#allocation8 + $0x7d0] sm:$0xf0] }
  0xda   :  { %2335 = vmatmul.bf16.vlgmr.msrb.gmra.mxu3 %v6448_v54  ;;  %2370 = vmatpush.bf16.msra.mxu2 %v4264_v48  ;;  %v5897_v46 = vld [vmem:[#allocation8 + $0x7c4] sm:$0xf]  ;;  %v4824_v53 = vor.u32 %v5865_v42, %v4821_v44  ;;  %v4805_v57 = vld [vmem:[#allocation8 + $0x6b0] sm:$0xf0] }
  0xdb   :  { %2383 = vmatpush.bf16.msra.mxu3 %v4392_v50  ;;  %v5793_v48 = vld [vmem:[#allocation8 + $0x484] sm:$0xf]  ;;  %v4533_v50 = vld [vmem:[#allocation8 + $0x490] sm:$0xf0] }
  0xdc   :  { %2346 = vmatpush.bf16.msra.mxu0 %v3976_v55  ;;  %2359 = vmatpush.bf16.msra.mxu1 %v4104_v56  ;;  %v5825_v51 = vld [vmem:[#allocation8 + $0x584] sm:$0xf]  ;;  %v4952_v55 = vor.u32 %v5897_v46, %v4949_v47  ;;  %v4536_v58 = vor.u32 %v5793_v48, %v4533_v50  ;;  %v4933_v62 = vld [vmem:[#allocation8 + $0x7b0] sm:$0xf0]  ;;  %v5680_v46 = vld [vmem:[#allocation8 + $0xf4] sm:$0xf0] }
  0xdd   :  { %v5861_v56 = vld [vmem:[#allocation8 + $0x6a4] sm:$0xf]  ;;  %v4664_v59 = vor.u32 %v5825_v51, %v4661_v52  ;;  %v4645_v2 = vld [vmem:[#allocation8 + $0x570] sm:$0xf0]  ;;  %v4203_v47 = vld [vmem:[#allocation8 + $0x1e8] sm:$0xf] }
  0xde   :  { %2371 = vmatpush.bf16.msra.mxu2 %v4248_v0  ;;  %v5893_v61 = vld [vmem:[#allocation8 + $0x7a4] sm:$0xf]  ;;  %v4517_v0 = vld [vmem:[#allocation8 + $0x470] sm:$0xf0]  ;;  %v4808_v4 = vor.u32 %v5861_v56, %v4805_v57  ;;  %v5712_v48 = vld [vmem:[#allocation8 + $0x1f4] sm:$0xf0] }
  0xdf   :  { %2384 = vmatpush.bf16.msra.mxu3 %v4376_v5  ;;  %v5789_v63 = vld [vmem:[#allocation8 + $0x464] sm:$0xf]  ;;  %v4936_v5 = vor.u32 %v5893_v61, %v4933_v62  ;;  %v4789_v7 = vld [vmem:[#allocation8 + $0x690] sm:$0xf0]  ;;  %v4059_v61 = vld [vmem:[#allocation8 + $0xc8] sm:$0xf] }
  0xe0   :  { %2347 = vmatpush.bf16.msra.mxu0 %v3960_v8  ;;  %2360 = vmatpush.bf16.msra.mxu1 %v4088_v10  ;;  %v5821_v1 = vld [vmem:[#allocation8 + $0x564] sm:$0xf]  ;;  %v4520_v8 = vor.u32 %v5789_v63, %v4517_v0  ;;  %v4917_v12 = vld [vmem:[#allocation8 + $0x790] sm:$0xf0]  ;;  %v5676_v63 = vld [vmem:[#allocation8 + $0xd4] sm:$0xf0] }
  0xe1   :  { %v5857_v6 = vld [vmem:[#allocation8 + $0x684] sm:$0xf]  ;;  %v4648_v10 = vor.u32 %v5821_v1, %v4645_v2  ;;  %v4901_v25 = vld [vmem:[#allocation8 + $0x770] sm:$0xf0]  ;;  %v4187_v0 = vld [vmem:[#allocation8 + $0x1c8] sm:$0xf] }
  0xe2   :  { %2372 = vmatpush.bf16.msra.mxu2 %v4232_v15  ;;  %v5889_v11 = vld [vmem:[#allocation8 + $0x784] sm:$0xf]  ;;  %v4629_v15 = vld [vmem:[#allocation8 + $0x550] sm:$0xf0]  ;;  %v4792_v16 = vor.u32 %v5857_v6, %v4789_v7  ;;  %v5708_v1 = vld [vmem:[#allocation8 + $0x1d4] sm:$0xf0] }
  0xe3   :  { %2385 = vmatpush.bf16.msra.mxu3 %v4360_v20  ;;  %2348 = vmatmul.bf16.vlgmr.msra.gmra.mxu0 %v6426_v3  ;;  %v5817_v60 = vld [vmem:[#allocation8 + $0x544] sm:$0xf]  ;;  %v4920_v18 = vor.u32 %v5889_v11, %v4917_v12  ;;  %v4773_v20 = vld [vmem:[#allocation8 + $0x670] sm:$0xf0]  ;;  %v4060_v11 = vor.u32 %v5676_v63, %v4059_v61  ;;  %v4188_v12 = vor.u32 %v5708_v1, %v4187_v0  ;;  %v5692_v63 = vld [vmem:[#allocation8 + $0x154] sm:$0xf0] }
  0xe4   :  { %2392 = vmatpush.bf16.msrb.mxu0 %v4584_v13  ;;  %2405 = vmatpush.bf16.msrb.mxu1 %v4712_v14  ;;  %v5785_v13 = vld [vmem:[#allocation8 + $0x444] sm:$0xf]  ;;  %v4501_v14 = vld [vmem:[#allocation8 + $0x450] sm:$0xf0]  ;;  %v4632_v22 = vor.u32 %v5817_v60, %v4629_v15  ;;  %v4043_v15 = vld [vmem:[#allocation8 + $0xa8] sm:$0xf] }
  0xe5   :  { %2361 = vmatmul.bf16.vlgmr.msra.gmra.mxu1 %v6428_v9  ;;  %v5853_v19 = vld [vmem:[#allocation8 + $0x664] sm:$0xf]  ;;  %v4504_v21 = vor.u32 %v5785_v13, %v4501_v14  ;;  %v4485_v27 = vld [vmem:[#allocation8 + $0x430] sm:$0xf0]  ;;  %v4459_v13 = vld [vmem:[#allocation8 + $0x3e8] sm:$0xf] }
  0xe6   :  { %2373 = vmatpush.bf16.msra.mxu2 %v4216_v34  ;;  %v5885_v23 = vld [vmem:[#allocation8 + $0x764] sm:$0xf]  ;;  %v4776_v30 = vor.u32 %v5853_v19, %v4773_v20  ;;  %v4757_v34 = vld [vmem:[#allocation8 + $0x650] sm:$0xf0]  ;;  %v5776_v14 = vld [vmem:[#allocation8 + $0x3f4] sm:$0xf0] }
  0xe7   :  { %2386 = vmatpush.bf16.msra.mxu3 %v4344_v39  ;;  %v5781_v26 = vld [vmem:[#allocation8 + $0x424] sm:$0xf]  ;;  %v4904_v31 = vor.u32 %v5885_v23, %v4901_v25  ;;  %v4885_v39 = vld [vmem:[#allocation8 + $0x750] sm:$0xf0]  ;;  %v4171_v20 = vld [vmem:[#allocation8 + $0x1a8] sm:$0xf] }
  0xe8   :  { %2393 = vmatpush.bf16.msrb.mxu0 %v4568_v28  ;;  %2406 = vmatpush.bf16.msrb.mxu1 %v4696_v29  ;;  %v5813_v28 = vld [vmem:[#allocation8 + $0x524] sm:$0xf]  ;;  %v4613_v29 = vld [vmem:[#allocation8 + $0x530] sm:$0xf0]  ;;  %v4488_v37 = vor.u32 %v5781_v26, %v4485_v27  ;;  %v4315_v23 = vld [vmem:[#allocation8 + $0x2c8] sm:$0xf] }
  0xe9   :  { %2374 = vmatmul.bf16.vlgmr.msra.gmra.mxu2 %v6434_v36  ;;  %v5849_v32 = vld [vmem:[#allocation8 + $0x644] sm:$0xf]  ;;  %v4616_v38 = vor.u32 %v5813_v28, %v4613_v29  ;;  %v4597_v44 = vld [vmem:[#allocation8 + $0x510] sm:$0xf0]  ;;  %v5740_v25 = vld [vmem:[#allocation8 + $0x2d4] sm:$0xf0] }
  0xea   :  { %2418 = vmatpush.bf16.msrb.mxu2 %v4840_v40  ;;  %2387 = vmatmul.bf16.vlgmr.msra.gmra.mxu3 %v6436_v43  ;;  %v5881_v35 = vld [vmem:[#allocation8 + $0x744] sm:$0xf]  ;;  %v4741_v52 = vld [vmem:[#allocation8 + $0x630] sm:$0xf0]  ;;  %v4443_v27 = vld [vmem:[#allocation8 + $0x3c8] sm:$0xf] }
  0xeb   :  { %2431 = vmatpush.bf16.msrb.mxu3 %v4968_v41  ;;  %v5777_v40 = vld [vmem:[#allocation8 + $0x404] sm:$0xf]  ;;  %v4469_v41 = vld [vmem:[#allocation8 + $0x410] sm:$0xf0]  ;;  %v4888_v50 = vor.u32 %v5881_v35, %v4885_v39  ;;  %v5772_v28 = vld [vmem:[#allocation8 + $0x3d4] sm:$0xf0] }
  0xec   :  { %2394 = vmatpush.bf16.msrb.mxu0 %v4552_v45  ;;  %2407 = vmatpush.bf16.msrb.mxu1 %v4680_v33  ;;  %v5809_v42 = vld [vmem:[#allocation8 + $0x504] sm:$0xf]  ;;  %v4075_v45 = vld [vmem:[#allocation8 + $0xe8] sm:$0xf]  ;;  %v4760_v33 = vor.u32 %v5849_v32, %v4757_v34  ;;  %v4869_v57 = vld [vmem:[#allocation8 + $0x730] sm:$0xf0]  ;;  %v4316_v32 = vor.u32 %v5740_v25, %v4315_v23 }
  0xed   :  { %v5845_v51 = vld [vmem:[#allocation8 + $0x624] sm:$0xf]  ;;  %v4853_v7 = vld [vmem:[#allocation8 + $0x710] sm:$0xf0]  ;;  %v4155_v34 = vld [vmem:[#allocation8 + $0x188] sm:$0xf] }
  0xee   :  { %2419 = vmatpush.bf16.msrb.mxu2 %v4824_v53  ;;  %v4472_v53 = vor.u32 %v5777_v40, %v4469_v41  ;;  %v5877_v56 = vld [vmem:[#allocation8 + $0x724] sm:$0xf]  ;;  %v4744_v62 = vor.u32 %v5845_v51, %v4741_v52  ;;  %v5700_v35 = vld [vmem:[#allocation8 + $0x194] sm:$0xf0]  ;;  %v4427_v41 = vld [vmem:[#allocation8 + $0x3a8] sm:$0xf] }
  0xef   :  { %2432 = vmatpush.bf16.msrb.mxu3 %v4952_v55  ;;  %v4600_v55 = vor.u32 %v5809_v42, %v4597_v44  ;;  %v4872_v2 = vor.u32 %v5877_v56, %v4869_v57  ;;  %v5873_v6 = vld [vmem:[#allocation8 + $0x704] sm:$0xf]  ;;  %v5736_v39 = vld [vmem:[#allocation8 + $0x2b4] sm:$0xf0]  ;;  %v4156_v44 = vor.u32 %v5700_v35, %v4155_v34  ;;  %v4283_v51 = vld [vmem:[#allocation8 + $0x288] sm:$0xf] }
  0xf0   :  { %2395 = vmatpush.bf16.msrb.mxu0 %v4536_v58  ;;  %2408 = vmatpush.bf16.msrb.mxu1 %v4664_v59  ;;  %v4076_v58 = vor.u32 %v5680_v46, %v4075_v45  ;;  %v4204_v59 = vor.u32 %v5712_v48, %v4203_v47  ;;  %v5768_v42 = vld [vmem:[#allocation8 + $0x3b4] sm:$0xf0]  ;;  %v4011_v45 = vld [vmem:[#allocation8 + $0x68] sm:$0xf] }
  0xf1   :  { %v4139_v47 = vld [vmem:[#allocation8 + $0x168] sm:$0xf]  ;;  %v5696_v48 = vld [vmem:[#allocation8 + $0x174] sm:$0xf0] }
  0xf2   :  { %2420 = vmatpush.bf16.msrb.mxu2 %v4808_v4  ;;  %v5841_v4 = vld [vmem:[#allocation8 + $0x604] sm:$0xf]  ;;  %v5732_v52 = vld [vmem:[#allocation8 + $0x294] sm:$0xf0]  ;;  %v4140_v57 = vor.u32 %v5696_v48, %v4139_v47  ;;  %v4267_v1 = vld [vmem:[#allocation8 + $0x268] sm:$0xf] }
  0xf3   :  { %2433 = vmatpush.bf16.msrb.mxu3 %v4936_v5  ;;  %v4725_v5 = vld [vmem:[#allocation8 + $0x610] sm:$0xf0]  ;;  %v5764_v56 = vld [vmem:[#allocation8 + $0x394] sm:$0xf0]  ;;  %v4284_v61 = vor.u32 %v5732_v52, %v4283_v51  ;;  %v4091_v23 = vld [vmem:[#allocation8 + $0x108] sm:$0xf] }
  0xf4   :  { %2396 = vmatpush.bf16.msrb.mxu0 %v4520_v8  ;;  %2409 = vmatpush.bf16.msrb.mxu1 %v4648_v10  ;;  %v4331_v8 = vld [vmem:[#allocation8 + $0x2e8] sm:$0xf]  ;;  %v5744_v10 = vld [vmem:[#allocation8 + $0x2f4] sm:$0xf0]  ;;  %v4728_v60 = vor.u32 %v5841_v4, %v4725_v5 }
  0xf5   :  { %v4332_v19 = vor.u32 %v5744_v10, %v4331_v8  ;;  %v4395_v5 = vld [vmem:[#allocation8 + $0x368] sm:$0xf]  ;;  %v5656_v10 = vld [vmem:[#allocation8 + $0x34] sm:$0xf0] }
  0xf6   :  { %2421 = vmatpush.bf16.msrb.mxu2 %v4792_v16  ;;  %v5672_v16 = vld [vmem:[#allocation8 + $0xb4] sm:$0xf0]  ;;  %v3979_v8 = vld [vmem:[#allocation8 + $0x28] sm:$0xf] }
  0xf7   :  { %2434 = vmatpush.bf16.msrb.mxu3 %v4920_v18  ;;  %v4856_v18 = vor.u32 %v5873_v6, %v4853_v7  ;;  %v4044_v26 = vor.u32 %v5672_v16, %v4043_v15  ;;  %v5760_v6 = vld [vmem:[#allocation8 + $0x374] sm:$0xf0]  ;;  %v3980_v16 = vor.u32 %v5656_v10, %v3979_v8  ;;  %v4219_v48 = vld [vmem:[#allocation8 + $0x208] sm:$0xf] }
  0xf8   :  { %2397 = vmatpush.bf16.msrb.mxu0 %v4504_v21  ;;  %2410 = vmatpush.bf16.msrb.mxu1 %v4632_v22  ;;  %v5704_v21 = vld [vmem:[#allocation8 + $0x1b4] sm:$0xf0]  ;;  %v4460_v22 = vor.u32 %v5776_v14, %v4459_v13  ;;  %v4396_v14 = vor.u32 %v5760_v6, %v4395_v5  ;;  %v4347_v51 = vld [vmem:[#allocation8 + $0x308] sm:$0xf] }
  0xf9   :  { %v4172_v29 = vor.u32 %v5704_v21, %v4171_v20  ;;  %v5688_v13 = vld [vmem:[#allocation8 + $0x134] sm:$0xf0]  ;;  %v3963_v20 = vld [vmem:[#allocation8 + $0x8] sm:$0xf] }
  0xfa   :  { %2422 = vmatpush.bf16.msrb.mxu2 %v4776_v30  ;;  %v4027_v30 = vld [vmem:[#allocation8 + $0x88] sm:$0xf]  ;;  %v5724_v15 = vld [vmem:[#allocation8 + $0x254] sm:$0xf0] }
  0xfb   :  { %2435 = vmatpush.bf16.msrb.mxu3 %v4904_v31  ;;  %v5668_v31 = vld [vmem:[#allocation8 + $0x94] sm:$0xf0]  ;;  %v4827_v6 = vld [vmem:[#allocation8 + $0x6c8] sm:$0xf] }
  0xfc   :  { %2398 = vmatpush.bf16.msrb.mxu0 %v4488_v37  ;;  %2411 = vmatpush.bf16.msrb.mxu1 %v4616_v38  ;;  %v4444_v37 = vor.u32 %v5772_v28, %v4443_v27  ;;  %v4299_v38 = vld [vmem:[#allocation8 + $0x2a8] sm:$0xf]  ;;  %v4028_v40 = vor.u32 %v5668_v31, %v4027_v30  ;;  %v5684_v25 = vld [vmem:[#allocation8 + $0x114] sm:$0xf0] }
  0xfd   :  { %v4300_v46 = vor.u32 %v5736_v39, %v4299_v38  ;;  %v4587_v27 = vld [vmem:[#allocation8 + $0x4e8] sm:$0xf]  ;;  %v5808_v28 = vld [vmem:[#allocation8 + $0x4f4] sm:$0xf0]  ;;  %v4092_v39 = vor.u32 %v5684_v25, %v4091_v23 }
  0xfe   :  { %2423 = vmatpush.bf16.msrb.mxu2 %v4760_v33  ;;  %v5664_v33 = vld [vmem:[#allocation8 + $0x74] sm:$0xf0]  ;;  %v4955_v10 = vld [vmem:[#allocation8 + $0x7c8] sm:$0xf] }
  0xff   :  { %2436 = vmatpush.bf16.msrb.mxu3 %v4888_v50  ;;  %v4428_v50 = vor.u32 %v5768_v42, %v4427_v41  ;;  %v5840_v31 = vld [vmem:[#allocation8 + $0x5f4] sm:$0xf0]  ;;  %v4571_v41 = vld [vmem:[#allocation8 + $0x4c8] sm:$0xf] }
 0x100   :  { %2399 = vmatpush.bf16.msrb.mxu0 %v4472_v53  ;;  %2412 = vmatpush.bf16.msrb.mxu1 %v4600_v55  ;;  %v4012_v53 = vor.u32 %v5664_v33, %v4011_v45  ;;  %v4411_v55 = vld [vmem:[#allocation8 + $0x388] sm:$0xf]  ;;  %v5720_v34 = vld [vmem:[#allocation8 + $0x234] sm:$0xf0] }
 0x101   :  { %v4412_v0 = vor.u32 %v5764_v56, %v4411_v55  ;;  %v5752_v38 = vld [vmem:[#allocation8 + $0x334] sm:$0xf0]  ;;  %v4699_v33 = vld [vmem:[#allocation8 + $0x5c8] sm:$0xf] }
 0x102   :  { %2424 = vmatpush.bf16.msrb.mxu2 %v4744_v62  ;;  %v4123_v62 = vld [vmem:[#allocation8 + $0x148] sm:$0xf]  ;;  %v5804_v45 = vld [vmem:[#allocation8 + $0x4d4] sm:$0xf0] }
 0x103   :  { %2437 = vmatpush.bf16.msrb.mxu3 %v4872_v2  ;;  %2400 = vmatmul.bf16.vlgmr.msrb.gmra.mxu0 %v6440_v17  ;;  %v5728_v2 = vld [vmem:[#allocation8 + $0x274] sm:$0xf0]  ;;  %v4124_v7 = vor.u32 %v5692_v63, %v4123_v62  ;;  %v4572_v56 = vor.u32 %v5804_v45, %v4571_v41  ;;  %v4555_v62 = vld [vmem:[#allocation8 + $0x4a8] sm:$0xf] }
 0x104   :  { %2444 = vmatpush.bf16.msra.mxu0 %v4076_v58  ;;  %2457 = vmatpush.bf16.msra.mxu1 %v4204_v59  ;;  %v3995_v58 = vld [vmem:[#allocation8 + $0x48] sm:$0xf]  ;;  %v5660_v59 = vld [vmem:[#allocation8 + $0x54] sm:$0xf0] }
 0x105   :  { %2413 = vmatmul.bf16.vlgmr.msrb.gmra.mxu1 %v6442_v24  ;;  %v3996_v4 = vor.u32 %v5660_v59, %v3995_v58  ;;  %v5748_v52 = vld [vmem:[#allocation8 + $0x314] sm:$0xf0] }
 0x106   :  { %2425 = vmatpush.bf16.msrb.mxu2 %v4728_v60  ;;  %v4251_v60 = vld [vmem:[#allocation8 + $0x248] sm:$0xf]  ;;  %v5872_v55 = vld [vmem:[#allocation8 + $0x6f4] sm:$0xf0] }
 0x107   :  { %2438 = vmatpush.bf16.msrb.mxu3 %v4856_v18  ;;  %v4379_v18 = vld [vmem:[#allocation8 + $0x348] sm:$0xf]  ;;  %v5904_v58 = vld [vmem:[#allocation8 + $0x7f4] sm:$0xf0] }
 0x108   :  { %2445 = vmatpush.bf16.msra.mxu0 %v4060_v11  ;;  %2458 = vmatpush.bf16.msra.mxu1 %v4188_v12  ;;  %v4268_v11 = vor.u32 %v5728_v2, %v4267_v1  ;;  %v4107_v12 = vld [vmem:[#allocation8 + $0x128] sm:$0xf]  ;;  %v5800_v63 = vld [vmem:[#allocation8 + $0x4b4] sm:$0xf0] }
 0x109   :  { %2426 = vmatmul.bf16.vlgmr.msrb.gmra.mxu2 %v6446_v49  ;;  %v4108_v21 = vor.u32 %v5688_v13, %v4107_v12  ;;  %v4683_v2 = vld [vmem:[#allocation8 + $0x5a8] sm:$0xf]  ;;  %v4556_v8 = vor.u32 %v5800_v63, %v4555_v62  ;;  %v5896_v23 = vld [vmem:[#allocation8 + $0x7b4] sm:$0xf0] }
 0x10a   :  { %2470 = vmatpush.bf16.msra.mxu2 %v4332_v19  ;;  %2439 = vmatmul.bf16.vlgmr.msrb.gmra.mxu3 %v6448_v54  ;;  %v5756_v19 = vld [vmem:[#allocation8 + $0x354] sm:$0xf0]  ;;  %v4539_v13 = vld [vmem:[#allocation8 + $0x488] sm:$0xf] }
 0x10b   :  { %2483 = vmatpush.bf16.msra.mxu3 %v4460_v22  ;;  %v5652_v22 = vld [vmem:[#allocation8 + $0x14] sm:$0xf0]  ;;  %v4380_v30 = vor.u32 %v5756_v19, %v4379_v18  ;;  %v4811_v19 = vld [vmem:[#allocation8 + $0x6a8] sm:$0xf] }
 0x10c   :  { %2446 = vmatpush.bf16.msra.mxu0 %v4044_v26  ;;  %2459 = vmatpush.bf16.msra.mxu1 %v4172_v29  ;;  %v4252_v26 = vor.u32 %v5724_v15, %v4251_v60  ;;  %v4715_v29 = vld [vmem:[#allocation8 + $0x5e8] sm:$0xf]  ;;  %v3964_v35 = vor.u32 %v5652_v22, %v3963_v20  ;;  %v5864_v20 = vld [vmem:[#allocation8 + $0x6b4] sm:$0xf0] }
 0x10d   :  { %v4716_v42 = vor.u32 %v5840_v31, %v4715_v29  ;;  %v4667_v15 = vld [vmem:[#allocation8 + $0x588] sm:$0xf]  ;;  %v5788_v41 = vld [vmem:[#allocation8 + $0x454] sm:$0xf0] }
 0x10e   :  { %2471 = vmatpush.bf16.msra.mxu2 %v4316_v32  ;;  %v4235_v32 = vld [vmem:[#allocation8 + $0x228] sm:$0xf]  ;;  %v5820_v45 = vld [vmem:[#allocation8 + $0x554] sm:$0xf0] }
 0x10f   :  { %2484 = vmatpush.bf16.msra.mxu3 %v4444_v37  ;;  %v4363_v37 = vld [vmem:[#allocation8 + $0x328] sm:$0xf]  ;;  %v5852_v62 = vld [vmem:[#allocation8 + $0x654] sm:$0xf0] }
 0x110   :  { %2447 = vmatpush.bf16.msra.mxu0 %v4028_v40  ;;  %2460 = vmatpush.bf16.msra.mxu1 %v4156_v44  ;;  %v4588_v40 = vor.u32 %v5808_v28, %v4587_v27  ;;  %v4236_v44 = vor.u32 %v5720_v34, %v4235_v32  ;;  %v4364_v47 = vor.u32 %v5752_v38, %v4363_v37  ;;  %v4939_v22 = vld [vmem:[#allocation8 + $0x7a8] sm:$0xf]  ;;  %v5792_v27 = vld [vmem:[#allocation8 + $0x474] sm:$0xf0] }
 0x111   :  { %v4812_v28 = vor.u32 %v5864_v20, %v4811_v19  ;;  %v4651_v29 = vld [vmem:[#allocation8 + $0x568] sm:$0xf]  ;;  %v4940_v31 = vor.u32 %v5896_v23, %v4939_v22  ;;  %v5860_v34 = vld [vmem:[#allocation8 + $0x694] sm:$0xf0]  ;;  %v5674_v22 = vld [vmem:[#allocation8 + $0xcc] sm:$0xf] }
 0x112   :  { %2472 = vmatpush.bf16.msra.mxu2 %v4300_v46  ;;  %v5836_v46 = vld [vmem:[#allocation8 + $0x5d4] sm:$0xf0]  ;;  %v4795_v32 = vld [vmem:[#allocation8 + $0x688] sm:$0xf] }
 0x113   :  { %2485 = vmatpush.bf16.msra.mxu3 %v4428_v50  ;;  %v5716_v50 = vld [vmem:[#allocation8 + $0x214] sm:$0xf0]  ;;  %v4700_v59 = vor.u32 %v5836_v46, %v4699_v33  ;;  %v4923_v37 = vld [vmem:[#allocation8 + $0x788] sm:$0xf] }
 0x114   :  { %2448 = vmatpush.bf16.msra.mxu0 %v4012_v53  ;;  %2461 = vmatpush.bf16.msra.mxu1 %v4140_v57  ;;  %v4843_v53 = vld [vmem:[#allocation8 + $0x6e8] sm:$0xf]  ;;  %v5892_v38 = vld [vmem:[#allocation8 + $0x794] sm:$0xf0] }
 0x115   :  { %v4971_v57 = vld [vmem:[#allocation8 + $0x7e8] sm:$0xf]  ;;  %v4844_v1 = vor.u32 %v5872_v55, %v4843_v53  ;;  %v4924_v33 = vor.u32 %v5892_v38, %v4923_v37  ;;  %v5784_v55 = vld [vmem:[#allocation8 + $0x434] sm:$0xf0]  ;;  %v4333_v37 = vld [vmem:[#allocation8 + $0x2f8] sm:$0xf0] }
 0x116   :  { %2473 = vmatpush.bf16.msra.mxu2 %v4284_v61  ;;  %v4220_v61 = vor.u32 %v5716_v50, %v4219_v48  ;;  %v4972_v5 = vor.u32 %v5904_v58, %v4971_v57  ;;  %v4779_v46 = vld [vmem:[#allocation8 + $0x668] sm:$0xf]  ;;  %v5816_v58 = vld [vmem:[#allocation8 + $0x534] sm:$0xf0] }
 0x117   :  { %2486 = vmatpush.bf16.msra.mxu3 %v4412_v0  ;;  %v4348_v0 = vor.u32 %v5748_v52, %v4347_v51  ;;  %v4907_v50 = vld [vmem:[#allocation8 + $0x768] sm:$0xf]  ;;  %v5888_v51 = vld [vmem:[#allocation8 + $0x774] sm:$0xf0] }
 0x118   :  { %2449 = vmatpush.bf16.msra.mxu0 %v3996_v4  ;;  %2462 = vmatpush.bf16.msra.mxu1 %v4124_v7  ;;  %v5832_v4 = vld [vmem:[#allocation8 + $0x5b4] sm:$0xf0]  ;;  %v4491_v53 = vld [vmem:[#allocation8 + $0x428] sm:$0xf] }
 0x119   :  { %v5868_v7 = vld [vmem:[#allocation8 + $0x6d4] sm:$0xf0]  ;;  %v4684_v12 = vor.u32 %v5832_v4, %v4683_v2  ;;  %v4619_v57 = vld [vmem:[#allocation8 + $0x528] sm:$0xf]  ;;  %v4492_v63 = vor.u32 %v5784_v55, %v4491_v53  ;;  %v5770_v55 = vld [vmem:[#allocation8 + $0x3cc] sm:$0xf] }
 0x11a   :  { %2474 = vmatpush.bf16.msra.mxu2 %v4268_v11  ;;  %v5900_v11 = vld [vmem:[#allocation8 + $0x7d4] sm:$0xf0]  ;;  %v4828_v60 = vor.u32 %v5868_v7, %v4827_v6  ;;  %v4475_v2 = vld [vmem:[#allocation8 + $0x408] sm:$0xf]  ;;  %v4620_v4 = vor.u32 %v5816_v58, %v4619_v57  ;;  %v5666_v58 = vld [vmem:[#allocation8 + $0x8c] sm:$0xf] }
 0x11b   :  { %2487 = vmatpush.bf16.msra.mxu3 %v4396_v14  ;;  %v5796_v14 = vld [vmem:[#allocation8 + $0x494] sm:$0xf0]  ;;  %v4956_v18 = vor.u32 %v5900_v11, %v4955_v10  ;;  %v4603_v6 = vld [vmem:[#allocation8 + $0x508] sm:$0xf]  ;;  %v5678_v10 = vld [vmem:[#allocation8 + $0xec] sm:$0xf] }
 0x11c   :  { %2450 = vmatpush.bf16.msra.mxu0 %v3980_v16  ;;  %2463 = vmatpush.bf16.msra.mxu1 %v4108_v21  ;;  %v5828_v16 = vld [vmem:[#allocation8 + $0x594] sm:$0xf0]  ;;  %v4540_v21 = vor.u32 %v5796_v14, %v4539_v13  ;;  %v4077_v11 = vld [vmem:[#allocation8 + $0xf8] sm:$0xf0] }
 0x11d   :  { %v4668_v25 = vor.u32 %v5828_v16, %v4667_v15  ;;  %v5812_v7 = vld [vmem:[#allocation8 + $0x514] sm:$0xf0]  ;;  %v4205_v14 = vld [vmem:[#allocation8 + $0x1f8] sm:$0xf0] }
 0x11e   :  { %2475 = vmatpush.bf16.msra.mxu2 %v4252_v26  ;;  %v4523_v26 = vld [vmem:[#allocation8 + $0x468] sm:$0xf]  ;;  %v5848_v15 = vld [vmem:[#allocation8 + $0x634] sm:$0xf0]  ;;  %v4604_v20 = vor.u32 %v5812_v7, %v4603_v6  ;;  %v5766_v7 = vld [vmem:[#allocation8 + $0x3ac] sm:$0xf] }
 0x11f   :  { %2488 = vmatpush.bf16.msra.mxu3 %v4380_v30  ;;  %v5824_v30 = vld [vmem:[#allocation8 + $0x574] sm:$0xf0] }
 0x120   :  { %2451 = vmatpush.bf16.msra.mxu0 %v3964_v35  ;;  %2464 = vmatpush.bf16.msra.mxu1 %v4092_v39  ;;  %v4524_v35 = vor.u32 %v5792_v27, %v4523_v26  ;;  %v4652_v39 = vor.u32 %v5824_v30, %v4651_v29  ;;  %v5880_v19 = vld [vmem:[#allocation8 + $0x734] sm:$0xf0]  ;;  %v4061_v26 = vld [vmem:[#allocation8 + $0xd8] sm:$0xf0]  ;;  %v5706_v27 = vld [vmem:[#allocation8 + $0x1cc] sm:$0xf] }
 0x121   :  { %v4731_v30 = vld [vmem:[#allocation8 + $0x608] sm:$0xf]  ;;  %v4064_v38 = vor.u32 %v5674_v22, %v4061_v26 }
 0x122   :  { %2476 = vmatpush.bf16.msra.mxu2 %v4236_v44  ;;  %v4635_v44 = vld [vmem:[#allocation8 + $0x548] sm:$0xf] }
 0x123   :  { %2489 = vmatpush.bf16.msra.mxu3 %v4364_v47  ;;  %2452 = vmatmul.bf16.vlgmr.msra.gmra.mxu0 %v6426_v3  ;;  %v5856_v47 = vld [vmem:[#allocation8 + $0x674] sm:$0xf0]  ;;  %v4636_v52 = vor.u32 %v5820_v45, %v4635_v44  ;;  %v5670_v44 = vld [vmem:[#allocation8 + $0xac] sm:$0xf]  ;;  %v4045_v45 = vld [vmem:[#allocation8 + $0xb8] sm:$0xf0] }
 0x124   :  { %2496 = vmatpush.bf16.msrb.mxu0 %v4588_v40  ;;  %2509 = vmatpush.bf16.msrb.mxu1 %v4716_v42  ;;  %v4507_v40 = vld [vmem:[#allocation8 + $0x448] sm:$0xf]  ;;  %v4796_v42 = vor.u32 %v5860_v34, %v4795_v32  ;;  %v5876_v34 = vld [vmem:[#allocation8 + $0x714] sm:$0xf0]  ;;  %v4048_v53 = vor.u32 %v5670_v44, %v4045_v45  ;;  %v5686_v44 = vld [vmem:[#allocation8 + $0x12c] sm:$0xf] }
 0x125   :  { %2465 = vmatmul.bf16.vlgmr.msra.gmra.mxu1 %v6428_v9  ;;  %v4508_v48 = vor.u32 %v5788_v41, %v4507_v40  ;;  %v4859_v32 = vld [vmem:[#allocation8 + $0x708] sm:$0xf]  ;;  %v4461_v40 = vld [vmem:[#allocation8 + $0x3f8] sm:$0xf0] }
 0x126   :  { %2477 = vmatpush.bf16.msra.mxu2 %v4220_v61  ;;  %v4763_v61 = vld [vmem:[#allocation8 + $0x648] sm:$0xf]  ;;  %v4109_v45 = vld [vmem:[#allocation8 + $0x138] sm:$0xf0] }
 0x127   :  { %2490 = vmatpush.bf16.msra.mxu3 %v4348_v0  ;;  %v4891_v0 = vld [vmem:[#allocation8 + $0x748] sm:$0xf] }
 0x128   :  { %2497 = vmatpush.bf16.msrb.mxu0 %v4572_v56  ;;  %2510 = vmatpush.bf16.msrb.mxu1 %v4700_v59  ;;  %v4780_v56 = vor.u32 %v5856_v47, %v4779_v46  ;;  %v4908_v59 = vor.u32 %v5888_v51, %v4907_v50  ;;  %v5702_v47 = vld [vmem:[#allocation8 + $0x1ac] sm:$0xf] }
 0x129   :  { %2478 = vmatmul.bf16.vlgmr.msra.gmra.mxu2 %v6434_v36  ;;  %v5738_v51 = vld [vmem:[#allocation8 + $0x2cc] sm:$0xf] }
 0x12a   :  { %2522 = vmatpush.bf16.msrb.mxu2 %v4844_v1  ;;  %2491 = vmatmul.bf16.vlgmr.msra.gmra.mxu3 %v6436_v43  ;;  %v5884_v1 = vld [vmem:[#allocation8 + $0x754] sm:$0xf0] }
 0x12b   :  { %2535 = vmatpush.bf16.msrb.mxu3 %v4972_v5  ;;  %v5780_v5 = vld [vmem:[#allocation8 + $0x414] sm:$0xf0]  ;;  %v4892_v13 = vor.u32 %v5884_v1, %v4891_v0 }
 0x12c   :  { %2498 = vmatpush.bf16.msrb.mxu0 %v4556_v8  ;;  %2511 = vmatpush.bf16.msrb.mxu1 %v4684_v12  ;;  %v4764_v8 = vor.u32 %v5852_v62, %v4763_v61  ;;  %v5710_v12 = vld [vmem:[#allocation8 + $0x1ec] sm:$0xf]  ;;  %v4476_v16 = vor.u32 %v5780_v5, %v4475_v2 }
 0x12d   :  { %v4208_v23 = vor.u32 %v5710_v12, %v4205_v14  ;;  %v5698_v62 = vld [vmem:[#allocation8 + $0x18c] sm:$0xf]  ;;  %v4013_v12 = vld [vmem:[#allocation8 + $0x78] sm:$0xf0] }
 0x12e   :  { %2523 = vmatpush.bf16.msrb.mxu2 %v4828_v60  ;;  %v4747_v60 = vld [vmem:[#allocation8 + $0x628] sm:$0xf]  ;;  %v5734_v2 = vld [vmem:[#allocation8 + $0x2ac] sm:$0xf] }
 0x12f   :  { %2536 = vmatpush.bf16.msrb.mxu3 %v4956_v18  ;;  %v4875_v18 = vld [vmem:[#allocation8 + $0x728] sm:$0xf]  ;;  %v5694_v14 = vld [vmem:[#allocation8 + $0x16c] sm:$0xf] }
 0x130   :  { %2499 = vmatpush.bf16.msrb.mxu0 %v4540_v21  ;;  %2512 = vmatpush.bf16.msrb.mxu1 %v4668_v25  ;;  %v4080_v21 = vor.u32 %v5678_v10, %v4077_v11  ;;  %v4748_v25 = vor.u32 %v5848_v15, %v4747_v60  ;;  %v4876_v29 = vor.u32 %v5880_v19, %v4875_v18  ;;  %v5662_v11 = vld [vmem:[#allocation8 + $0x6c] sm:$0xf]  ;;  %v4141_v60 = vld [vmem:[#allocation8 + $0x178] sm:$0xf0] }
 0x131   :  { %v4285_v18 = vld [vmem:[#allocation8 + $0x298] sm:$0xf0]  ;;  %v4016_v19 = vor.u32 %v5662_v11, %v4013_v12  ;;  %v4144_v22 = vor.u32 %v5694_v14, %v4141_v60  ;;  %v5750_v12 = vld [vmem:[#allocation8 + $0x32c] sm:$0xf] }
 0x132   :  { %2524 = vmatpush.bf16.msrb.mxu2 %v4812_v28  ;;  %v4189_v28 = vld [vmem:[#allocation8 + $0x1d8] sm:$0xf0] }
 0x133   :  { %2537 = vmatpush.bf16.msrb.mxu3 %v4940_v31  ;;  %v5844_v31 = vld [vmem:[#allocation8 + $0x614] sm:$0xf0]  ;;  %v4192_v41 = vor.u32 %v5706_v27, %v4189_v28  ;;  %v5690_v27 = vld [vmem:[#allocation8 + $0x14c] sm:$0xf]  ;;  %v4125_v28 = vld [vmem:[#allocation8 + $0x158] sm:$0xf0] }
 0x134   :  { %2500 = vmatpush.bf16.msrb.mxu0 %v4524_v35  ;;  %2513 = vmatpush.bf16.msrb.mxu1 %v4652_v39  ;;  %v5742_v35 = vld [vmem:[#allocation8 + $0x2ec] sm:$0xf] }
 0x135   :  { %v5774_v39 = vld [vmem:[#allocation8 + $0x3ec] sm:$0xf]  ;;  %v4336_v46 = vor.u32 %v5742_v35, %v4333_v37 }
 0x136   :  { %2525 = vmatpush.bf16.msrb.mxu2 %v4796_v42  ;;  %v4732_v42 = vor.u32 %v5844_v31, %v4731_v30  ;;  %v4464_v50 = vor.u32 %v5774_v39, %v4461_v40  ;;  %v5726_v31 = vld [vmem:[#allocation8 + $0x26c] sm:$0xf]  ;;  %v4128_v39 = vor.u32 %v5690_v27, %v4125_v28 }
 0x137   :  { %2538 = vmatpush.bf16.msrb.mxu3 %v4924_v33  ;;  %v4860_v33 = vor.u32 %v5876_v34, %v4859_v32  ;;  %v4269_v32 = vld [vmem:[#allocation8 + $0x278] sm:$0xf0]  ;;  %v5758_v37 = vld [vmem:[#allocation8 + $0x36c] sm:$0xf] }
 0x138   :  { %2501 = vmatpush.bf16.msrb.mxu0 %v4508_v48  ;;  %2514 = vmatpush.bf16.msrb.mxu1 %v4636_v52  ;;  %v4173_v48 = vld [vmem:[#allocation8 + $0x1b8] sm:$0xf0]  ;;  %v5654_v40 = vld [vmem:[#allocation8 + $0x2c] sm:$0xf] }
 0x139   :  { %v4317_v52 = vld [vmem:[#allocation8 + $0x2d8] sm:$0xf0]  ;;  %v4176_v57 = vor.u32 %v5702_v47, %v4173_v48  ;;  %v5746_v27 = vld [vmem:[#allocation8 + $0x30c] sm:$0xf] }
 0x13a   :  { %2526 = vmatpush.bf16.msrb.mxu2 %v4780_v56  ;;  %v4445_v56 = vld [vmem:[#allocation8 + $0x3d8] sm:$0xf0]  ;;  %v4320_v61 = vor.u32 %v5738_v51, %v4317_v52  ;;  %v5754_v51 = vld [vmem:[#allocation8 + $0x34c] sm:$0xf] }
 0x13b   :  { %2539 = vmatpush.bf16.msrb.mxu3 %v4908_v59  ;;  %v4029_v59 = vld [vmem:[#allocation8 + $0x98] sm:$0xf0]  ;;  %v4448_v1 = vor.u32 %v5770_v55, %v4445_v56  ;;  %v4112_v56 = vor.u32 %v5686_v44, %v4109_v45 }
 0x13c   :  { %2502 = vmatpush.bf16.msrb.mxu0 %v4492_v63  ;;  %2515 = vmatpush.bf16.msrb.mxu1 %v4620_v4  ;;  %v4157_v63 = vld [vmem:[#allocation8 + $0x198] sm:$0xf0]  ;;  %v4032_v6 = vor.u32 %v5666_v58, %v4029_v59  ;;  %v5682_v58 = vld [vmem:[#allocation8 + $0x10c] sm:$0xf] }
 0x13d   :  { %v4301_v4 = vld [vmem:[#allocation8 + $0x2b8] sm:$0xf0]  ;;  %v4160_v10 = vor.u32 %v5698_v62, %v4157_v63  ;;  %v5806_v62 = vld [vmem:[#allocation8 + $0x4ec] sm:$0xf] }
 0x13e   :  { %2527 = vmatpush.bf16.msrb.mxu2 %v4764_v8  ;;  %v6466_v0 = vpop.f32.mrf.mxu0  ;;  %v4429_v8 = vld [vmem:[#allocation8 + $0x3b8] sm:$0xf0] }
 0x13f   :  { %2540 = vmatpush.bf16.msrb.mxu3 %v4892_v13  ;;  %v6469_v5 = vpop.f32.mrf.mxu1  ;;  %v4304_v13 = vor.u32 %v5734_v2, %v4301_v4  ;;  %v4432_v15 = vor.u32 %v5766_v7, %v4429_v8  ;;  %v4253_v47 = vld [vmem:[#allocation8 + $0x258] sm:$0xf0]  ;;  %v5718_v7 = vld [vmem:[#allocation8 + $0x22c] sm:$0xf] }
 0x140   :  { %2503 = vmatpush.bf16.msrb.mxu0 %v4476_v16  ;;  %2516 = vmatpush.bf16.msrb.mxu1 %v4604_v20  ;;  %v5730_v16 = vld [vmem:[#allocation8 + $0x28c] sm:$0xf]  ;;  %v4381_v52 = vld [vmem:[#allocation8 + $0x358] sm:$0xf0] }
 0x141   :  { %v5762_v20 = vld [vmem:[#allocation8 + $0x38c] sm:$0xf]  ;;  %v4288_v26 = vor.u32 %v5730_v16, %v4285_v18  ;;  %v4093_v59 = vld [vmem:[#allocation8 + $0x118] sm:$0xf0]  ;;  %v4384_v4 = vor.u32 %v5754_v51, %v4381_v52  ;;  %v6480_v16 = vld [vmem:[#allocation10] sm:$0xf] }
 0x142   :  { %2528 = vmatpush.bf16.msrb.mxu2 %v4748_v25  ;;  %v3997_v25 = vld [vmem:[#allocation8 + $0x58] sm:$0xf0]  ;;  %v4096_v14 = vor.u32 %v5682_v58, %v4093_v59  ;;  %v5866_v52 = vld [vmem:[#allocation8 + $0x6cc] sm:$0xf] }
 0x143   :  { %2541 = vmatpush.bf16.msrb.mxu3 %v4876_v29  ;;  %2504 = vmatmul.bf16.vlgmr.msrb.gmra.mxu0 %v6440_v17  ;;  %v4589_v63 = vld [vmem:[#allocation8 + $0x4f8] sm:$0xf0] }
 0x144   :  { %2548 = vmatpush.bf16.msra.mxu0 %v4080_v21  ;;  %2561 = vmatpush.bf16.msra.mxu1 %v4208_v23  ;;  %v4413_v21 = vld [vmem:[#allocation8 + $0x398] sm:$0xf0]  ;;  %v5658_v23 = vld [vmem:[#allocation8 + $0x4c] sm:$0xf]  ;;  %v4592_v60 = vor.u32 %v5806_v62, %v4589_v63 }
 0x145   :  { %2517 = vmatmul.bf16.vlgmr.msrb.gmra.mxu1 %v6442_v24  ;;  %v4416_v30 = vor.u32 %v5762_v20, %v4413_v21  ;;  %v4000_v35 = vor.u32 %v5658_v23, %v3997_v25  ;;  %v4237_v8 = vld [vmem:[#allocation8 + $0x238] sm:$0xf0]  ;;  %v5834_v21 = vld [vmem:[#allocation8 + $0x5cc] sm:$0xf] }
 0x146   :  { %2529 = vmatpush.bf16.msrb.mxu2 %v4732_v42  ;;  %v2247_v29 = vpop.f32.mrf.mxu0  ;;  %v4272_v42 = vor.u32 %v5726_v31, %v4269_v32  ;;  %v4573_v20 = vld [vmem:[#allocation8 + $0x4d8] sm:$0xf0]  ;;  %v5714_v25 = vld [vmem:[#allocation8 + $0x20c] sm:$0xf] }
 0x147   :  { %2542 = vmatpush.bf16.msrb.mxu3 %v4860_v33  ;;  %v2260_v34 = vpop.f32.mrf.mxu1  ;;  %v4349_v29 = vld [vmem:[#allocation8 + $0x318] sm:$0xf0] }
 0x148   :  { %2549 = vmatpush.bf16.msra.mxu0 %v4064_v38  ;;  %2562 = vmatpush.bf16.msra.mxu1 %v4192_v41  ;;  %v4397_v38 = vld [vmem:[#allocation8 + $0x378] sm:$0xf0]  ;;  %v4352_v45 = vor.u32 %v5746_v27, %v4349_v29  ;;  %v5890_v27 = vld [vmem:[#allocation8 + $0x78c] sm:$0xf] }
 0x149   :  { %2530 = vmatmul.bf16.vlgmr.msrb.gmra.mxu2 %v6446_v49  ;;  %v3981_v41 = vld [vmem:[#allocation8 + $0x38] sm:$0xf0]  ;;  %v4400_v33 = vor.u32 %v5758_v37, %v4397_v38 }
 0x14a   :  { %2574 = vmatpush.bf16.msra.mxu2 %v4336_v46  ;;  %2543 = vmatmul.bf16.vlgmr.msrb.gmra.mxu3 %v6448_v54  ;;  %v5722_v46 = vld [vmem:[#allocation8 + $0x24c] sm:$0xf]  ;;  %v4845_v31 = vld [vmem:[#allocation8 + $0x6f8] sm:$0xf0] }
 0x14b   :  { %2587 = vmatpush.bf16.msra.mxu3 %v4464_v50  ;;  %v3984_v50 = vor.u32 %v5654_v40, %v3981_v41  ;;  %v4973_v37 = vld [vmem:[#allocation8 + $0x7f8] sm:$0xf0]  ;;  %v5798_v40 = vld [vmem:[#allocation8 + $0x4ac] sm:$0xf] }
 0x14c   :  { %2550 = vmatpush.bf16.msra.mxu0 %v4048_v53  ;;  %2563 = vmatpush.bf16.msra.mxu1 %v4176_v57  ;;  %v6472_v48 = vpop.f32.mrf.mxu2  ;;  %v5650_v53 = vld [vmem:[#allocation8 + $0xc] sm:$0xf]  ;;  %v3965_v57 = vld [vmem:[#allocation8 + $0x18] sm:$0xf0] }
 0x14d   :  { %v6474_v55 = vpop.f32.mrf.mxu3  ;;  %v3968_v11 = vor.u32 %v5650_v53, %v3965_v57  ;;  %v4557_v41 = vld [vmem:[#allocation8 + $0x4b8] sm:$0xf0]  ;;  %v5898_v57 = vld [vmem:[#allocation8 + $0x7cc] sm:$0xf] }
 0x14e   :  { %2575 = vmatpush.bf16.msra.mxu2 %v4320_v61  ;;  %v4256_v61 = vor.u32 %v5722_v46, %v4253_v47  ;;  %v5830_v46 = vld [vmem:[#allocation8 + $0x5ac] sm:$0xf]  ;;  %v4685_v47 = vld [vmem:[#allocation8 + $0x5b8] sm:$0xf0] }
 0x14f   :  { %2588 = vmatpush.bf16.msra.mxu3 %v4448_v1  ;;  %v5838_v1 = vld [vmem:[#allocation8 + $0x5ec] sm:$0xf]  ;;  %v6476_v2 = vpop.f32.mrf.mxu0  ;;  %v4829_v53 = vld [vmem:[#allocation8 + $0x6d8] sm:$0xf0]  ;;  %v4688_v59 = vor.u32 %v5830_v46, %v4685_v47 }
 0x150   :  { %2551 = vmatpush.bf16.msra.mxu0 %v4032_v6  ;;  %2564 = vmatpush.bf16.msra.mxu1 %v4160_v10  ;;  %v4717_v6 = vld [vmem:[#allocation8 + $0x5f8] sm:$0xf0]  ;;  %v6478_v10 = vpop.f32.mrf.mxu1  ;;  %v4832_v63 = vor.u32 %v5866_v52, %v4829_v53  ;;  %v5782_v46 = vld [vmem:[#allocation8 + $0x42c] sm:$0xf] }
 0x151   :  { %v4720_v18 = vor.u32 %v5838_v1, %v4717_v6  ;;  %v4957_v58 = vld [vmem:[#allocation8 + $0x7d8] sm:$0xf0]  ;;  %v5826_v1 = vld [vmem:[#allocation8 + $0x58c] sm:$0xf] }
 0x152   :  { %2576 = vmatpush.bf16.msra.mxu2 %v4304_v13  ;;  %v4365_v13 = vld [vmem:[#allocation8 + $0x338] sm:$0xf0]  ;;  %v4960_v6 = vor.u32 %v5898_v57, %v4957_v58  ;;  %v5850_v57 = vld [vmem:[#allocation8 + $0x64c] sm:$0xf] }
 0x153   :  { %2589 = vmatpush.bf16.msra.mxu3 %v4432_v15  ;;  %v5802_v15 = vld [vmem:[#allocation8 + $0x4cc] sm:$0xf]  ;;  %v4368_v23 = vor.u32 %v5750_v12, %v4365_v13  ;;  %v4493_v47 = vld [vmem:[#allocation8 + $0x438] sm:$0xf0] }
 0x154   :  { %2552 = vmatpush.bf16.msra.mxu0 %v4016_v19  ;;  %2565 = vmatpush.bf16.msra.mxu1 %v4144_v22  ;;  %v4240_v19 = vor.u32 %v5718_v7, %v4237_v8  ;;  %v4701_v22 = vld [vmem:[#allocation8 + $0x5d8] sm:$0xf0]  ;;  %v2273_v28 = vpop.f32.mrf.mxu2  ;;  %v4576_v34 = vor.u32 %v5802_v15, %v4573_v20  ;;  %v5862_v7 = vld [vmem:[#allocation8 + $0x6ac] sm:$0xf] }
 0x155   :  { %v2286_v32 = vpop.f32.mrf.mxu3  ;;  %v4704_v38 = vor.u32 %v5834_v21, %v4701_v22  ;;  %v4813_v8 = vld [vmem:[#allocation8 + $0x6b8] sm:$0xf0]  ;;  %v5894_v13 = vld [vmem:[#allocation8 + $0x7ac] sm:$0xf] }
 0x156   :  { %2577 = vmatpush.bf16.msra.mxu2 %v4288_v26  ;;  %v4221_v26 = vld [vmem:[#allocation8 + $0x218] sm:$0xf0]  ;;  %v5822_v20 = vld [vmem:[#allocation8 + $0x56c] sm:$0xf] }
 0x157   :  { %2590 = vmatpush.bf16.msra.mxu3 %v4416_v30  ;;  %v5870_v30 = vld [vmem:[#allocation8 + $0x6ec] sm:$0xf]  ;;  %v2299_v44 = vpop.f32.mrf.mxu0  ;;  %v4525_v15 = vld [vmem:[#allocation8 + $0x478] sm:$0xf0] }
 0x158   :  { %2553 = vmatpush.bf16.msra.mxu0 %v4000_v35  ;;  %2566 = vmatpush.bf16.msra.mxu1 %v4128_v39  ;;  %v5902_v35 = vld [vmem:[#allocation8 + $0x7ec] sm:$0xf]  ;;  %v4224_v39 = vor.u32 %v5714_v25, %v4221_v26  ;;  %v4653_v21 = vld [vmem:[#allocation8 + $0x578] sm:$0xf0] }
 0x159   :  { %v4976_v51 = vor.u32 %v5902_v35, %v4973_v37  ;;  %v4797_v25 = vld [vmem:[#allocation8 + $0x698] sm:$0xf0]  ;;  %v4656_v29 = vor.u32 %v5822_v20, %v4653_v21  ;;  %v5886_v44 = vld [vmem:[#allocation8 + $0x76c] sm:$0xf] }
 0x15a   :  { %2578 = vmatpush.bf16.msra.mxu2 %v4272_v42  ;;  %v948_v42 = vperm.slane %v6480_v16, 0  ;;  %v4925_v28 = vld [vmem:[#allocation8 + $0x798] sm:$0xf0] }
 0x15b   :  { %2591 = vmatpush.bf16.msra.mxu3 %v4400_v33  ;;  %v4848_v33 = vor.u32 %v5870_v30, %v4845_v31  ;;  %v5786_v30 = vld [vmem:[#allocation8 + $0x44c] sm:$0xf]  ;;  %v4637_v35 = vld [vmem:[#allocation8 + $0x558] sm:$0xf0] }
 0x15c   :  { %2554 = vmatpush.bf16.msra.mxu0 %v3984_v50  ;;  %2567 = vmatpush.bf16.msra.mxu1 %v4112_v56  ;;  %v2312_v50 = vpop.f32.mrf.mxu1  ;;  %v4560_v56 = vor.u32 %v5798_v40, %v4557_v41  ;;  %v2246_v62 = vadd.f32 %v6466_v0, %v948_v42  ;;  %v4781_v40 = vld [vmem:[#allocation8 + $0x678] sm:$0xf0] }
 0x15d   :  { %v4621_v52 = vld [vmem:[#allocation8 + $0x538] sm:$0xf0] }
 0x15e   :  { %2579 = vmatpush.bf16.msra.mxu2 %v4256_v61  ;;  %v5794_v61 = vld [vmem:[#allocation8 + $0x48c] sm:$0xf]  ;;  %v4765_v58 = vld [vmem:[#allocation8 + $0x658] sm:$0xf0] }
 0x15f   :  { %2592 = vmatpush.bf16.msra.mxu3 %v4384_v4  ;;  %v6486_v4 = vpop.f32.mrf.mxu2 }
 0x160   :  { %2555 = vmatpush.bf16.msra.mxu0 %v3968_v11  ;;  %2568 = vmatpush.bf16.msra.mxu1 %v4096_v14  ;;  %v6488_v11 = vpop.f32.mrf.mxu3  ;;  %v4941_v14 = vld [vmem:[#allocation8 + $0x7b8] sm:$0xf0]  ;;  %v6493_v22 = vpop.f32.mrf.mxu0 }
 0x162   :  { %2580 = vmatpush.bf16.msra.mxu2 %v4240_v19  ;;  %v4816_v19 = vor.u32 %v5862_v7, %v4813_v8  ;;  %v4768_v8 = vor.u32 %v5850_v57, %v4765_v58  ;;  %v5955_v58 = vld [vmem:[#allocation11 + $0x18c] sm:$0xf0] }
 0x163   :  { %2593 = vmatpush.bf16.msra.mxu3 %v4368_v23  ;;  %2556 = vmatmul.bf16.vlgmr.msra.gmra.mxu0 %v6426_v3  ;;  %v4541_v3 = vld [vmem:[#allocation8 + $0x498] sm:$0xf0]  ;;  %v5858_v23 = vld [vmem:[#allocation8 + $0x68c] sm:$0xf] }
 0x164   :  { %2600 = vmatpush.bf16.msrb.mxu0 %v4592_v60  ;;  %2613 = vmatpush.bf16.msrb.mxu1 %v4720_v18  ;;  %v4544_v12 = vor.u32 %v5794_v61, %v4541_v3  ;;  %v5790_v60 = vld [vmem:[#allocation8 + $0x46c] sm:$0xf]  ;;  %v2259_v18 = vadd.f32 %v6469_v5, %v2246_v62  ;;  %v6495_v26 = vpop.f32.mrf.mxu1  ;;  %v4509_v5 = vld [vmem:[#allocation8 + $0x458] sm:$0xf0]  ;;  %v4800_v32 = vor.u32 %v5858_v23, %v4797_v25 }
 0x165   :  { %2569 = vmatmul.bf16.vlgmr.msra.gmra.mxu1 %v6428_v9  ;;  %v4669_v9 = vld [vmem:[#allocation8 + $0x598] sm:$0xf0]  ;;  %v4512_v42 = vor.u32 %v5786_v30, %v4509_v5  ;;  %v4496_v61 = vor.u32 %v5782_v46, %v4493_v47  ;;  %v5882_v3 = vld [vmem:[#allocation8 + $0x74c] sm:$0xf]  ;;  %v5931_v30 = vld [vmem:[#allocation11 + $0xcc] sm:$0xf0] }
 0x166   :  { %2581 = vmatpush.bf16.msra.mxu2 %v4224_v39  ;;  %v4672_v0 = vor.u32 %v5826_v1, %v4669_v9  ;;  %v2272_v31 = vadd.f32 %v6472_v48, %v2259_v18  ;;  %v5854_v39 = vld [vmem:[#allocation8 + $0x66c] sm:$0xf]  ;;  %v4893_v62 = vld [vmem:[#allocation8 + $0x758] sm:$0xf0]  ;;  %v5203_v5 = vld [vmem:[#allocation11 + $0x1c0] sm:$0xf] }
 0x167   :  { %2594 = vmatpush.bf16.msra.mxu3 %v4352_v45  ;;  %v2325_v37 = vpop.f32.mrf.mxu2  ;;  %v4909_v45 = vld [vmem:[#allocation8 + $0x778] sm:$0xf0]  ;;  %v4784_v50 = vor.u32 %v5854_v39, %v4781_v40  ;;  %v5187_v46 = vld [vmem:[#allocation11 + $0x1a0] sm:$0xf] }
 0x168   :  { %2601 = vmatpush.bf16.msrb.mxu0 %v4576_v34  ;;  %2614 = vmatpush.bf16.msrb.mxu1 %v4704_v38  ;;  %v5818_v34 = vld [vmem:[#allocation8 + $0x54c] sm:$0xf]  ;;  %v4928_v38 = vor.u32 %v5890_v27, %v4925_v28  ;;  %v2338_v41 = vpop.f32.mrf.mxu3  ;;  %v2285_v48 = vadd.f32 %v6474_v55, %v2272_v31  ;;  %v2351_v53 = vpop.f32.mrf.mxu0  ;;  %v4477_v9 = vld [vmem:[#allocation8 + $0x418] sm:$0xf0] }
 0x169   :  { %2582 = vmatmul.bf16.vlgmr.msra.gmra.mxu2 %v6434_v36  ;;  %v4944_v36 = vor.u32 %v5894_v13, %v4941_v14  ;;  %v4605_v55 = vld [vmem:[#allocation8 + $0x518] sm:$0xf0]  ;;  %v5935_v13 = vld [vmem:[#allocation11 + $0xec] sm:$0xf0]  ;;  %v5219_v14 = vld [vmem:[#allocation11 + $0x1e0] sm:$0xf] }
 0x16a   :  { %2626 = vmatpush.bf16.msrb.mxu2 %v4848_v33  ;;  %2595 = vmatmul.bf16.vlgmr.msra.gmra.mxu3 %v6436_v43  ;;  %v4528_v43 = vor.u32 %v5790_v60, %v4525_v15  ;;  %v4640_v33 = vor.u32 %v5818_v34, %v4637_v35  ;;  %v2298_v7 = vadd.f32 %v6476_v2, %v2285_v48  ;;  %v5967_v60 = vld [vmem:[#allocation11 + $0x1ec] sm:$0xf0]  ;;  %v5846_v15 = vld [vmem:[#allocation8 + $0x62c] sm:$0xf]  ;;  %v4749_v18 = vld [vmem:[#allocation8 + $0x638] sm:$0xf0] }
 0x16b   :  { %2639 = vmatpush.bf16.msrb.mxu3 %v4976_v51  ;;  %v5814_v51 = vld [vmem:[#allocation8 + $0x52c] sm:$0xf]  ;;  %v4877_v23 = vld [vmem:[#allocation8 + $0x738] sm:$0xf0]  ;;  %v5220_v27 = vor.u32 %v5967_v60, %v5219_v14  ;;  %v4752_v28 = vor.u32 %v5846_v15, %v4749_v18  ;;  %v5043_v53 = vld [vmem:[#allocation11 + $0x80] sm:$0xf] }
 0x16c   :  { %2602 = vmatpush.bf16.msrb.mxu0 %v4560_v56  ;;  %2615 = vmatpush.bf16.msrb.mxu1 %v4688_v59  ;;  %v4912_v56 = vor.u32 %v5886_v44, %v4909_v45  ;;  %v2364_v59 = vpop.f32.mrf.mxu1  ;;  %v4624_v1 = vor.u32 %v5814_v51, %v4621_v52  ;;  %v5842_v34 = vld [vmem:[#allocation8 + $0x60c] sm:$0xf]  ;;  %v4733_v35 = vld [vmem:[#allocation8 + $0x618] sm:$0xf0]  ;;  %v5927_v44 = vld [vmem:[#allocation11 + $0xac] sm:$0xf0] }
 0x16d   :  { %v4861_v39 = vld [vmem:[#allocation8 + $0x718] sm:$0xf0]  ;;  %v4736_v41 = vor.u32 %v5842_v34, %v4733_v35  ;;  %v949_v45 = vperm.slane %v6480_v16, 1  ;;  %v5331_v14 = vld [vmem:[#allocation11 + $0x2c0] sm:$0xf] }
 0x16e   :  { %2627 = vmatpush.bf16.msrb.mxu2 %v4832_v63  ;;  %v5778_v63 = vld [vmem:[#allocation8 + $0x40c] sm:$0xf]  ;;  %v5139_v60 = vld [vmem:[#allocation11 + $0x140] sm:$0xf]  ;;  %v5947_v15 = vld [vmem:[#allocation11 + $0x14c] sm:$0xf0] }
 0x16f   :  { %2640 = vmatpush.bf16.msrb.mxu3 %v4960_v6  ;;  %v5810_v6 = vld [vmem:[#allocation8 + $0x50c] sm:$0xf]  ;;  %v4480_v21 = vor.u32 %v5778_v63, %v4477_v9  ;;  %v2350_v57 = vadd.f32 %v6493_v22, %v949_v45  ;;  %v5999_v63 = vld [vmem:[#allocation11 + $0x2ec] sm:$0xf0]  ;;  %v5155_v9 = vld [vmem:[#allocation11 + $0x160] sm:$0xf] }
 0x170   :  { %2603 = vmatpush.bf16.msrb.mxu0 %v4544_v12  ;;  %2616 = vmatpush.bf16.msrb.mxu1 %v4672_v0  ;;  %v5091_v12 = vld [vmem:[#allocation11 + $0xe0] sm:$0xf]  ;;  %v4896_v0 = vor.u32 %v5882_v3, %v4893_v62  ;;  %v6502_v20 = vpop.f32.mrf.mxu3  ;;  %v4608_v2 = vor.u32 %v5810_v6, %v4605_v55  ;;  %v5919_v3 = vld [vmem:[#allocation11 + $0x6c] sm:$0xf0] }
 0x171   :  { %v5092_v25 = vor.u32 %v5935_v13, %v5091_v12  ;;  %v5347_v62 = vld [vmem:[#allocation11 + $0x2e0] sm:$0xf]  ;;  %v5951_v22 = vld [vmem:[#allocation11 + $0x16c] sm:$0xf0] }
 0x172   :  { %2628 = vmatpush.bf16.msrb.mxu2 %v4816_v19  ;;  %v6500_v19 = vpop.f32.mrf.mxu2  ;;  %v5348_v6 = vor.u32 %v5999_v63, %v5347_v62  ;;  %v5011_v12 = vld [vmem:[#allocation11 + $0x40] sm:$0xf]  ;;  %v5915_v13 = vld [vmem:[#allocation11 + $0x4c] sm:$0xf0] }
 0x173   :  { %2641 = vmatpush.bf16.msrb.mxu3 %v4944_v36  ;;  %v5878_v36 = vld [vmem:[#allocation8 + $0x72c] sm:$0xf]  ;;  %v5907_v35 = vld [vmem:[#allocation11 + $0xc] sm:$0xf0] }
 0x174   :  { %2604 = vmatpush.bf16.msrb.mxu0 %v4528_v43  ;;  %2617 = vmatpush.bf16.msrb.mxu1 %v4656_v29  ;;  %v2311_v43 = vadd.f32 %v6478_v10, %v2298_v7  ;;  %v5075_v29 = vld [vmem:[#allocation11 + $0xc0] sm:$0xf]  ;;  %v4880_v31 = vor.u32 %v5878_v36, %v4877_v23  ;;  %v5140_v23 = vor.u32 %v5947_v15, %v5139_v60  ;;  %v5975_v60 = vld [vmem:[#allocation11 + $0x22c] sm:$0xf0] }
 0x175   :  { %v5076_v40 = vor.u32 %v5931_v30, %v5075_v29  ;;  %v4995_v36 = vld [vmem:[#allocation11 + $0x20] sm:$0xf]  ;;  %v5943_v29 = vld [vmem:[#allocation11 + $0x12c] sm:$0xf0] }
 0x176   :  { %2629 = vmatpush.bf16.msrb.mxu2 %v4800_v32  ;;  %v5963_v32 = vld [vmem:[#allocation11 + $0x1cc] sm:$0xf0]  ;;  %v2324_v37 = vadd.f32 %v6486_v4, %v2311_v43 }
 0x177   :  { %2642 = vmatpush.bf16.msrb.mxu3 %v4928_v38  ;;  %v5874_v38 = vld [vmem:[#allocation8 + $0x70c] sm:$0xf]  ;;  %v5204_v10 = vor.u32 %v5963_v32, %v5203_v5  ;;  %v5959_v4 = vld [vmem:[#allocation11 + $0x1ac] sm:$0xf0] }
 0x178   :  { %2605 = vmatpush.bf16.msrb.mxu0 %v4512_v42  ;;  %2618 = vmatpush.bf16.msrb.mxu1 %v4640_v33  ;;  %v5059_v42 = vld [vmem:[#allocation11 + $0xa0] sm:$0xf]  ;;  %v4864_v33 = vor.u32 %v5874_v38, %v4861_v39  ;;  %v2337_v47 = vadd.f32 %v6488_v11, %v2324_v37  ;;  %v5188_v52 = vor.u32 %v5959_v4, %v5187_v46  ;;  %v5991_v43 = vld [vmem:[#allocation11 + $0x2ac] sm:$0xf0]  ;;  %v5965_v46 = vld [vmem:[#allocation11 + $0x1e4] sm:$0xf] }
 0x179   :  { %v5060_v51 = vor.u32 %v5927_v44, %v5059_v42  ;;  %v5107_v38 = vld [vmem:[#allocation11 + $0x100] sm:$0xf]  ;;  %v5933_v42 = vld [vmem:[#allocation11 + $0xe4] sm:$0xf]  ;;  %v5093_v44 = vld [vmem:[#allocation11 + $0xf0] sm:$0xf0] }
 0x17a   :  { %2630 = vmatpush.bf16.msrb.mxu2 %v4784_v50  ;;  %v2377_v48 = vpop.f32.mrf.mxu2  ;;  %v2390_v50 = vpop.f32.mrf.mxu3  ;;  %v2652_v59 = vmul.f32 0.5, %v2337_v47  ;;  %v5299_v39 = vld [vmem:[#allocation11 + $0x280] sm:$0xf]  ;;  %v5221_v4 = vld [vmem:[#allocation11 + $0x1f0] sm:$0xf0] }
 0x17b   :  { %2643 = vmatpush.bf16.msrb.mxu3 %v4912_v56  ;;  %v5923_v56 = vld [vmem:[#allocation11 + $0x8c] sm:$0xf0] }
 0x17c   :  { %2606 = vmatpush.bf16.msrb.mxu0 %v4496_v61  ;;  %2619 = vmatpush.bf16.msrb.mxu1 %v4624_v1  ;;  %v5044_v11 = vor.u32 %v5923_v56, %v5043_v53  ;;  %v2363_v1 = vadd.f32 %v6495_v26, %v2350_v57  ;;  %6096 = vtanh.f32 %v2652_v59  ;;  %v5096_v53 = vor.u32 %v5933_v42, %v5093_v44  ;;  %v5283_v56 = vld [vmem:[#allocation11 + $0x260] sm:$0xf]  ;;  %v5077_v59 = vld [vmem:[#allocation11 + $0xd0] sm:$0xf0] }
 0x17d   :  { %v5013_v44 = vld [vmem:[#allocation11 + $0x50] sm:$0xf0] }
 0x17e   :  { %2631 = vmatpush.bf16.msrb.mxu2 %v4768_v8  ;;  %v2376_v7 = vadd.f32 %v6500_v19, %v2363_v1 }
 0x17f   :  { %2644 = vmatpush.bf16.msrb.mxu3 %v4896_v0  ;;  %v5995_v0 = vld [vmem:[#allocation11 + $0x2cc] sm:$0xf0] }
 0x180   :  { %2607 = vmatpush.bf16.msrb.mxu0 %v4480_v21  ;;  %2620 = vmatpush.bf16.msrb.mxu1 %v4608_v2  ;;  %v2401_v55 = vpop.f32.mrf.mxu0  ;;  %v5332_v26 = vor.u32 %v5995_v0, %v5331_v14  ;;  %v2389_v18 = vadd.f32 %v6502_v20, %v2376_v7  ;;  %v5012_v21 = vor.u32 %v5915_v13, %v5011_v12  ;;  %v5911_v2 = vld [vmem:[#allocation11 + $0x2c] sm:$0xf0]  ;;  %v4979_v20 = vld [vmem:[#allocation11] sm:$0xf]  ;;  %v5189_v12 = vld [vmem:[#allocation11 + $0x1b0] sm:$0xf0] }
 0x181   :  { %v4996_v34 = vor.u32 %v5911_v2, %v4995_v36  ;;  %v4980_v50 = vor.u32 %v5907_v35, %v4979_v20  ;;  %v5979_v7 = vld [vmem:[#allocation11 + $0x24c] sm:$0xf0]  ;;  %v5251_v0 = vld [vmem:[#allocation11 + $0x220] sm:$0xf]  ;;  %v5953_v36 = vld [vmem:[#allocation11 + $0x184] sm:$0xf] }
 0x182   :  { %2632 = vmatpush.bf16.msrb.mxu2 %v4752_v28  ;;  %v6097_v19 = vpop.eup %6096  ;;  %v5123_v28 = vld [vmem:[#allocation11 + $0x120] sm:$0xf]  ;;  %v5917_v2 = vld [vmem:[#allocation11 + $0x64] sm:$0xf]  ;;  %v5157_v20 = vld [vmem:[#allocation11 + $0x170] sm:$0xf0] }
 0x183   :  { %2645 = vmatpush.bf16.msrb.mxu3 %v4880_v31  ;;  %2608 = vmatmul.bf16.vlgmr.msrb.gmra.mxu0 %v6440_v17  ;;  %v5171_v17 = vld [vmem:[#allocation11 + $0x180] sm:$0xf]  ;;  %v2660_v31 = vmul.f32 0.5, %v6097_v19  ;;  %v5124_v37 = vor.u32 %v5943_v29, %v5123_v28  ;;  %v5173_v19 = vld [vmem:[#allocation11 + $0x190] sm:$0xf0] }
 0x184   :  { %3321 = vmatpush.bf16.msra.mxu0 %v5092_v25  ;;  %3334 = vmatpush.bf16.msra.mxu1 %v5220_v27  ;;  %v5172_v61 = vor.u32 %v5955_v58, %v5171_v17  ;;  %v5315_v25 = vld [vmem:[#allocation11 + $0x2a0] sm:$0xf]  ;;  %v2402_v27 = vadd.f32 %v2401_v55, %v2389_v18  ;;  %v5224_v17 = vor.u32 %v5965_v46, %v5221_v4  ;;  %v5929_v58 = vld [vmem:[#allocation11 + $0xc4] sm:$0xf]  ;;  %v5061_v55 = vld [vmem:[#allocation11 + $0xb0] sm:$0xf0] }
 0x185   :  { %2621 = vmatmul.bf16.vlgmr.msrb.gmra.mxu1 %v6442_v24  ;;  %v5027_v24 = vld [vmem:[#allocation11 + $0x60] sm:$0xf]  ;;  %v5316_v30 = vor.u32 %v5991_v43, %v5315_v25  ;;  %v5080_v1 = vor.u32 %v5929_v58, %v5077_v59  ;;  %v5045_v18 = vld [vmem:[#allocation11 + $0x90] sm:$0xf0]  ;;  %v5176_v29 = vor.u32 %v5953_v36, %v5173_v19  ;;  %v5945_v46 = vld [vmem:[#allocation11 + $0x144] sm:$0xf] }
 0x186   :  { %2633 = vmatpush.bf16.msrb.mxu2 %v4736_v41  ;;  %v5028_v8 = vor.u32 %v5919_v3, %v5027_v24  ;;  %v5939_v41 = vld [vmem:[#allocation11 + $0x10c] sm:$0xf0]  ;;  %v5961_v24 = vld [vmem:[#allocation11 + $0x1c4] sm:$0xf]  ;;  %v5235_v28 = vld [vmem:[#allocation11 + $0x200] sm:$0xf] }
 0x187   :  { %2646 = vmatpush.bf16.msrb.mxu3 %v4864_v33  ;;  %v5141_v4 = vld [vmem:[#allocation11 + $0x150] sm:$0xf0]  ;;  %v5211_v19 = vld [vmem:[#allocation11 + $0x1c8] sm:$0xf] }
 0x188   :  { %3322 = vmatpush.bf16.msra.mxu0 %v5076_v40  ;;  %3335 = vmatpush.bf16.msra.mxu1 %v5204_v10  ;;  %v2403_v5 = vpop.f32.mrf.mxu0  ;;  %v5987_v40 = vld [vmem:[#allocation11 + $0x28c] sm:$0xf0]  ;;  %v5285_v36 = vld [vmem:[#allocation11 + $0x270] sm:$0xf0] }
 0x189   :  { %2634 = vmatmul.bf16.vlgmr.msrb.gmra.mxu2 %v6446_v49  ;;  %v2414_v49 = vpop.f32.mrf.mxu1  ;;  %v5300_v45 = vor.u32 %v5987_v40, %v5299_v39  ;;  %v5997_v5 = vld [vmem:[#allocation11 + $0x2e4] sm:$0xf] }
 0x18a   :  { %2647 = vmatmul.bf16.vlgmr.msrb.gmra.mxu3 %v6448_v54  ;;  %3347 = vmatpush.bf16.msra.mxu2 %v5348_v6  ;;  %v5156_v54 = vor.u32 %v5951_v22, %v5155_v9  ;;  %v2415_v10 = vadd.f32 %v2414_v49, %v2402_v27  ;;  %v5267_v9 = vld [vmem:[#allocation11 + $0x240] sm:$0xf]  ;;  %v5925_v6 = vld [vmem:[#allocation11 + $0xa4] sm:$0xf]  ;;  %v5029_v27 = vld [vmem:[#allocation11 + $0x70] sm:$0xf0] }
 0x18b   :  { %v5064_v14 = vor.u32 %v5925_v6, %v5061_v55  ;;  %v5109_v6 = vld [vmem:[#allocation11 + $0x110] sm:$0xf0]  ;;  %v5099_v55 = vld [vmem:[#allocation11 + $0xe8] sm:$0xf] }
 0x18c   :  { %3323 = vmatpush.bf16.msra.mxu0 %v5060_v51  ;;  %3336 = vmatpush.bf16.msra.mxu1 %v5188_v52  ;;  %v2427_v33 = vpop.f32.mrf.mxu2  ;;  %v2664_v51 = vadd.f32 0.5, %v2660_v31  ;;  %v5108_v52 = vor.u32 %v5939_v41, %v5107_v38  ;;  %v5349_v31 = vld [vmem:[#allocation11 + $0x2f0] sm:$0xf0]  ;;  %v5913_v41 = vld [vmem:[#allocation11 + $0x44] sm:$0xf] }
 0x18d   :  { %v2428_v47 = vadd.f32 %v2427_v33, %v2415_v10  ;;  %v2440_v48 = vpop.f32.mrf.mxu3  ;;  %v5032_v10 = vor.u32 %v5917_v2, %v5029_v27  ;;  %v5333_v33 = vld [vmem:[#allocation11 + $0x2d0] sm:$0xf0] }
 0x18e   :  { %3348 = vmatpush.bf16.msra.mxu2 %v5332_v26  ;;  %v6516_v63 = vpack.c.bf16 %v2664_v51, %v2664_v51  ;;  %v5921_v26 = vld [vmem:[#allocation11 + $0x84] sm:$0xf]  ;;  %v5144_v51 = vor.u32 %v5945_v46, %v5141_v4  ;;  %v5269_v27 = vld [vmem:[#allocation11 + $0x250] sm:$0xf0]  ;;  %v5179_v46 = vld [vmem:[#allocation11 + $0x188] sm:$0xf] }
 0x18f   :  { %v2441_v57 = vadd.f32 %v2440_v48, %v2428_v47  ;;  %v5048_v43 = vor.u32 %v5921_v26, %v5045_v18  ;;  %v5016_v48 = vor.u32 %v5913_v41, %v5013_v44  ;;  %v5083_v18 = vld [vmem:[#allocation11 + $0xc8] sm:$0xf]  ;;  %v5253_v41 = vld [vmem:[#allocation11 + $0x230] sm:$0xf0]  ;;  %v5956_v4 = vld [vmem:[#allocation11 + $0x194] sm:$0xf0] }
 0x190   :  { %3324 = vmatpush.bf16.msra.mxu0 %v5044_v11  ;;  %3337 = vmatpush.bf16.msra.mxu1 %v5172_v61  ;;  %v5983_v11 = vld [vmem:[#allocation11 + $0x26c] sm:$0xf0]  ;;  %v5205_v61 = vld [vmem:[#allocation11 + $0x1d0] sm:$0xf0]  ;;  %v5051_v44 = vld [vmem:[#allocation11 + $0x88] sm:$0xf] }
 0x191   :  { %v2416_v32 = vpop.f32.mrf.mxu1  ;;  %v5284_v3 = vor.u32 %v5983_v11, %v5283_v56  ;;  %v2653_v62 = vmul.f32 0.5, %v2441_v57  ;;  %v5208_v22 = vor.u32 %v5961_v24, %v5205_v61  ;;  %v5317_v56 = vld [vmem:[#allocation11 + $0x2b0] sm:$0xf0]  ;;  %v5941_v57 = vld [vmem:[#allocation11 + $0x124] sm:$0xf] }
 0x192   :  { %3349 = vmatpush.bf16.msra.mxu2 %v5316_v30  ;;  %v5971_v30 = vld [vmem:[#allocation11 + $0x20c] sm:$0xf0]  ;;  %v5905_v61 = vld [vmem:[#allocation11 + $0x4] sm:$0xf] }
 0x193   :  { %6098 = vtanh.f32 %v2653_v62  ;;  %v5236_v35 = vor.u32 %v5971_v30, %v5235_v28  ;;  %v5928_v30 = vld [vmem:[#allocation11 + $0xb4] sm:$0xf0] }
 0x194   :  { %3325 = vmatpush.bf16.msra.mxu0 %v5028_v8  ;;  %3338 = vmatpush.bf16.msra.mxu1 %v5156_v54  ;;  %v2429_v49 = vpop.f32.mrf.mxu2  ;;  %v5957_v8 = vld [vmem:[#allocation11 + $0x1a4] sm:$0xf]  ;;  %v5268_v54 = vor.u32 %v5979_v7, %v5267_v9  ;;  %v5936_v7 = vld [vmem:[#allocation11 + $0xf4] sm:$0xf0] }
 0x195   :  { %v2442_v13 = vpop.f32.mrf.mxu3  ;;  %v5192_v15 = vor.u32 %v5957_v8, %v5189_v12  ;;  %v5985_v9 = vld [vmem:[#allocation11 + $0x284] sm:$0xf]  ;;  %v5227_v12 = vld [vmem:[#allocation11 + $0x1e8] sm:$0xf] }
 0x196   :  { %3350 = vmatpush.bf16.msra.mxu2 %v5300_v45  ;;  %v5993_v45 = vld [vmem:[#allocation11 + $0x2c4] sm:$0xf] }
 0x197   :  { %v5336_v47 = vor.u32 %v5993_v45, %v5333_v33  ;;  %v5924_v45 = vld [vmem:[#allocation11 + $0x94] sm:$0xf0] }
 0x198   :  { %3326 = vmatpush.bf16.msra.mxu0 %v5012_v21  ;;  %3339 = vmatpush.bf16.msra.mxu1 %v5140_v23  ;;  %v5252_v21 = vor.u32 %v5975_v60, %v5251_v0  ;;  %v5100_v60 = vor.u32 %v5936_v7, %v5099_v55  ;;  %v6027_v55 = vld [vmem:[#allocation11 + $0x3cc] sm:$0xf0]  ;;  %v5147_v7 = vld [vmem:[#allocation11 + $0x148] sm:$0xf] }
 0x199   :  { %v6099_v23 = vpop.eup %6098 }
 0x19a   :  { %3351 = vmatpush.bf16.msra.mxu2 %v5284_v3  ;;  %v2661_v25 = vmul.f32 0.5, %v6099_v23  ;;  %v4981_v3 = vld [vmem:[#allocation11 + $0x10] sm:$0xf0]  ;;  %v5964_v23 = vld [vmem:[#allocation11 + $0x1d4] sm:$0xf0] }
 0x19b   :  { %v5212_v28 = vor.u32 %v5964_v23, %v5211_v19 }
 0x19c   :  { %3327 = vmatpush.bf16.msra.mxu0 %v4996_v34  ;;  %3340 = vmatpush.bf16.msra.mxu1 %v5124_v37  ;;  %v2665_v32 = vadd.f32 0.5, %v2661_v25  ;;  %v5949_v34 = vld [vmem:[#allocation11 + $0x164] sm:$0xf]  ;;  %v5352_v37 = vor.u32 %v5997_v5, %v5349_v31  ;;  %v950_v31 = vperm.slane %v6480_v16, 2 }
 0x19d   :  { %v5160_v42 = vor.u32 %v5949_v34, %v5157_v20  ;;  %v5195_v34 = vld [vmem:[#allocation11 + $0x1a8] sm:$0xf]  ;;  %v5960_v20 = vld [vmem:[#allocation11 + $0x1b4] sm:$0xf0] }
 0x19e   :  { %3352 = vmatpush.bf16.msra.mxu2 %v5268_v54  ;;  %v6521_v39 = vpack.c.bf16 %v2665_v32, %v2665_v32  ;;  %v5968_v54 = vld [vmem:[#allocation11 + $0x1f4] sm:$0xf0] }
 0x19f   :  { %v5228_v26 = vor.u32 %v5968_v54, %v5227_v12 }
 0x1a0   :  { %3328 = vmatpush.bf16.msra.mxu0 %v4980_v50  ;;  %3341 = vmatpush.bf16.msra.mxu1 %v5108_v52  ;;  %v6519_v38 = vpop.f32.mrf.mxu0  ;;  %v5909_v50 = vld [vmem:[#allocation11 + $0x24] sm:$0xf]  ;;  %v4997_v52 = vld [vmem:[#allocation11 + $0x30] sm:$0xf0] }
 0x1a1   :  { %v5000_v24 = vor.u32 %v5909_v50, %v4997_v52  ;;  %v2454_v16 = vadd.f32 %v6519_v38, %v950_v31  ;;  %v5920_v50 = vld [vmem:[#allocation11 + $0x74] sm:$0xf0]  ;;  %v5180_v52 = vor.u32 %v5956_v4, %v5179_v46  ;;  %v5934_v31 = vld [vmem:[#allocation11 + $0xec] sm:$0xf] }
 0x1a2   :  { %3353 = vmatpush.bf16.msra.mxu2 %v5252_v21  ;;  %v6523_v40 = vpop.f32.mrf.mxu1  ;;  %v5932_v21 = vld [vmem:[#allocation11 + $0xd4] sm:$0xf0] }
 0x1a3   :  { %3329 = vmatmul.bf16.vlgmr.msra.gmra.mxu0 %v6516_v63  ;;  %3342 = vmatmul.bf16.vlgmr.msra.gmra.mxu1 %v6521_v39  ;;  %v5084_v25 = vor.u32 %v5932_v21, %v5083_v18  ;;  %v5131_v18 = vld [vmem:[#allocation11 + $0x128] sm:$0xf]  ;;  %v5944_v21 = vld [vmem:[#allocation11 + $0x134] sm:$0xf0] }
 0x1a4   :  { %3373 = vmatpush.bf16.msrb.mxu0 %v5096_v53  ;;  %3386 = vmatpush.bf16.msrb.mxu1 %v5224_v17  ;;  %v5989_v53 = vld [vmem:[#allocation11 + $0x2a4] sm:$0xf]  ;;  %v5125_v17 = vld [vmem:[#allocation11 + $0x130] sm:$0xf0] }
 0x1a5   :  { %v5320_v58 = vor.u32 %v5989_v53, %v5317_v56  ;;  %v5128_v62 = vor.u32 %v5941_v57, %v5125_v17  ;;  %v5237_v53 = vld [vmem:[#allocation11 + $0x210] sm:$0xf0]  ;;  %v5475_v56 = vld [vmem:[#allocation11 + $0x3e0] sm:$0xf]  ;;  %v6031_v57 = vld [vmem:[#allocation11 + $0x3ec] sm:$0xf0]  ;;  %v2467_v17 = vadd.f32 %v6523_v40, %v2454_v16 }
 0x1a6   :  { %3354 = vmatpush.bf16.msra.mxu2 %v5236_v35  ;;  %v5948_v40 = vld [vmem:[#allocation11 + $0x154] sm:$0xf0]  ;;  %v6015_v16 = vld [vmem:[#allocation11 + $0x36c] sm:$0xf0] }
 0x1a8   :  { %3374 = vmatpush.bf16.msrb.mxu0 %v5080_v1  ;;  %3387 = vmatpush.bf16.msrb.mxu1 %v5208_v22  ;;  %v2455_v59 = vpop.f32.mrf.mxu0  ;;  %v5937_v1 = vld [vmem:[#allocation11 + $0x104] sm:$0xf]  ;;  %v5301_v22 = vld [vmem:[#allocation11 + $0x290] sm:$0xf0] }
 0x1a9   :  { %v5304_v49 = vor.u32 %v5985_v9, %v5301_v22  ;;  %v5112_v0 = vor.u32 %v5937_v1, %v5109_v6  ;;  %v5952_v59 = vld [vmem:[#allocation11 + $0x174] sm:$0xf0]  ;;  %v5019_v1 = vld [vmem:[#allocation11 + $0x48] sm:$0xf]  ;;  %v5459_v6 = vld [vmem:[#allocation11 + $0x3c0] sm:$0xf] }
 0x1aa   :  { %3399 = vmatpush.bf16.msrb.mxu2 %v5352_v37  ;;  %v2468_v11 = vpop.f32.mrf.mxu1  ;;  %v5916_v22 = vld [vmem:[#allocation11 + $0x54] sm:$0xf0] }
 0x1ab   :  { %v5020_v54 = vor.u32 %v5916_v22, %v5019_v1  ;;  %v5379_v1 = vld [vmem:[#allocation11 + $0x320] sm:$0xf] }
 0x1ac   :  { %3375 = vmatpush.bf16.msrb.mxu0 %v5064_v14  ;;  %3388 = vmatpush.bf16.msrb.mxu1 %v5192_v15  ;;  %v6526_v8 = vpop.f32.mrf.mxu2  ;;  %v4984_v14 = vor.u32 %v5905_v61, %v4981_v3  ;;  %v5981_v15 = vld [vmem:[#allocation11 + $0x264] sm:$0xf] }
 0x1ad   :  { %v6528_v13 = vpop.f32.mrf.mxu3  ;;  %v5288_v2 = vor.u32 %v5981_v15, %v5285_v36  ;;  %v2480_v61 = vadd.f32 %v6526_v8, %v2467_v17  ;;  %v5148_v8 = vor.u32 %v5948_v40, %v5147_v7  ;;  %v6023_v15 = vld [vmem:[#allocation11 + $0x3ac] sm:$0xf0]  ;;  %v5922_v7 = vld [vmem:[#allocation11 + $0x8c] sm:$0xf]  ;;  %v5053_v40 = vld [vmem:[#allocation11 + $0x98] sm:$0xf0] }
 0x1ae   :  { %3400 = vmatpush.bf16.msrb.mxu2 %v5336_v47  ;;  %v5052_v47 = vor.u32 %v5924_v45, %v5051_v44  ;;  %v6011_v17 = vld [vmem:[#allocation11 + $0x34c] sm:$0xf0] }
 0x1af   :  { %v2493_v12 = vadd.f32 %v6528_v13, %v2480_v61  ;;  %v5132_v13 = vor.u32 %v5944_v21, %v5131_v18  ;;  %v5958_v61 = vld [vmem:[#allocation11 + $0x1ac] sm:$0xf]  ;;  %v6003_v18 = vld [vmem:[#allocation11 + $0x30c] sm:$0xf0] }
 0x1b0   :  { %3376 = vmatpush.bf16.msrb.mxu0 %v5048_v43  ;;  %3389 = vmatpush.bf16.msrb.mxu1 %v5176_v29  ;;  %v5977_v43 = vld [vmem:[#allocation11 + $0x244] sm:$0xf]  ;;  %v5067_v29 = vld [vmem:[#allocation11 + $0xa8] sm:$0xf] }
 0x1b1   :  { %v5272_v5 = vor.u32 %v5977_v43, %v5269_v27  ;;  %v5068_v37 = vor.u32 %v5928_v30, %v5067_v29  ;;  %v5908_v43 = vld [vmem:[#allocation11 + $0x14] sm:$0xf0]  ;;  %v5115_v27 = vld [vmem:[#allocation11 + $0x108] sm:$0xf]  ;;  %v6019_v29 = vld [vmem:[#allocation11 + $0x38c] sm:$0xf0] }
 0x1b2   :  { %3401 = vmatpush.bf16.msrb.mxu2 %v5320_v58  ;;  %v5163_v58 = vld [vmem:[#allocation11 + $0x168] sm:$0xf] }
 0x1b3   :  { %v5164_v9 = vor.u32 %v5952_v59, %v5163_v58  ;;  %v5926_v59 = vld [vmem:[#allocation11 + $0xac] sm:$0xf] }
 0x1b4   :  { %3377 = vmatpush.bf16.msrb.mxu0 %v5032_v10  ;;  %3390 = vmatpush.bf16.msrb.mxu1 %v5160_v42  ;;  %v2481_v32 = vpop.f32.mrf.mxu2  ;;  %v5973_v10 = vld [vmem:[#allocation11 + $0x224] sm:$0xf]  ;;  %v5196_v42 = vor.u32 %v5960_v20, %v5195_v34 }
 0x1b5   :  { %v2494_v35 = vpop.f32.mrf.mxu3  ;;  %v5256_v33 = vor.u32 %v5973_v10, %v5253_v41  ;;  %v5101_v32 = vld [vmem:[#allocation11 + $0xf8] sm:$0xf0] }
 0x1b6   :  { %3402 = vmatpush.bf16.msrb.mxu2 %v5304_v49  ;;  %v5460_v49 = vor.u32 %v6027_v55, %v5459_v6  ;;  %v5966_v35 = vld [vmem:[#allocation11 + $0x1ec] sm:$0xf]  ;;  %v5104_v45 = vor.u32 %v5934_v31, %v5101_v32  ;;  %v5339_v32 = vld [vmem:[#allocation11 + $0x2c8] sm:$0xf] }
 0x1b8   :  { %3378 = vmatpush.bf16.msrb.mxu0 %v5016_v48  ;;  %3391 = vmatpush.bf16.msrb.mxu1 %v5144_v51  ;;  %v5035_v48 = vld [vmem:[#allocation11 + $0x68] sm:$0xf]  ;;  %v5969_v51 = vld [vmem:[#allocation11 + $0x204] sm:$0xf] }
 0x1b9   :  { %v5240_v11 = vor.u32 %v5969_v51, %v5237_v53  ;;  %v5962_v51 = vld [vmem:[#allocation11 + $0x1cc] sm:$0xf] }
 0x1ba   :  { %3403 = vmatpush.bf16.msrb.mxu2 %v5288_v2 }
 0x1bc   :  { %3379 = vmatpush.bf16.msrb.mxu0 %v5000_v24  ;;  %3392 = vmatpush.bf16.msrb.mxu1 %v5128_v62  ;;  %v5476_v24 = vor.u32 %v6031_v57, %v5475_v56  ;;  %v5036_v62 = vor.u32 %v5920_v50, %v5035_v48  ;;  %v5085_v48 = vld [vmem:[#allocation11 + $0xd8] sm:$0xf0]  ;;  %v5395_v57 = vld [vmem:[#allocation11 + $0x340] sm:$0xf] }
 0x1be   :  { %3404 = vmatpush.bf16.msrb.mxu2 %v5272_v5  ;;  %3360 = vmatpush.bf16.msra.mxu3 %v5476_v24  ;;  %v5940_v5 = vld [vmem:[#allocation11 + $0x114] sm:$0xf0]  ;;  %v5396_v24 = vor.u32 %v6011_v17, %v5395_v57 }
 0x1bf   :  { %v5116_v44 = vor.u32 %v5940_v5, %v5115_v27 }
 0x1c0   :  { %3380 = vmatpush.bf16.msrb.mxu0 %v4984_v14  ;;  %3393 = vmatpush.bf16.msrb.mxu1 %v5112_v0  ;;  %v2505_v38 = vpop.f32.mrf.mxu0  ;;  %v5003_v14 = vld [vmem:[#allocation11 + $0x28] sm:$0xf]  ;;  %v5912_v0 = vld [vmem:[#allocation11 + $0x34] sm:$0xf0] }
 0x1c1   :  { %v5004_v2 = vor.u32 %v5912_v0, %v5003_v14  ;;  %v5355_v14 = vld [vmem:[#allocation11 + $0x2e8] sm:$0xf]  ;;  %v5918_v0 = vld [vmem:[#allocation11 + $0x6c] sm:$0xf] }
 0x1c2   :  { %3405 = vmatpush.bf16.msrb.mxu2 %v5256_v33  ;;  %v2518_v3 = vpop.f32.mrf.mxu1  ;;  %3361 = vmatpush.bf16.msra.mxu3 %v5460_v49  ;;  %v5411_v33 = vld [vmem:[#allocation11 + $0x360] sm:$0xf]  ;;  %v5954_v49 = vld [vmem:[#allocation11 + $0x18c] sm:$0xf] }
 0x1c3   :  { %3381 = vmatmul.bf16.vlgmr.msrb.gmra.mxu0 %v6516_v63  ;;  %3394 = vmatmul.bf16.vlgmr.msrb.gmra.mxu1 %v6521_v39  ;;  %v5412_v50 = vor.u32 %v6015_v16, %v5411_v33 }
 0x1c4   :  { %3425 = vmatpush.bf16.msra.mxu0 %v5100_v60  ;;  %3438 = vmatpush.bf16.msra.mxu1 %v5228_v26  ;;  %v5443_v60 = vld [vmem:[#allocation11 + $0x3a0] sm:$0xf]  ;;  %v2506_v26 = vadd.f32 %v2505_v38, %v2493_v12  ;;  %v5181_v12 = vld [vmem:[#allocation11 + $0x198] sm:$0xf0] }
 0x1c5   :  { %v5444_v36 = vor.u32 %v6023_v15, %v5443_v60  ;;  %v5056_v15 = vor.u32 %v5922_v7, %v5053_v40  ;;  %v5184_v21 = vor.u32 %v5954_v49, %v5181_v12 }
 0x1c6   :  { %3406 = vmatpush.bf16.msrb.mxu2 %v5240_v11  ;;  %v2519_v30 = vadd.f32 %v2518_v3, %v2506_v26  ;;  %v5069_v11 = vld [vmem:[#allocation11 + $0xb8] sm:$0xf0]  ;;  %v5363_v26 = vld [vmem:[#allocation11 + $0x300] sm:$0xf] }
 0x1c7   :  { %3362 = vmatpush.bf16.msra.mxu3 %v5444_v36  ;;  %v5197_v3 = vld [vmem:[#allocation11 + $0x1b8] sm:$0xf0]  ;;  %v5072_v22 = vor.u32 %v5926_v59, %v5069_v11 }
 0x1c8   :  { %3426 = vmatpush.bf16.msra.mxu0 %v5084_v25  ;;  %3439 = vmatpush.bf16.msra.mxu1 %v5212_v28  ;;  %v2507_v19 = vpop.f32.mrf.mxu0  ;;  %v4987_v25 = vld [vmem:[#allocation11 + $0x8] sm:$0xf]  ;;  %v5427_v28 = vld [vmem:[#allocation11 + $0x380] sm:$0xf]  ;;  %v5200_v55 = vor.u32 %v5958_v61, %v5197_v3  ;;  %v5037_v36 = vld [vmem:[#allocation11 + $0x78] sm:$0xf0] }
 0x1c9   :  { %v5428_v34 = vor.u32 %v6019_v29, %v5427_v28  ;;  %v5950_v19 = vld [vmem:[#allocation11 + $0x16c] sm:$0xf]  ;;  %v5040_v31 = vor.u32 %v5918_v0, %v5037_v36  ;;  %v6013_v0 = vld [vmem:[#allocation11 + $0x364] sm:$0xf] }
 0x1ca   :  { %v2520_v23 = vpop.f32.mrf.mxu1  ;;  %v5906_v61 = vld [vmem:[#allocation11 + $0xc] sm:$0xf]  ;;  %v6009_v36 = vld [vmem:[#allocation11 + $0x344] sm:$0xf] }
 0x1cb   :  { %3363 = vmatpush.bf16.msra.mxu3 %v5428_v34  ;;  %v5364_v23 = vor.u32 %v6003_v18, %v5363_v26  ;;  %v5996_v34 = vld [vmem:[#allocation11 + $0x2d4] sm:$0xf0]  ;;  %v5275_v18 = vld [vmem:[#allocation11 + $0x248] sm:$0xf] }
 0x1cc   :  { %3427 = vmatpush.bf16.msra.mxu0 %v5068_v37  ;;  %3440 = vmatpush.bf16.msra.mxu1 %v5196_v42  ;;  %v2531_v20 = vpop.f32.mrf.mxu2  ;;  %v5229_v37 = vld [vmem:[#allocation11 + $0x1f8] sm:$0xf0]  ;;  %v4988_v42 = vor.u32 %v5908_v43, %v4987_v25  ;;  %v5340_v33 = vor.u32 %v5996_v34, %v5339_v32  ;;  %v6005_v32 = vld [vmem:[#allocation11 + $0x324] sm:$0xf]  ;;  %v5381_v34 = vld [vmem:[#allocation11 + $0x330] sm:$0xf0] }
 0x1cd   :  { %v2532_v10 = vadd.f32 %v2531_v20, %v2519_v30  ;;  %v2544_v41 = vpop.f32.mrf.mxu3  ;;  %v5232_v4 = vor.u32 %v5966_v35, %v5229_v37  ;;  %v5165_v43 = vld [vmem:[#allocation11 + $0x178] sm:$0xf0]  ;;  %v5914_v20 = vld [vmem:[#allocation11 + $0x4c] sm:$0xf] }
 0x1ce   :  { %v5168_v35 = vor.u32 %v5950_v19, %v5165_v43  ;;  %v5021_v37 = vld [vmem:[#allocation11 + $0x58] sm:$0xf0]  ;;  %v5397_v19 = vld [vmem:[#allocation11 + $0x350] sm:$0xf0] }
 0x1cf   :  { %v2545_v46 = vadd.f32 %v2544_v41, %v2532_v10  ;;  %3364 = vmatpush.bf16.msra.mxu3 %v5412_v50  ;;  %v6025_v10 = vld [vmem:[#allocation11 + $0x3c4] sm:$0xf]  ;;  %v5461_v41 = vld [vmem:[#allocation11 + $0x3d0] sm:$0xf0]  ;;  %v5024_v16 = vor.u32 %v5914_v20, %v5021_v37  ;;  %v5005_v50 = vld [vmem:[#allocation11 + $0x38] sm:$0xf0]  ;;  %v5384_v20 = vor.u32 %v6005_v32, %v5381_v34 }
 0x1d0   :  { %3428 = vmatpush.bf16.msra.mxu0 %v5052_v47  ;;  %3441 = vmatpush.bf16.msra.mxu1 %v5180_v52  ;;  %v5930_v47 = vld [vmem:[#allocation11 + $0xcc] sm:$0xf]  ;;  %v5213_v52 = vld [vmem:[#allocation11 + $0x1d8] sm:$0xf0]  ;;  %v5451_v32 = vld [vmem:[#allocation11 + $0x3a8] sm:$0xf] }
 0x1d1   :  { %v2654_v53 = vmul.f32 0.5, %v2545_v46  ;;  %v5088_v56 = vor.u32 %v5930_v47, %v5085_v48  ;;  %v5216_v58 = vor.u32 %v5962_v51, %v5213_v52  ;;  %v5323_v46 = vld [vmem:[#allocation11 + $0x2a8] sm:$0xf]  ;;  %v5910_v47 = vld [vmem:[#allocation11 + $0x2c] sm:$0xf] }
 0x1d2   :  { %v6021_v51 = vld [vmem:[#allocation11 + $0x3a4] sm:$0xf]  ;;  %v5445_v52 = vld [vmem:[#allocation11 + $0x3b0] sm:$0xf0]  ;;  %v5008_v11 = vor.u32 %v5910_v47, %v5005_v50  ;;  %v5994_v50 = vld [vmem:[#allocation11 + $0x2cc] sm:$0xf] }
 0x1d3   :  { %6100 = vtanh.f32 %v2654_v53  ;;  %3365 = vmatpush.bf16.msra.mxu3 %v5396_v24  ;;  %v5942_v53 = vld [vmem:[#allocation11 + $0x12c] sm:$0xf]  ;;  %v5448_v57 = vor.u32 %v6021_v51, %v5445_v52  ;;  %v5307_v24 = vld [vmem:[#allocation11 + $0x288] sm:$0xf]  ;;  %v6024_v34 = vld [vmem:[#allocation11 + $0x3b4] sm:$0xf0] }
 0x1d4   :  { %3429 = vmatpush.bf16.msra.mxu0 %v5036_v62  ;;  %3442 = vmatpush.bf16.msra.mxu1 %v5164_v9  ;;  %v2533_v38 = vpop.f32.mrf.mxu2  ;;  %v6007_v9 = vld [vmem:[#allocation11 + $0x32c] sm:$0xf0] }
 0x1d5   :  { %v2546_v62 = vpop.f32.mrf.mxu3  ;;  %v5380_v6 = vor.u32 %v6007_v9, %v5379_v1  ;;  %v5988_v38 = vld [vmem:[#allocation11 + $0x294] sm:$0xf0]  ;;  %v6017_v1 = vld [vmem:[#allocation11 + $0x384] sm:$0xf]  ;;  %v5429_v9 = vld [vmem:[#allocation11 + $0x390] sm:$0xf0] }
 0x1d6   :  { %v4989_v62 = vld [vmem:[#allocation11 + $0x18] sm:$0xf0]  ;;  %v5308_v40 = vor.u32 %v5988_v38, %v5307_v24 }
 0x1d7   :  { %3366 = vmatpush.bf16.msra.mxu3 %v5380_v6  ;;  %v5117_v6 = vld [vmem:[#allocation11 + $0x118] sm:$0xf0]  ;;  %v4992_v12 = vor.u32 %v5906_v61, %v4989_v62 }
 0x1d8   :  { %3430 = vmatpush.bf16.msra.mxu0 %v5020_v54  ;;  %3443 = vmatpush.bf16.msra.mxu1 %v5148_v8  ;;  %v6000_v8 = vld [vmem:[#allocation11 + $0x2f4] sm:$0xf0] }
 0x1d9   :  { %v6101_v54 = vpop.eup %6100  ;;  %v5356_v28 = vor.u32 %v6000_v8, %v5355_v14  ;;  %v5984_v14 = vld [vmem:[#allocation11 + $0x274] sm:$0xf0] }
 0x1da   :  { %v2662_v60 = vmul.f32 0.5, %v6101_v54  ;;  %v5291_v54 = vld [vmem:[#allocation11 + $0x268] sm:$0xf] }
 0x1db   :  { %3367 = vmatpush.bf16.msra.mxu3 %v5364_v23  ;;  %v5292_v26 = vor.u32 %v5984_v14, %v5291_v54  ;;  %v5400_v23 = vor.u32 %v6009_v36, %v5397_v19  ;;  %v5974_v14 = vld [vmem:[#allocation11 + $0x22c] sm:$0xf]  ;;  %v6032_v36 = vld [vmem:[#allocation11 + $0x3f4] sm:$0xf0] }
 0x1dc   :  { %3431 = vmatpush.bf16.msra.mxu0 %v5004_v2  ;;  %3444 = vmatpush.bf16.msra.mxu1 %v5132_v13  ;;  %v6029_v2 = vld [vmem:[#allocation11 + $0x3e4] sm:$0xf]  ;;  %v2666_v25 = vadd.f32 0.5, %v2662_v60  ;;  %v5477_v13 = vld [vmem:[#allocation11 + $0x3f0] sm:$0xf0] }
 0x1dd   :  { %v5480_v29 = vor.u32 %v6029_v2, %v5477_v13  ;;  %v5413_v60 = vld [vmem:[#allocation11 + $0x370] sm:$0xf0]  ;;  %v6112_v2 = vld [vmem:[#allocation10] sm:$0xf] }
 0x1de   :  { %v6541_v30 = vpack.c.bf16 %v2666_v25, %v2666_v25  ;;  %v951_v25 = vperm.slane %v6112_v2, 3 }
 0x1df   :  { %3412 = vmatpush.bf16.msrb.mxu3 %v5480_v29  ;;  %v5259_v29 = vld [vmem:[#allocation11 + $0x228] sm:$0xf] }
 0x1e0   :  { %3432 = vmatpush.bf16.msra.mxu0 %v4988_v42  ;;  %3445 = vmatpush.bf16.msra.mxu1 %v5116_v44  ;;  %v6539_v27 = vpop.f32.mrf.mxu0  ;;  %v5946_v42 = vld [vmem:[#allocation11 + $0x14c] sm:$0xf]  ;;  %v5149_v44 = vld [vmem:[#allocation11 + $0x158] sm:$0xf0] }
 0x1e1   :  { %3355 = vmatmul.bf16.vlgmr.msra.gmra.mxu2 %v6541_v30  ;;  %v5152_v48 = vor.u32 %v5946_v42, %v5149_v44  ;;  %v5998_v42 = vld [vmem:[#allocation11 + $0x2ec] sm:$0xf]  ;;  %v5357_v44 = vld [vmem:[#allocation11 + $0x2f8] sm:$0xf0] }
 0x1e2   :  { %v6543_v5 = vpop.f32.mrf.mxu1  ;;  %3451 = vmatpush.bf16.msra.mxu2 %v5356_v28 }
 0x1e3   :  { %3433 = vmatmul.bf16.vlgmr.msra.gmra.mxu0 %v6516_v63  ;;  %3446 = vmatmul.bf16.vlgmr.msra.gmra.mxu1 %v6521_v39 }
 0x1e4   :  { %3477 = vmatpush.bf16.msrb.mxu0 %v5104_v45  ;;  %3490 = vmatpush.bf16.msrb.mxu1 %v5232_v4  ;;  %v5464_v45 = vor.u32 %v6025_v10, %v5461_v41  ;;  %v5992_v4 = vld [vmem:[#allocation11 + $0x2b4] sm:$0xf0]  ;;  %v5243_v10 = vld [vmem:[#allocation11 + $0x208] sm:$0xf] }
 0x1e5   :  { %v5972_v41 = vld [vmem:[#allocation11 + $0x214] sm:$0xf0] }
 0x1e6   :  { %3413 = vmatpush.bf16.msrb.mxu3 %v5464_v45  ;;  %3452 = vmatpush.bf16.msra.mxu2 %v5340_v33  ;;  %v5365_v45 = vld [vmem:[#allocation11 + $0x310] sm:$0xf0] }
 0x1e8   :  { %3478 = vmatpush.bf16.msrb.mxu0 %v5088_v56  ;;  %3491 = vmatpush.bf16.msrb.mxu1 %v5216_v58  ;;  %v5133_v56 = vld [vmem:[#allocation11 + $0x138] sm:$0xf0]  ;;  %v2559_v17 = vpop.f32.mrf.mxu0  ;;  %v5324_v58 = vor.u32 %v5992_v4, %v5323_v46  ;;  %v5360_v4 = vor.u32 %v5998_v42, %v5357_v44 }
 0x1e9   :  { %v5136_v3 = vor.u32 %v5942_v53, %v5133_v56  ;;  %v5990_v53 = vld [vmem:[#allocation11 + $0x2ac] sm:$0xf]  ;;  %v5325_v56 = vld [vmem:[#allocation11 + $0x2b8] sm:$0xf0] }
 0x1ea   :  { %v2572_v59 = vpop.f32.mrf.mxu1  ;;  %3414 = vmatpush.bf16.msrb.mxu3 %v5448_v57  ;;  %3453 = vmatpush.bf16.msra.mxu2 %v5324_v58  ;;  %v5328_v17 = vor.u32 %v5990_v53, %v5325_v56  ;;  %v6030_v56 = vld [vmem:[#allocation11 + $0x3ec] sm:$0xf] }
 0x1eb   :  { %v5986_v59 = vld [vmem:[#allocation11 + $0x28c] sm:$0xf] }
 0x1ec   :  { %3479 = vmatpush.bf16.msrb.mxu0 %v5072_v22  ;;  %3492 = vmatpush.bf16.msrb.mxu1 %v5200_v55  ;;  %v5938_v22 = vld [vmem:[#allocation11 + $0x10c] sm:$0xf]  ;;  %v5432_v55 = vor.u32 %v6017_v1, %v5429_v9  ;;  %v2583_v7 = vpop.f32.mrf.mxu2  ;;  %v5293_v9 = vld [vmem:[#allocation11 + $0x278] sm:$0xf0] }
 0x1ed   :  { %v2596_v49 = vpop.f32.mrf.mxu3  ;;  %v5120_v8 = vor.u32 %v5938_v22, %v5117_v6  ;;  %v5982_v1 = vld [vmem:[#allocation11 + $0x26c] sm:$0xf] }
 0x1ee   :  { %3415 = vmatpush.bf16.msrb.mxu3 %v5432_v55  ;;  %3454 = vmatpush.bf16.msra.mxu2 %v5308_v40  ;;  %v5296_v6 = vor.u32 %v5982_v1, %v5293_v9  ;;  %v5277_v40 = vld [vmem:[#allocation11 + $0x258] sm:$0xf0] }
 0x1ef   :  { %v5453_v1 = vld [vmem:[#allocation11 + $0x3b8] sm:$0xf0] }
 0x1f0   :  { %3480 = vmatpush.bf16.msrb.mxu0 %v5056_v15  ;;  %3493 = vmatpush.bf16.msrb.mxu1 %v5184_v21  ;;  %v5416_v15 = vor.u32 %v6013_v0, %v5413_v60  ;;  %v5980_v21 = vld [vmem:[#allocation11 + $0x254] sm:$0xf0] }
 0x1f1   :  { %3407 = vmatmul.bf16.vlgmr.msrb.gmra.mxu2 %v6541_v30  ;;  %v5276_v13 = vor.u32 %v5980_v21, %v5275_v18  ;;  %v5483_v21 = vld [vmem:[#allocation11 + $0x3e8] sm:$0xf] }
 0x1f2   :  { %3416 = vmatpush.bf16.msrb.mxu3 %v5416_v15  ;;  %3455 = vmatpush.bf16.msra.mxu2 %v5292_v26  ;;  %v5970_v15 = vld [vmem:[#allocation11 + $0x20c] sm:$0xf]  ;;  %v5245_v26 = vld [vmem:[#allocation11 + $0x218] sm:$0xf0] }
 0x1f4   :  { %3481 = vmatpush.bf16.msrb.mxu0 %v5040_v31  ;;  %3494 = vmatpush.bf16.msrb.mxu1 %v5168_v35  ;;  %v2585_v43 = vpop.f32.mrf.mxu2  ;;  %v5976_v31 = vld [vmem:[#allocation11 + $0x234] sm:$0xf0]  ;;  %v2558_v35 = vadd.f32 %v6539_v27, %v951_v25  ;;  %v5341_v27 = vld [vmem:[#allocation11 + $0x2d8] sm:$0xf0]  ;;  %v5484_v25 = vor.u32 %v6032_v36, %v5483_v21 }
 0x1f5   :  { %v2598_v28 = vpop.f32.mrf.mxu3  ;;  %v5260_v37 = vor.u32 %v5976_v31, %v5259_v29  ;;  %v5344_v51 = vor.u32 %v5994_v50, %v5341_v27  ;;  %v6558_v29 = vld [vmem:[%s6595_s6] sm:$0xf]  ;;  %v6008_v50 = vld [vmem:[#allocation11 + $0x334] sm:$0xf0]  ;;  %v5373_v21 = vld [vmem:[#allocation11 + $0x318] sm:$0xf0] }
 0x1f6   :  { %3417 = vmatpush.bf16.msrb.mxu3 %v5400_v23  ;;  %3456 = vmatpush.bf16.msra.mxu2 %v5276_v13  ;;  %v5248_v23 = vor.u32 %v5970_v15, %v5245_v26  ;;  %v5467_v13 = vld [vmem:[#allocation11 + $0x3c8] sm:$0xf]  ;;  %v6028_v28 = vld [vmem:[#allocation11 + $0x3d4] sm:$0xf0]  ;;  %v2674_v53 = vperm.slane %v6558_v29, 1  ;;  %v2675_v36 = vperm.slane %v6558_v29, 2 }
 0x1f7   :  { %v5468_v31 = vor.u32 %v6028_v28, %v5467_v13  ;;  %v5389_v15 = vld [vmem:[#allocation11 + $0x338] sm:$0xf0] }
 0x1f8   :  { %3482 = vmatpush.bf16.msrb.mxu0 %v5024_v16  ;;  %3495 = vmatpush.bf16.msrb.mxu1 %v5152_v48  ;;  %v5244_v16 = vor.u32 %v5972_v41, %v5243_v10  ;;  %v5435_v10 = vld [vmem:[#allocation11 + $0x388] sm:$0xf]  ;;  %v6020_v41 = vld [vmem:[#allocation11 + $0x394] sm:$0xf0] }
 0x1fa   :  { %3418 = vmatpush.bf16.msrb.mxu3 %v5384_v20  ;;  %3457 = vmatpush.bf16.msra.mxu2 %v5260_v37  ;;  %v2673_v20 = vperm.slane %v6558_v29, 0  ;;  %v5452_v37 = vor.u32 %v6024_v34, %v5451_v32 }
 0x1fc   :  { %3483 = vmatpush.bf16.msrb.mxu0 %v5008_v11  ;;  %3496 = vmatpush.bf16.msrb.mxu1 %v5136_v3  ;;  %v5309_v11 = vld [vmem:[#allocation11 + $0x298] sm:$0xf0] }
 0x1fd   :  { %v5312_v61 = vor.u32 %v5986_v59, %v5309_v11 }
 0x1fe   :  { %3458 = vmatpush.bf16.msra.mxu2 %v5244_v16 }
 0x200   :  { %3484 = vmatpush.bf16.msrb.mxu0 %v4992_v12  ;;  %3497 = vmatpush.bf16.msrb.mxu1 %v5120_v8  ;;  %v2609_v46 = vpop.f32.mrf.mxu0  ;;  %v5261_v8 = vld [vmem:[#allocation11 + $0x238] sm:$0xf0] }
 0x201   :  { %3459 = vmatmul.bf16.vlgmr.msra.gmra.mxu2 %v6541_v30  ;;  %v5264_v0 = vor.u32 %v5974_v14, %v5261_v8  ;;  %v6010_v14 = vld [vmem:[#allocation11 + $0x34c] sm:$0xf]  ;;  %v5405_v8 = vld [vmem:[#allocation11 + $0x358] sm:$0xf0] }
 0x202   :  { %v2622_v48 = vpop.f32.mrf.mxu1  ;;  %3503 = vmatpush.bf16.msrb.mxu2 %v5360_v4  ;;  %v6012_v4 = vld [vmem:[#allocation11 + $0x354] sm:$0xf0] }
 0x203   :  { %3485 = vmatmul.bf16.vlgmr.msrb.gmra.mxu0 %v6516_v63  ;;  %3498 = vmatmul.bf16.vlgmr.msrb.gmra.mxu1 %v6521_v39  ;;  %v6001_v63 = vld [vmem:[#allocation11 + $0x304] sm:$0xf]  ;;  %v2571_v39 = vadd.f32 %v6543_v5, %v2558_v35 }
 0x204   :  { %v5368_v33 = vor.u32 %v6001_v63, %v5365_v45  ;;  %v5436_v63 = vor.u32 %v6020_v41, %v5435_v10 }
 0x205   :  { %v2584_v47 = vadd.f32 %v2583_v7, %v2571_v39  ;;  %v5978_v7 = vld [vmem:[#allocation11 + $0x24c] sm:$0xf]  ;;  %v6016_v39 = vld [vmem:[#allocation11 + $0x374] sm:$0xf0] }
 0x206   :  { %3419 = vmatpush.bf16.msrb.mxu3 %v5368_v33  ;;  %3504 = vmatpush.bf16.msrb.mxu2 %v5344_v51  ;;  %v5280_v12 = vor.u32 %v5978_v7, %v5277_v40  ;;  %v5419_v33 = vld [vmem:[#allocation11 + $0x368] sm:$0xf]  ;;  %v5437_v7 = vld [vmem:[#allocation11 + $0x398] sm:$0xf0] }
 0x207   :  { %v2597_v52 = vadd.f32 %v2596_v49, %v2584_v47  ;;  %v5420_v16 = vor.u32 %v6016_v39, %v5419_v33  ;;  %v5371_v51 = vld [vmem:[#allocation11 + $0x308] sm:$0xf]  ;;  %v6037_v39 = vld [vmem:[#allocation13 + $0x20] sm:$0xff] }
 0x208   :  { %v2611_v5 = vpop.f32.mrf.mxu0 }
 0x209   :  { %v2610_v57 = vadd.f32 %v2609_v46, %v2597_v52  ;;  %v5403_v46 = vld [vmem:[#allocation11 + $0x348] sm:$0xf]  ;;  %v6004_v52 = vld [vmem:[#allocation11 + $0x314] sm:$0xf0] }
 0x20a   :  { %v2624_v58 = vpop.f32.mrf.mxu1  ;;  %3505 = vmatpush.bf16.msrb.mxu2 %v5328_v17  ;;  %v5404_v47 = vor.u32 %v6012_v4, %v5403_v46  ;;  %v5372_v5 = vor.u32 %v6004_v52, %v5371_v51  ;;  %v6036_v4 = vld [vmem:[#allocation13 + $0x18] sm:$0xff]  ;;  %v6033_v52 = vld [vmem:[#allocation13] sm:$0xff] }
 0x20b   :  { %v2623_v24 = vadd.f32 %v2622_v48, %v2610_v57  ;;  %v5387_v48 = vld [vmem:[#allocation11 + $0x328] sm:$0xf]  ;;  %v5485_v57 = vld [vmem:[#allocation11 + $0x3f8] sm:$0xf0] }
 0x20c   :  { %v2635_v38 = vpop.f32.mrf.mxu2  ;;  %v5388_v27 = vor.u32 %v6008_v50, %v5387_v48  ;;  %v5488_v58 = vor.u32 %v6030_v56, %v5485_v57  ;;  %v6047_v48 = vld [vmem:[#allocation13 + $0x70] sm:$0xff]  ;;  %v6034_v50 = vld [vmem:[#allocation13 + $0x8] sm:$0xff]  ;;  %v6044_v56 = vld [vmem:[#allocation13 + $0x58] sm:$0xff] }
 0x20d   :  { %v2636_v3 = vadd.f32 %v2635_v38, %v2623_v24  ;;  %v2648_v62 = vpop.f32.mrf.mxu3  ;;  %v6026_v24 = vld [vmem:[#allocation11 + $0x3cc] sm:$0xf]  ;;  %v5469_v38 = vld [vmem:[#allocation11 + $0x3d8] sm:$0xf0] }
 0x20e   :  { %3506 = vmatpush.bf16.msrb.mxu2 %v5312_v61  ;;  %v6056_v57 = vld [vmem:[#allocation13 + $0xb8] sm:$0xff] }
 0x20f   :  { %v2649_v22 = vadd.f32 %v2648_v62, %v2636_v3  ;;  %v5472_v3 = vor.u32 %v6026_v24, %v5469_v38  ;;  %v6022_v62 = vld [vmem:[#allocation11 + $0x3ac] sm:$0xf]  ;;  %v6053_v24 = vld [vmem:[#allocation13 + $0xa0] sm:$0xff] }
 0x211   :  { %v2655_v55 = vmul.f32 0.5, %v2649_v22  ;;  %v5456_v22 = vor.u32 %v6022_v62, %v5453_v1  ;;  %v6052_v1 = vld [vmem:[#allocation13 + $0x98] sm:$0xff] }
 0x212   :  { %3507 = vmatpush.bf16.msrb.mxu2 %v5296_v6 }
 0x213   :  { %6102 = vtanh.f32 %v2655_v55  ;;  %v6018_v55 = vld [vmem:[#allocation11 + $0x38c] sm:$0xf] }
 0x214   :  { %v2637_v49 = vpop.f32.mrf.mxu2  ;;  %v5440_v40 = vor.u32 %v6018_v55, %v5437_v7  ;;  %v6050_v7 = vld [vmem:[#allocation13 + $0x88] sm:$0xff] }
 0x215   :  { %v2650_v54 = vpop.f32.mrf.mxu3  ;;  %v6014_v49 = vld [vmem:[#allocation11 + $0x36c] sm:$0xf] }
 0x216   :  { %3508 = vmatpush.bf16.msrb.mxu2 %v5280_v12  ;;  %v5421_v12 = vld [vmem:[#allocation11 + $0x378] sm:$0xf0] }
 0x217   :  { %v5424_v54 = vor.u32 %v6014_v49, %v5421_v12 }
 0x219   :  { %v6103_v60 = vpop.eup %6102 }
 0x21a   :  { %v2663_v18 = vmul.f32 0.5, %v6103_v60  ;;  %3509 = vmatpush.bf16.msrb.mxu2 %v5264_v0  ;;  %v5408_v0 = vor.u32 %v6010_v14, %v5405_v8  ;;  %v6006_v60 = vld [vmem:[#allocation11 + $0x32c] sm:$0xf]  ;;  %v6049_v14 = vld [vmem:[#allocation13 + $0x80] sm:$0xff] }
 0x21b   :  { %v5392_v26 = vor.u32 %v6006_v60, %v5389_v15 }
 0x21c   :  { %v2667_v19 = vadd.f32 0.5, %v2663_v18  ;;  %v6002_v18 = vld [vmem:[#allocation11 + $0x30c] sm:$0xf] }
 0x21e   :  { %v6552_v43 = vpack.c.bf16 %v2667_v19, %v2667_v19  ;;  %3510 = vmatpush.bf16.msrb.mxu2 %v5248_v23  ;;  %v5376_v19 = vor.u32 %v6002_v18, %v5373_v21  ;;  %v6062_v21 = vld [vmem:[#allocation13 + $0xe8] sm:$0xff] }
 0x220   :  { %v3330_v2 = vpop.f32.mrf.mxu0  ;;  %3368 = vmatmul.bf16.vlgmr.msra.gmra.mxu3 %v6552_v43  ;;  %v3343_v44 = vpop.f32.mrf.mxu1 }
 0x221   :  { %3464 = vmatpush.bf16.msra.mxu3 %v5484_v25  ;;  %3511 = vmatmul.bf16.vlgmr.msrb.gmra.mxu2 %v6541_v30  ;;  %v3331_v42 = vadd.f32 %v3330_v2, %v2673_v20  ;;  %v2676_v20 = vperm.slane %v6558_v29, 3 }
 0x222   :  { %3770 = vmatpush.bf16.msra.mxu2 %v6056_v57 }
 0x223   :  { %v6562_v45 = vadd.f32 %v3343_v44, %v3331_v42 }
 0x225   :  { %3465 = vmatpush.bf16.msra.mxu3 %v5468_v31 }
 0x228   :  { %v3332_v35 = vpop.f32.mrf.mxu0  ;;  %v3345_v30 = vpop.f32.mrf.mxu1 }
 0x229   :  { %3466 = vmatpush.bf16.msra.mxu3 %v5452_v37  ;;  %v6040_v35 = vld [vmem:[#allocation13 + $0x38] sm:$0xff]  ;;  %v6039_v37 = vld [vmem:[#allocation13 + $0x30] sm:$0xff] }
 0x22a   :  { %3744 = vmatpush.bf16.msra.mxu0 %v6040_v35  ;;  %v6048_v30 = vld [vmem:[#allocation13 + $0x78] sm:$0xff] }
 0x22b   :  { %3757 = vmatpush.bf16.msra.mxu1 %v6048_v30 }
 0x22d   :  { %3467 = vmatpush.bf16.msra.mxu3 %v5436_v63  ;;  %v6038_v63 = vld [vmem:[#allocation13 + $0x28] sm:$0xff] }
 0x22e   :  { %3745 = vmatpush.bf16.msra.mxu0 %v6039_v37  ;;  %v6058_v37 = vld [vmem:[#allocation13 + $0xc8] sm:$0xff] }
 0x22f   :  { %3758 = vmatpush.bf16.msra.mxu1 %v6047_v48 }
 0x230   :  { %3420 = vmatmul.bf16.vlgmr.msrb.gmra.mxu3 %v6552_v43 }
 0x231   :  { %3468 = vmatpush.bf16.msra.mxu3 %v5420_v16 }
 0x232   :  { %3746 = vmatpush.bf16.msra.mxu0 %v6038_v63 }
 0x235   :  { %3469 = vmatpush.bf16.msra.mxu3 %v5404_v47  ;;  %v6035_v47 = vld [vmem:[#allocation13 + $0x10] sm:$0xff] }
 0x236   :  { %3747 = vmatpush.bf16.msra.mxu0 %v6037_v39 }
 0x239   :  { %3470 = vmatpush.bf16.msra.mxu3 %v5388_v27  ;;  %v6046_v27 = vld [vmem:[#allocation13 + $0x68] sm:$0xff] }
 0x23a   :  { %3748 = vmatpush.bf16.msra.mxu0 %v6036_v4  ;;  %3759 = vmatpush.bf16.msra.mxu1 %v6046_v27 }
 0x23d   :  { %3471 = vmatpush.bf16.msra.mxu3 %v5372_v5  ;;  %v6043_v5 = vld [vmem:[#allocation13 + $0x50] sm:$0xff] }
 0x23e   :  { %3749 = vmatpush.bf16.msra.mxu0 %v6035_v47 }
 0x240   :  { %v3382_v17 = vpop.f32.mrf.mxu0  ;;  %v3395_v11 = vpop.f32.mrf.mxu1  ;;  %3472 = vmatmul.bf16.vlgmr.msra.gmra.mxu3 %v6552_v43 }
 0x241   :  { %v3383_v59 = vadd.f32 %v3382_v17, %v2674_v53  ;;  %3516 = vmatpush.bf16.msrb.mxu3 %v5488_v58  ;;  %v6045_v53 = vld [vmem:[#allocation13 + $0x60] sm:$0xff]  ;;  %v6055_v17 = vld [vmem:[#allocation13 + $0xb0] sm:$0xff]  ;;  %v6042_v58 = vld [vmem:[#allocation13 + $0x48] sm:$0xff] }
 0x242   :  { %3750 = vmatpush.bf16.msra.mxu0 %v6034_v50  ;;  %3760 = vmatpush.bf16.msra.mxu1 %v6045_v53 }
 0x243   :  { %v6566_v61 = vadd.f32 %v3395_v11, %v3383_v59  ;;  %3771 = vmatpush.bf16.msra.mxu2 %v6055_v17  ;;  %v6054_v59 = vld [vmem:[#allocation13 + $0xa8] sm:$0xff]  ;;  %v6041_v11 = vld [vmem:[#allocation13 + $0x40] sm:$0xff] }
 0x245   :  { %3517 = vmatpush.bf16.msrb.mxu3 %v5472_v3 }
 0x246   :  { %3751 = vmatpush.bf16.msra.mxu0 %v6033_v52  ;;  %3761 = vmatpush.bf16.msra.mxu1 %v6044_v56 }
 0x247   :  { %3772 = vmatpush.bf16.msra.mxu2 %v6054_v59 }
 0x248   :  { %v3384_v9 = vpop.f32.mrf.mxu0  ;;  %v3397_v6 = vpop.f32.mrf.mxu1 }
 0x249   :  { %3518 = vmatpush.bf16.msrb.mxu3 %v5456_v22  ;;  %v6051_v6 = vld [vmem:[#allocation13 + $0x90] sm:$0xff] }
 0x24a   :  { %3762 = vmatpush.bf16.msra.mxu1 %v6043_v5 }
 0x24b   :  { %3773 = vmatpush.bf16.msra.mxu2 %v6053_v24 }
 0x24d   :  { %3519 = vmatpush.bf16.msrb.mxu3 %v5440_v40 }
 0x24e   :  { %3763 = vmatpush.bf16.msra.mxu1 %v6042_v58 }
 0x24f   :  { %3774 = vmatpush.bf16.msra.mxu2 %v6052_v1 }
 0x251   :  { %3520 = vmatpush.bf16.msrb.mxu3 %v5424_v54 }
 0x252   :  { %3764 = vmatpush.bf16.msra.mxu1 %v6041_v11 }
 0x253   :  { %3775 = vmatpush.bf16.msra.mxu2 %v6051_v6 }
 0x255   :  { %3521 = vmatpush.bf16.msrb.mxu3 %v5408_v0 }
 0x257   :  { %3776 = vmatpush.bf16.msra.mxu2 %v6050_v7 }
 0x259   :  { %3522 = vmatpush.bf16.msrb.mxu3 %v5392_v26  ;;  %v6063_v26 = vld [vmem:[#allocation13 + $0xf0] sm:$0xff] }
 0x25b   :  { %3777 = vmatpush.bf16.msra.mxu2 %v6049_v14 }
 0x25d   :  { %3523 = vmatpush.bf16.msrb.mxu3 %v5376_v19  ;;  %v6061_v19 = vld [vmem:[#allocation13 + $0xe0] sm:$0xff] }
 0x260   :  { %v3434_v23 = vpop.f32.mrf.mxu0  ;;  %v3447_v25 = vpop.f32.mrf.mxu1  ;;  %3524 = vmatmul.bf16.vlgmr.msrb.gmra.mxu3 %v6552_v43 }
 0x261   :  { %v3435_v2 = vadd.f32 %v3434_v23, %v2675_v36 }
 0x263   :  { %v6570_v13 = vadd.f32 %v3447_v25, %v3435_v2 }
 0x264   :  { %v3356_v32 = vpop.f32.mrf.mxu2 }
 0x265   :  { %v3357_v38 = vadd.f32 %v3356_v32, %v6562_v45  ;;  %v6064_v45 = vld [vmem:[#allocation13 + $0xf8] sm:$0xff] }
 0x266   :  { %3783 = vmatpush.bf16.msra.mxu3 %v6064_v45 }
 0x268   :  { %v3436_v28 = vpop.f32.mrf.mxu0  ;;  %v3449_v31 = vpop.f32.mrf.mxu1 }
 0x269   :  { %v6060_v28 = vld [vmem:[#allocation13 + $0xd8] sm:$0xff] }
 0x26a   :  { %3784 = vmatpush.bf16.msra.mxu3 %v6063_v26 }
 0x26c   :  { %v3358_v34 = vpop.f32.mrf.mxu2 }
 0x26e   :  { %3785 = vmatpush.bf16.msra.mxu3 %v6062_v21 }
 0x272   :  { %3786 = vmatpush.bf16.msra.mxu3 %v6061_v19 }
 0x274   :  { %v3408_v33 = vpop.f32.mrf.mxu2 }
 0x275   :  { %v3409_v8 = vadd.f32 %v3408_v33, %v6566_v61 }
 0x276   :  { %3787 = vmatpush.bf16.msra.mxu3 %v6060_v28 }
 0x27c   :  { %v3410_v46 = vpop.f32.mrf.mxu2 }
 0x280   :  { %v3486_v10 = vpop.f32.mrf.mxu0  ;;  %v3499_v42 = vpop.f32.mrf.mxu1 }
 0x281   :  { %v3487_v41 = vadd.f32 %v3486_v10, %v2676_v20  ;;  %v6059_v20 = vld [vmem:[#allocation13 + $0xd0] sm:$0xff] }
 0x282   :  { %3788 = vmatpush.bf16.msra.mxu3 %v6059_v20 }
 0x283   :  { %v6574_v44 = vadd.f32 %v3499_v42, %v3487_v41  ;;  %v6057_v41 = vld [vmem:[#allocation13 + $0xc0] sm:$0xff] }
 0x284   :  { %v6576_v29 = vpop.f32.mrf.mxu2 }
 0x285   :  { %v3461_v61 = vadd.f32 %v6576_v29, %v6570_v13 }
 0x286   :  { %3789 = vmatpush.bf16.msra.mxu3 %v6058_v37 }
 0x288   :  { %v3488_v43 = vpop.f32.mrf.mxu0  ;;  %v3501_v16 = vpop.f32.mrf.mxu1 }
 0x28a   :  { %3790 = vmatpush.bf16.msra.mxu3 %v6057_v41 }
 0x28c   :  { %v3462_v51 = vpop.f32.mrf.mxu2 }
 0x2a3   :  { %v3369_v3 = vpop.f32.mrf.mxu3 }
 0x2a4   :  { %v3370_v62 = vadd.f32 %v3369_v3, %v3357_v38  ;;  %v3512_v22 = vpop.f32.mrf.mxu2 }
 0x2a5   :  { %v3513_v13 = vadd.f32 %v3512_v22, %v6574_v44  ;;  %v6079_v44 = vld [vmem:[%s6597_s8] ss:$0 sm:$0xff] }
 0x2a6   :  { %v3529_v9 = vmul.f32 0.5, %v3370_v62 }
 0x2a8   :  { %6104 = vtanh.f32 %v3529_v9 }
 0x2ab   :  { %v3371_v55 = vpop.f32.mrf.mxu3 }
 0x2ac   :  { %v3514_v49 = vpop.f32.mrf.mxu2 }
 0x2ae   :  { %v6105_v40 = vpop.eup %6104 }
 0x2af   :  { %v3537_v12 = vmul.f32 0.5, %v6105_v40 }
 0x2b1   :  { %v3541_v54 = vadd.f32 0.5, %v3537_v12 }
 0x2b3   :  { %v3545_v0 = vpack.c.bf16 %v3541_v54, %v3541_v54  ;;  %v3421_v60 = vpop.f32.mrf.mxu3 }
 0x2b4   :  { %v3422_v15 = vadd.f32 %v3421_v60, %v3409_v8 }
 0x2b5   :  { %3752 = vmatmul.bf16.vlgmr.msra.gmra.mxu0 %v3545_v0 }
 0x2b6   :  { %v3530_v18 = vmul.f32 0.5, %v3422_v15 }
 0x2b8   :  { %6106 = vtanh.f32 %v3530_v18 }
 0x2bb   :  { %v3423_v36 = vpop.f32.mrf.mxu3 }
 0x2be   :  { %v6107_v23 = vpop.eup %6106 }
 0x2bf   :  { %v3538_v2 = vmul.f32 0.5, %v6107_v23 }
 0x2c1   :  { %v3542_v25 = vadd.f32 0.5, %v3538_v2 }
 0x2c3   :  { %v3546_v31 = vpack.c.bf16 %v3542_v25, %v3542_v25  ;;  %v3473_v32 = vpop.f32.mrf.mxu3 }
 0x2c4   :  { %v3474_v34 = vadd.f32 %v3473_v32, %v3461_v61 }
 0x2c5   :  { %3765 = vmatmul.bf16.vlgmr.msra.gmra.mxu1 %v3546_v31 }
 0x2c6   :  { %v3531_v35 = vmul.f32 0.5, %v3474_v34 }
 0x2c8   :  { %6108 = vtanh.f32 %v3531_v35 }
 0x2cb   :  { %v3475_v10 = vpop.f32.mrf.mxu3 }
 0x2ce   :  { %v6109_v42 = vpop.eup %6108 }
 0x2cf   :  { %v3539_v63 = vmul.f32 0.5, %v6109_v42 }
 0x2d1   :  { %v3543_v33 = vadd.f32 0.5, %v3539_v63 }
 0x2d3   :  { %v3547_v39 = vpack.c.bf16 %v3543_v33, %v3543_v33 }
 0x2d5   :  { %3778 = vmatmul.bf16.vlgmr.msra.gmra.mxu2 %v3547_v39 }
 0x2e3   :  { %v3525_v43 = vpop.f32.mrf.mxu3 }
 0x2e4   :  { %v3526_v16 = vadd.f32 %v3525_v43, %v3513_v13 }
 0x2e6   :  { %v3532_v46 = vmul.f32 0.5, %v3526_v16 }
 0x2e8   :  { %6110 = vtanh.f32 %v3532_v46 }
 0x2eb   :  { %v3527_v4 = vpop.f32.mrf.mxu3 }
 0x2ee   :  { %v6111_v30 = vpop.eup %6110 }
 0x2ef   :  { %v3540_v29 = vmul.f32 0.5, %v6111_v30 }
 0x2f1   :  { %v3544_v47 = vadd.f32 0.5, %v3540_v29 }
 0x2f3   :  { %v3548_v48 = vpack.c.bf16 %v3544_v47, %v3544_v47 }
 0x2f5   :  { %3791 = vmatmul.bf16.vlgmr.msra.gmra.mxu3 %v3548_v48 }
 0x332   :  { %v3753_v50 = vpop.f32.mrf.mxu0 }
 0x333   :  { %v3754_v57 = vadd.f32 %v6079_v44, %v3753_v50 }
 0x33a   :  { %v3755_v27 = vpop.f32.mrf.mxu0 }
 0x342   :  { %v3766_v51 = vpop.f32.mrf.mxu1 }
 0x343   :  { %v3767_v5 = vadd.f32 %v3766_v51, %v3754_v57 }
 0x34a   :  { %v3768_v52 = vpop.f32.mrf.mxu1 }
 0x358   :  { %v3779_v53 = vpop.f32.mrf.mxu2 }
 0x359   :  { %v3780_v17 = vadd.f32 %v3779_v53, %v3767_v5 }
 0x360   :  { %v3781_v56 = vpop.f32.mrf.mxu2 }
 0x378   :  { %v3792_v58 = vpop.f32.mrf.mxu3 }
 0x379   :  { %v3793_v59 = vadd.f32 %v3792_v58, %v3780_v17 }
 0x37b   :  { %3796 = vst [vmem:[#allocation14] sm:$0xff] %v3793_v59 }
 0x37c   :  { %3807 = dma.vmem_to_hbm [thread:$0]  %s3803_s25, 128, %s3805_s3, [#allocation4]  }
 0x380   :  { %v3794_v11 = vpop.f32.mrf.mxu3 }
 0x381   :  { %6313 = dma.done.wait [#allocation4], 128  }
 0x382   :  { %6314 = vsyncadd [#allocation4], 4294967168 }
 0x383   :  { %3812 = vsyncpa [#allocation3], 1 }
 0x384   :  { %3813 = vsyncpa [#allocation6], 1 }
 0x385   :  { %3814 = vsyncpa [#allocation9], 1 }
 0x386   :  { %3815 = vsyncpa [#allocation12], 1 }
 0x387   :  { %3816 = vsyncpa [#allocation4], 1 }

</bundles_post_ra>
